<compile_context>
chip_gen: v6e
topology: v6e:2x2x1
jax: 0.10.0
libtpu: 0.0.40
codegen_flags: <defaults>
</compile_context>

<pallas_src>
import jax
import jax.numpy as jnp
from jax import lax
from jax.experimental import pallas as pl
from jax.experimental.pallas import tpu as pltpu


# --------------------------- Pallas recurrence kernel ---------------------------
def _bilstm_recurrence_kernel(pre_ref, whh_ref, out_ref):
    """Fused bidirectional LSTM recurrence.

    pre_ref : (T, B, 8H) f32  pre-activations x@W_ih + b, columns ordered
                              [fwd: i,f,o,g | bwd: i,f,o,g]
    whh_ref : (2H, 8H)        block-diagonal recurrent weights (same column order)
    out_ref : (2, T, B, H)    out[0] = forward hidden states, out[1] = backward
    """
    T, B, G = pre_ref.shape
    H = G // 8
    H2, H3, H4 = 2 * H, 3 * H, 4 * H

    whh = whh_ref[...]                      # hoisted: loaded once, reused every step

    def step(t, carry):
        h_cat, c_f, c_b = carry             # (B,2H), (B,H), (B,H)
        tb = T - 1 - t

        # One fused recurrent matmul for both directions (single MXU issue/step).
        rec = jnp.dot(h_cat.astype(whh.dtype), whh,
                      preferred_element_type=jnp.float32)          # (B, 8H)

        pre_f = pre_ref[t]                  # (B, 8H): fwd columns valid for time t
        pre_b = pre_ref[tb]                 # (B, 8H): bwd columns valid for time T-1-t
        gates_f = rec[:, :H4] + pre_f[:, :H4]
        gates_b = rec[:, H4:] + pre_b[:, H4:]

        # Gate order [i, f, o, g]: one sigmoid slab + one tanh slab per direction.
        sig_f = jax.nn.sigmoid(gates_f[:, :H3])
        sig_b = jax.nn.sigmoid(gates_b[:, :H3])
        g_f = jnp.tanh(gates_f[:, H3:])
        g_b = jnp.tanh(gates_b[:, H3:])

        c_f_new = sig_f[:, H:H2] * c_f + sig_f[:, :H] * g_f
        c_b_new = sig_b[:, H:H2] * c_b + sig_b[:, :H] * g_b
        h_f = sig_f[:, H2:H3] * jnp.tanh(c_f_new)
        h_b = sig_b[:, H2:H3] * jnp.tanh(c_b_new)

        # Stores only index leading (untiled) axes.
        out_ref[0, t] = h_f
        out_ref[1, tb] = h_b

        h_cat_new = jnp.concatenate([h_f, h_b], axis=1)            # (B, 2H)
        return (h_cat_new, c_f_new, c_b_new)

    init = (jnp.zeros((B, H2), jnp.float32),
            jnp.zeros((B, H), jnp.float32),
            jnp.zeros((B, H), jnp.float32))
    # Unrolled fori_loop gives the LLO scheduler cross-iteration visibility.
    unroll = True if T <= 32 else 4
    lax.fori_loop(0, T, step, init, unroll=unroll)


# ------------------------------- wrapper / driver -------------------------------
def _reorder_gates(w, H):
    """Reorder PyTorch gate blocks [i|f|g|o] -> [i|f|o|g] along the last axis."""
    return jnp.concatenate(
        [w[..., 0:2 * H], w[..., 3 * H:4 * H], w[..., 2 * H:3 * H]], axis=-1)


def bilstm_pallas(x, params, *, use_bf16_matmul=False):
    """x: (B, T, D) float32.  Returns (B, T, 2H) float32."""
    B, T, D = x.shape
    H = params["whh_f"].shape[1]            # weight_hh: (4H, H)

    # Per-direction weights, transposed and gate-reordered to [i,f,o,g].
    Wf = _reorder_gates(params["wih_f"].T, H)                      # (D, 4H)
    Wb = _reorder_gates(params["wih_b"].T, H)                      # (D, 4H)
    Rf = _reorder_gates(params["whh_f"].T, H)                      # (H, 4H)
    Rb = _reorder_gates(params["whh_b"].T, H)                      # (H, 4H)
    bf = _reorder_gates(params["bih_f"] + params["bhh_f"], H)      # (4H,)
    bb = _reorder_gates(params["bih_b"] + params["bhh_b"], H)      # (4H,)

    w_ih = jnp.concatenate([Wf, Wb], axis=1)                       # (D, 8H)
    bias = jnp.concatenate([bf, bb])[None, None, :]                # (1, 1, 8H)
    Z = jnp.zeros((H, 4 * H), jnp.float32)
    whh = jnp.concatenate(
        [jnp.concatenate([Rf, Z], axis=1),
         jnp.concatenate([Z, Rb], axis=1)], axis=0)                # (2H, 8H) block-diag

    mm_dtype = jnp.bfloat16 if use_bf16_matmul else jnp.float32

    # Hoisted input projection: one MXU-friendly GEMM for the whole sequence and
    # both directions, bias folded in; produced directly in time-major layout.
    pre = jnp.einsum(
        "btd,dg->tbg", x.astype(mm_dtype), w_ih.astype(mm_dtype),
        preferred_element_type=jnp.float32,
        precision=lax.Precision.HIGHEST) + bias                    # (T, B, 8H) f32

    vspec = pl.BlockSpec(memory_space=pltpu.MemorySpace.VMEM)
    out_dir = pl.pallas_call(
        _bilstm_recurrence_kernel,
        out_shape=jax.ShapeDtypeStruct((2, T, B, H), jnp.float32),
        in_specs=[vspec, vspec],
        out_specs=vspec,
        compiler_params=pltpu.CompilerParams(
            vmem_limit_bytes=32 * 1024 * 1024),  # raise further for large T*B*H
    )(pre, whh.astype(mm_dtype))

    # (2,T,B,H) -> (B,T,2,H) -> (B,T,2H): single fused relayout under jit.
    return jnp.transpose(out_dir, (2, 1, 0, 3)).reshape(B, T, 2 * H)


def output_lstm_forward(x, params):
    """Exact forward of Output_LSTM at inference (dropout == identity)."""
    # TODO(synk): training-mode dropout (pltpu PRNG) not implemented; eval is identity.
    return bilstm_pallas(x, params)


# ----------------------- pure-JAX reference (for checking) -----------------------
def _lstm_dir_ref(x, wih, whh, bih, bhh, reverse):
    B, T, D = x.shape
    H = whh.shape[1]
    xs = jnp.flip(x, axis=1) if reverse else x

    def step(carry, x_t):
        h, c = carry
        gates = x_t @ wih.T + h @ whh.T + bih + bhh
        i = jax.nn.sigmoid(gates[:, 0 * H:1 * H])
        f = jax.nn.sigmoid(gates[:, 1 * H:2 * H])
        g = jnp.tanh(gates[:, 2 * H:3 * H])
        o = jax.nn.sigmoid(gates[:, 3 * H:4 * H])
        c = f * c + i * g
        h = o * jnp.tanh(c)
        return (h, c), h

    h0 = jnp.zeros((B, H), jnp.float32)
    _, hs = jax.lax.scan(step, (h0, h0), jnp.transpose(xs, (1, 0, 2)))
    hs = jnp.transpose(hs, (1, 0, 2))
    return jnp.flip(hs, axis=1) if reverse else hs


def bilstm_ref(x, p):
    fwd = _lstm_dir_ref(x, p["wih_f"], p["whh_f"], p["bih_f"], p["bhh_f"], False)
    bwd = _lstm_dir_ref(x, p["wih_b"], p["whh_b"], p["bih_b"], p["bhh_b"], True)
    return jnp.concatenate([fwd, bwd], axis=-1)


# ------------------------------------ main ------------------------------------
def _init_lstm_params(key, input_dim, hidden_dim):
    ks = jax.random.split(key, 8)
    s = 1.0 / jnp.sqrt(hidden_dim)
    u = lambda k, shape: jax.random.uniform(k, shape, jnp.float32, -s, s)
    return {
        "wih_f": u(ks[0], (4 * hidden_dim, input_dim)),
        "whh_f": u(ks[1], (4 * hidden_dim, hidden_dim)),
        "bih_f": u(ks[2], (4 * hidden_dim,)),
        "bhh_f": u(ks[3], (4 * hidden_dim,)),
        "wih_b": u(ks[4], (4 * hidden_dim, input_dim)),
        "whh_b": u(ks[5], (4 * hidden_dim, hidden_dim)),
        "bih_b": u(ks[6], (4 * hidden_dim,)),
        "bhh_b": u(ks[7], (4 * hidden_dim,)),
    }


if __name__ == "__main__":
    # Full-precision f32 matmuls everywhere so kernel and reference match tightly.
    jax.config.update("jax_default_matmul_precision", "highest")

    B, T, D, H = 2, 8, 16, 32          # batch, seq, input_dim, hidden_dim
    key = jax.random.PRNGKey(0)
    kx, kp = jax.random.split(key)

    x = jax.random.normal(kx, (B, T, D), jnp.float32)
    params = _init_lstm_params(kp, D, H)

    out = jax.jit(output_lstm_forward)(x, params)
    out = jax.block_until_ready(out)

    ref = bilstm_ref(x, params)
    assert out.shape == (B, T, 2 * H), out.shape
    assert jnp.allclose(out, ref, atol=2e-5, rtol=1e-5), (
        f"max abs err {jnp.max(jnp.abs(out - ref))}")

    print("KERNEL_OK")
</pallas_src>

<mosaic_0001>
module attributes {stable_mosaic.version = 11 : i64} {
  func.func @_bilstm_recurrence_kernel(%arg0: memref<8x2x256xf32, #tpu.memory_space<vmem>>, %arg1: memref<64x256xf32, #tpu.memory_space<vmem>>, %arg2: memref<2x8x2x32xf32, #tpu.memory_space<vmem>>) attributes {dimension_semantics = [], scalar_prefetch = 0 : i64, scratch_operands = 0 : i64, tpu.core_type = #tpu.core_type<tc>} {
    %c0 = arith.constant 0 : index
    %c0_0 = arith.constant 0 : index
    %0 = vector.load %arg1[%c0, %c0_0] : memref<64x256xf32, #tpu.memory_space<vmem>>, vector<64x256xf32>
    %cst = arith.constant 0.000000e+00 : f32
    %1 = vector.broadcast %cst : f32 to vector<2x64xf32>
    %cst_1 = arith.constant 0.000000e+00 : f32
    %2 = vector.broadcast %cst_1 : f32 to vector<2x32xf32>
    %cst_2 = arith.constant 0.000000e+00 : f32
    %3 = vector.broadcast %cst_2 : f32 to vector<2x32xf32>
    %c0_i32 = arith.constant 0 : i32
    %c7_i32 = arith.constant 7 : i32
    %4 = arith.subi %c7_i32, %c0_i32 : i32
    %cst_3 = arith.constant dense<0.000000e+00> : vector<2x256xf32>
    %5 = tpu.matmul %1, %0, %cst_3 {dimension_numbers = #tpu.dot_dimension_numbers<[1], [0], [0], [1], [0, 0, 1, 1], [], []>, precision = #tpu.contract_precision<fp32>} : vector<2x64xf32>, vector<64x256xf32>, vector<2x256xf32> -> vector<2x256xf32>
    %6 = arith.index_cast %c0_i32 : i32 to index
    %c0_4 = arith.constant 0 : index
    %c0_5 = arith.constant 0 : index
    %7 = vector.load %arg0[%6, %c0_4, %c0_5] : memref<8x2x256xf32, #tpu.memory_space<vmem>>, vector<1x2x256xf32>
    %8 = vector.shape_cast %7 : vector<1x2x256xf32> to vector<2x256xf32>
    %9 = arith.index_cast %4 : i32 to index
    %c0_6 = arith.constant 0 : index
    %c0_7 = arith.constant 0 : index
    %10 = vector.load %arg0[%9, %c0_6, %c0_7] : memref<8x2x256xf32, #tpu.memory_space<vmem>>, vector<1x2x256xf32>
    %11 = vector.shape_cast %10 : vector<1x2x256xf32> to vector<2x256xf32>
    %12 = vector.extract_strided_slice %5 {offsets = [0, 0], sizes = [2, 128], strides = [1, 1]} : vector<2x256xf32> to vector<2x128xf32>
    %13 = vector.extract_strided_slice %8 {offsets = [0, 0], sizes = [2, 128], strides = [1, 1]} : vector<2x256xf32> to vector<2x128xf32>
    %14 = arith.addf %12, %13 : vector<2x128xf32>
    %15 = vector.extract_strided_slice %5 {offsets = [0, 128], sizes = [2, 128], strides = [1, 1]} : vector<2x256xf32> to vector<2x128xf32>
    %16 = vector.extract_strided_slice %11 {offsets = [0, 128], sizes = [2, 128], strides = [1, 1]} : vector<2x256xf32> to vector<2x128xf32>
    %17 = arith.addf %15, %16 : vector<2x128xf32>
    %18 = vector.extract_strided_slice %14 {offsets = [0, 0], sizes = [2, 96], strides = [1, 1]} : vector<2x128xf32> to vector<2x96xf32>
    %19 = arith.negf %18 : vector<2x96xf32>
    %20 = math.exp %19 : vector<2x96xf32>
    %cst_8 = arith.constant 1.000000e+00 : f32
    %21 = vector.broadcast %cst_8 : f32 to vector<2x96xf32>
    %22 = arith.addf %21, %20 : vector<2x96xf32>
    %23 = arith.divf %21, %22 : vector<2x96xf32>
    %24 = vector.extract_strided_slice %17 {offsets = [0, 0], sizes = [2, 96], strides = [1, 1]} : vector<2x128xf32> to vector<2x96xf32>
    %25 = arith.negf %24 : vector<2x96xf32>
    %26 = math.exp %25 : vector<2x96xf32>
    %cst_9 = arith.constant 1.000000e+00 : f32
    %27 = vector.broadcast %cst_9 : f32 to vector<2x96xf32>
    %28 = arith.addf %27, %26 : vector<2x96xf32>
    %29 = arith.divf %27, %28 : vector<2x96xf32>
    %30 = vector.extract_strided_slice %14 {offsets = [0, 96], sizes = [2, 32], strides = [1, 1]} : vector<2x128xf32> to vector<2x32xf32>
    %31 = math.tanh %30 : vector<2x32xf32>
    %32 = vector.extract_strided_slice %17 {offsets = [0, 96], sizes = [2, 32], strides = [1, 1]} : vector<2x128xf32> to vector<2x32xf32>
    %33 = math.tanh %32 : vector<2x32xf32>
    %34 = vector.extract_strided_slice %23 {offsets = [0, 32], sizes = [2, 32], strides = [1, 1]} : vector<2x96xf32> to vector<2x32xf32>
    %35 = arith.mulf %34, %2 : vector<2x32xf32>
    %36 = vector.extract_strided_slice %23 {offsets = [0, 0], sizes = [2, 32], strides = [1, 1]} : vector<2x96xf32> to vector<2x32xf32>
    %37 = arith.mulf %36, %31 : vector<2x32xf32>
    %38 = arith.addf %35, %37 : vector<2x32xf32>
    %39 = vector.extract_strided_slice %29 {offsets = [0, 32], sizes = [2, 32], strides = [1, 1]} : vector<2x96xf32> to vector<2x32xf32>
    %40 = arith.mulf %39, %3 : vector<2x32xf32>
    %41 = vector.extract_strided_slice %29 {offsets = [0, 0], sizes = [2, 32], strides = [1, 1]} : vector<2x96xf32> to vector<2x32xf32>
    %42 = arith.mulf %41, %33 : vector<2x32xf32>
    %43 = arith.addf %40, %42 : vector<2x32xf32>
    %44 = vector.extract_strided_slice %23 {offsets = [0, 64], sizes = [2, 32], strides = [1, 1]} : vector<2x96xf32> to vector<2x32xf32>
    %45 = math.tanh %38 : vector<2x32xf32>
    %46 = arith.mulf %44, %45 : vector<2x32xf32>
    %47 = vector.extract_strided_slice %29 {offsets = [0, 64], sizes = [2, 32], strides = [1, 1]} : vector<2x96xf32> to vector<2x32xf32>
    %48 = math.tanh %43 : vector<2x32xf32>
    %49 = arith.mulf %47, %48 : vector<2x32xf32>
    %c0_10 = arith.constant 0 : index
    %50 = arith.index_cast %c0_i32 : i32 to index
    %c0_11 = arith.constant 0 : index
    %c0_12 = arith.constant 0 : index
    %51 = vector.load %arg2[%c0_10, %50, %c0_11, %c0_12] : memref<2x8x2x32xf32, #tpu.memory_space<vmem>>, vector<1x1x2x32xf32>
    %52 = vector.shape_cast %51 : vector<1x1x2x32xf32> to vector<2x32xf32>
    %53 = vector.shape_cast %46 : vector<2x32xf32> to vector<1x1x2x32xf32>
    tpu.vector_store %arg2[%c0_10, %50, %c0_11, %c0_12], %53 {strides = array<i32>} : memref<2x8x2x32xf32, #tpu.memory_space<vmem>>, vector<1x1x2x32xf32>,
    %c1 = arith.constant 1 : index
    %54 = arith.index_cast %4 : i32 to index
    %c0_13 = arith.constant 0 : index
    %c0_14 = arith.constant 0 : index
    %55 = vector.load %arg2[%c1, %54, %c0_13, %c0_14] : memref<2x8x2x32xf32, #tpu.memory_space<vmem>>, vector<1x1x2x32xf32>
    %56 = vector.shape_cast %55 : vector<1x1x2x32xf32> to vector<2x32xf32>
    %57 = vector.shape_cast %49 : vector<2x32xf32> to vector<1x1x2x32xf32>
    tpu.vector_store %arg2[%c1, %54, %c0_13, %c0_14], %57 {strides = array<i32>} : memref<2x8x2x32xf32, #tpu.memory_space<vmem>>, vector<1x1x2x32xf32>,
    %58 = tpu.concatenate %46, %49 in 1 : vector<2x32xf32>, vector<2x32xf32> -> vector<2x64xf32>
    %c1_i32 = arith.constant 1 : i32
    %c7_i32_15 = arith.constant 7 : i32
    %59 = arith.subi %c7_i32_15, %c1_i32 : i32
    %cst_16 = arith.constant dense<0.000000e+00> : vector<2x256xf32>
    %60 = tpu.matmul %58, %0, %cst_16 {dimension_numbers = #tpu.dot_dimension_numbers<[1], [0], [0], [1], [0, 0, 1, 1], [], []>, precision = #tpu.contract_precision<fp32>} : vector<2x64xf32>, vector<64x256xf32>, vector<2x256xf32> -> vector<2x256xf32>
    %61 = arith.index_cast %c1_i32 : i32 to index
    %c0_17 = arith.constant 0 : index
    %c0_18 = arith.constant 0 : index
    %62 = vector.load %arg0[%61, %c0_17, %c0_18] : memref<8x2x256xf32, #tpu.memory_space<vmem>>, vector<1x2x256xf32>
    %63 = vector.shape_cast %62 : vector<1x2x256xf32> to vector<2x256xf32>
    %64 = arith.index_cast %59 : i32 to index
    %c0_19 = arith.constant 0 : index
    %c0_20 = arith.constant 0 : index
    %65 = vector.load %arg0[%64, %c0_19, %c0_20] : memref<8x2x256xf32, #tpu.memory_space<vmem>>, vector<1x2x256xf32>
    %66 = vector.shape_cast %65 : vector<1x2x256xf32> to vector<2x256xf32>
    %67 = vector.extract_strided_slice %60 {offsets = [0, 0], sizes = [2, 128], strides = [1, 1]} : vector<2x256xf32> to vector<2x128xf32>
    %68 = vector.extract_strided_slice %63 {offsets = [0, 0], sizes = [2, 128], strides = [1, 1]} : vector<2x256xf32> to vector<2x128xf32>
    %69 = arith.addf %67, %68 : vector<2x128xf32>
    %70 = vector.extract_strided_slice %60 {offsets = [0, 128], sizes = [2, 128], strides = [1, 1]} : vector<2x256xf32> to vector<2x128xf32>
    %71 = vector.extract_strided_slice %66 {offsets = [0, 128], sizes = [2, 128], strides = [1, 1]} : vector<2x256xf32> to vector<2x128xf32>
    %72 = arith.addf %70, %71 : vector<2x128xf32>
    %73 = vector.extract_strided_slice %69 {offsets = [0, 0], sizes = [2, 96], strides = [1, 1]} : vector<2x128xf32> to vector<2x96xf32>
    %74 = arith.negf %73 : vector<2x96xf32>
    %75 = math.exp %74 : vector<2x96xf32>
    %cst_21 = arith.constant 1.000000e+00 : f32
    %76 = vector.broadcast %cst_21 : f32 to vector<2x96xf32>
    %77 = arith.addf %76, %75 : vector<2x96xf32>
    %78 = arith.divf %76, %77 : vector<2x96xf32>
    %79 = vector.extract_strided_slice %72 {offsets = [0, 0], sizes = [2, 96], strides = [1, 1]} : vector<2x128xf32> to vector<2x96xf32>
    %80 = arith.negf %79 : vector<2x96xf32>
    %81 = math.exp %80 : vector<2x96xf32>
    %cst_22 = arith.constant 1.000000e+00 : f32
    %82 = vector.broadcast %cst_22 : f32 to vector<2x96xf32>
    %83 = arith.addf %82, %81 : vector<2x96xf32>
    %84 = arith.divf %82, %83 : vector<2x96xf32>
    %85 = vector.extract_strided_slice %69 {offsets = [0, 96], sizes = [2, 32], strides = [1, 1]} : vector<2x128xf32> to vector<2x32xf32>
    %86 = math.tanh %85 : vector<2x32xf32>
    %87 = vector.extract_strided_slice %72 {offsets = [0, 96], sizes = [2, 32], strides = [1, 1]} : vector<2x128xf32> to vector<2x32xf32>
    %88 = math.tanh %87 : vector<2x32xf32>
    %89 = vector.extract_strided_slice %78 {offsets = [0, 32], sizes = [2, 32], strides = [1, 1]} : vector<2x96xf32> to vector<2x32xf32>
    %90 = arith.mulf %89, %38 : vector<2x32xf32>
    %91 = vector.extract_strided_slice %78 {offsets = [0, 0], sizes = [2, 32], strides = [1, 1]} : vector<2x96xf32> to vector<2x32xf32>
    %92 = arith.mulf %91, %86 : vector<2x32xf32>
    %93 = arith.addf %90, %92 : vector<2x32xf32>
    %94 = vector.extract_strided_slice %84 {offsets = [0, 32], sizes = [2, 32], strides = [1, 1]} : vector<2x96xf32> to vector<2x32xf32>
    %95 = arith.mulf %94, %43 : vector<2x32xf32>
    %96 = vector.extract_strided_slice %84 {offsets = [0, 0], sizes = [2, 32], strides = [1, 1]} : vector<2x96xf32> to vector<2x32xf32>
    %97 = arith.mulf %96, %88 : vector<2x32xf32>
    %98 = arith.addf %95, %97 : vector<2x32xf32>
    %99 = vector.extract_strided_slice %78 {offsets = [0, 64], sizes = [2, 32], strides = [1, 1]} : vector<2x96xf32> to vector<2x32xf32>
    %100 = math.tanh %93 : vector<2x32xf32>
    %101 = arith.mulf %99, %100 : vector<2x32xf32>
    %102 = vector.extract_strided_slice %84 {offsets = [0, 64], sizes = [2, 32], strides = [1, 1]} : vector<2x96xf32> to vector<2x32xf32>
    %103 = math.tanh %98 : vector<2x32xf32>
    %104 = arith.mulf %102, %103 : vector<2x32xf32>
    %c0_23 = arith.constant 0 : index
    %105 = arith.index_cast %c1_i32 : i32 to index
    %c0_24 = arith.constant 0 : index
    %c0_25 = arith.constant 0 : index
    %106 = vector.load %arg2[%c0_23, %105, %c0_24, %c0_25] : memref<2x8x2x32xf32, #tpu.memory_space<vmem>>, vector<1x1x2x32xf32>
    %107 = vector.shape_cast %106 : vector<1x1x2x32xf32> to vector<2x32xf32>
    %108 = vector.shape_cast %101 : vector<2x32xf32> to vector<1x1x2x32xf32>
    tpu.vector_store %arg2[%c0_23, %105, %c0_24, %c0_25], %108 {strides = array<i32>} : memref<2x8x2x32xf32, #tpu.memory_space<vmem>>, vector<1x1x2x32xf32>,
    %c1_26 = arith.constant 1 : index
    %109 = arith.index_cast %59 : i32 to index
    %c0_27 = arith.constant 0 : index
    %c0_28 = arith.constant 0 : index
    %110 = vector.load %arg2[%c1_26, %109, %c0_27, %c0_28] : memref<2x8x2x32xf32, #tpu.memory_space<vmem>>, vector<1x1x2x32xf32>
    %111 = vector.shape_cast %110 : vector<1x1x2x32xf32> to vector<2x32xf32>
    %112 = vector.shape_cast %104 : vector<2x32xf32> to vector<1x1x2x32xf32>
    tpu.vector_store %arg2[%c1_26, %109, %c0_27, %c0_28], %112 {strides = array<i32>} : memref<2x8x2x32xf32, #tpu.memory_space<vmem>>, vector<1x1x2x32xf32>,
    %113 = tpu.concatenate %101, %104 in 1 : vector<2x32xf32>, vector<2x32xf32> -> vector<2x64xf32>
    %c2_i32 = arith.constant 2 : i32
    %c7_i32_29 = arith.constant 7 : i32
    %114 = arith.subi %c7_i32_29, %c2_i32 : i32
    %cst_30 = arith.constant dense<0.000000e+00> : vector<2x256xf32>
    %115 = tpu.matmul %113, %0, %cst_30 {dimension_numbers = #tpu.dot_dimension_numbers<[1], [0], [0], [1], [0, 0, 1, 1], [], []>, precision = #tpu.contract_precision<fp32>} : vector<2x64xf32>, vector<64x256xf32>, vector<2x256xf32> -> vector<2x256xf32>
    %116 = arith.index_cast %c2_i32 : i32 to index
    %c0_31 = arith.constant 0 : index
    %c0_32 = arith.constant 0 : index
    %117 = vector.load %arg0[%116, %c0_31, %c0_32] : memref<8x2x256xf32, #tpu.memory_space<vmem>>, vector<1x2x256xf32>
    %118 = vector.shape_cast %117 : vector<1x2x256xf32> to vector<2x256xf32>
    %119 = arith.index_cast %114 : i32 to index
    %c0_33 = arith.constant 0 : index
    %c0_34 = arith.constant 0 : index
    %120 = vector.load %arg0[%119, %c0_33, %c0_34] : memref<8x2x256xf32, #tpu.memory_space<vmem>>, vector<1x2x256xf32>
    %121 = vector.shape_cast %120 : vector<1x2x256xf32> to vector<2x256xf32>
    %122 = vector.extract_strided_slice %115 {offsets = [0, 0], sizes = [2, 128], strides = [1, 1]} : vector<2x256xf32> to vector<2x128xf32>
    %123 = vector.extract_strided_slice %118 {offsets = [0, 0], sizes = [2, 128], strides = [1, 1]} : vector<2x256xf32> to vector<2x128xf32>
    %124 = arith.addf %122, %123 : vector<2x128xf32>
    %125 = vector.extract_strided_slice %115 {offsets = [0, 128], sizes = [2, 128], strides = [1, 1]} : vector<2x256xf32> to vector<2x128xf32>
    %126 = vector.extract_strided_slice %121 {offsets = [0, 128], sizes = [2, 128], strides = [1, 1]} : vector<2x256xf32> to vector<2x128xf32>
    %127 = arith.addf %125, %126 : vector<2x128xf32>
    %128 = vector.extract_strided_slice %124 {offsets = [0, 0], sizes = [2, 96], strides = [1, 1]} : vector<2x128xf32> to vector<2x96xf32>
    %129 = arith.negf %128 : vector<2x96xf32>
    %130 = math.exp %129 : vector<2x96xf32>
    %cst_35 = arith.constant 1.000000e+00 : f32
    %131 = vector.broadcast %cst_35 : f32 to vector<2x96xf32>
    %132 = arith.addf %131, %130 : vector<2x96xf32>
    %133 = arith.divf %131, %132 : vector<2x96xf32>
    %134 = vector.extract_strided_slice %127 {offsets = [0, 0], sizes = [2, 96], strides = [1, 1]} : vector<2x128xf32> to vector<2x96xf32>
    %135 = arith.negf %134 : vector<2x96xf32>
    %136 = math.exp %135 : vector<2x96xf32>
    %cst_36 = arith.constant 1.000000e+00 : f32
    %137 = vector.broadcast %cst_36 : f32 to vector<2x96xf32>
    %138 = arith.addf %137, %136 : vector<2x96xf32>
    %139 = arith.divf %137, %138 : vector<2x96xf32>
    %140 = vector.extract_strided_slice %124 {offsets = [0, 96], sizes = [2, 32], strides = [1, 1]} : vector<2x128xf32> to vector<2x32xf32>
    %141 = math.tanh %140 : vector<2x32xf32>
    %142 = vector.extract_strided_slice %127 {offsets = [0, 96], sizes = [2, 32], strides = [1, 1]} : vector<2x128xf32> to vector<2x32xf32>
    %143 = math.tanh %142 : vector<2x32xf32>
    %144 = vector.extract_strided_slice %133 {offsets = [0, 32], sizes = [2, 32], strides = [1, 1]} : vector<2x96xf32> to vector<2x32xf32>
    %145 = arith.mulf %144, %93 : vector<2x32xf32>
    %146 = vector.extract_strided_slice %133 {offsets = [0, 0], sizes = [2, 32], strides = [1, 1]} : vector<2x96xf32> to vector<2x32xf32>
    %147 = arith.mulf %146, %141 : vector<2x32xf32>
    %148 = arith.addf %145, %147 : vector<2x32xf32>
    %149 = vector.extract_strided_slice %139 {offsets = [0, 32], sizes = [2, 32], strides = [1, 1]} : vector<2x96xf32> to vector<2x32xf32>
    %150 = arith.mulf %149, %98 : vector<2x32xf32>
    %151 = vector.extract_strided_slice %139 {offsets = [0, 0], sizes = [2, 32], strides = [1, 1]} : vector<2x96xf32> to vector<2x32xf32>
    %152 = arith.mulf %151, %143 : vector<2x32xf32>
    %153 = arith.addf %150, %152 : vector<2x32xf32>
    %154 = vector.extract_strided_slice %133 {offsets = [0, 64], sizes = [2, 32], strides = [1, 1]} : vector<2x96xf32> to vector<2x32xf32>
    %155 = math.tanh %148 : vector<2x32xf32>
    %156 = arith.mulf %154, %155 : vector<2x32xf32>
    %157 = vector.extract_strided_slice %139 {offsets = [0, 64], sizes = [2, 32], strides = [1, 1]} : vector<2x96xf32> to vector<2x32xf32>
    %158 = math.tanh %153 : vector<2x32xf32>
    %159 = arith.mulf %157, %158 : vector<2x32xf32>
    %c0_37 = arith.constant 0 : index
    %160 = arith.index_cast %c2_i32 : i32 to index
    %c0_38 = arith.constant 0 : index
    %c0_39 = arith.constant 0 : index
    %161 = vector.load %arg2[%c0_37, %160, %c0_38, %c0_39] : memref<2x8x2x32xf32, #tpu.memory_space<vmem>>, vector<1x1x2x32xf32>
    %162 = vector.shape_cast %161 : vector<1x1x2x32xf32> to vector<2x32xf32>
    %163 = vector.shape_cast %156 : vector<2x32xf32> to vector<1x1x2x32xf32>
    tpu.vector_store %arg2[%c0_37, %160, %c0_38, %c0_39], %163 {strides = array<i32>} : memref<2x8x2x32xf32, #tpu.memory_space<vmem>>, vector<1x1x2x32xf32>,
    %c1_40 = arith.constant 1 : index
    %164 = arith.index_cast %114 : i32 to index
    %c0_41 = arith.constant 0 : index
    %c0_42 = arith.constant 0 : index
    %165 = vector.load %arg2[%c1_40, %164, %c0_41, %c0_42] : memref<2x8x2x32xf32, #tpu.memory_space<vmem>>, vector<1x1x2x32xf32>
    %166 = vector.shape_cast %165 : vector<1x1x2x32xf32> to vector<2x32xf32>
    %167 = vector.shape_cast %159 : vector<2x32xf32> to vector<1x1x2x32xf32>
    tpu.vector_store %arg2[%c1_40, %164, %c0_41, %c0_42], %167 {strides = array<i32>} : memref<2x8x2x32xf32, #tpu.memory_space<vmem>>, vector<1x1x2x32xf32>,
    %168 = tpu.concatenate %156, %159 in 1 : vector<2x32xf32>, vector<2x32xf32> -> vector<2x64xf32>
    %c3_i32 = arith.constant 3 : i32
    %c7_i32_43 = arith.constant 7 : i32
    %169 = arith.subi %c7_i32_43, %c3_i32 : i32
    %cst_44 = arith.constant dense<0.000000e+00> : vector<2x256xf32>
    %170 = tpu.matmul %168, %0, %cst_44 {dimension_numbers = #tpu.dot_dimension_numbers<[1], [0], [0], [1], [0, 0, 1, 1], [], []>, precision = #tpu.contract_precision<fp32>} : vector<2x64xf32>, vector<64x256xf32>, vector<2x256xf32> -> vector<2x256xf32>
    %171 = arith.index_cast %c3_i32 : i32 to index
    %c0_45 = arith.constant 0 : index
    %c0_46 = arith.constant 0 : index
    %172 = vector.load %arg0[%171, %c0_45, %c0_46] : memref<8x2x256xf32, #tpu.memory_space<vmem>>, vector<1x2x256xf32>
    %173 = vector.shape_cast %172 : vector<1x2x256xf32> to vector<2x256xf32>
    %174 = arith.index_cast %169 : i32 to index
    %c0_47 = arith.constant 0 : index
    %c0_48 = arith.constant 0 : index
    %175 = vector.load %arg0[%174, %c0_47, %c0_48] : memref<8x2x256xf32, #tpu.memory_space<vmem>>, vector<1x2x256xf32>
    %176 = vector.shape_cast %175 : vector<1x2x256xf32> to vector<2x256xf32>
    %177 = vector.extract_strided_slice %170 {offsets = [0, 0], sizes = [2, 128], strides = [1, 1]} : vector<2x256xf32> to vector<2x128xf32>
    %178 = vector.extract_strided_slice %173 {offsets = [0, 0], sizes = [2, 128], strides = [1, 1]} : vector<2x256xf32> to vector<2x128xf32>
    %179 = arith.addf %177, %178 : vector<2x128xf32>
    %180 = vector.extract_strided_slice %170 {offsets = [0, 128], sizes = [2, 128], strides = [1, 1]} : vector<2x256xf32> to vector<2x128xf32>
    %181 = vector.extract_strided_slice %176 {offsets = [0, 128], sizes = [2, 128], strides = [1, 1]} : vector<2x256xf32> to vector<2x128xf32>
    %182 = arith.addf %180, %181 : vector<2x128xf32>
    %183 = vector.extract_strided_slice %179 {offsets = [0, 0], sizes = [2, 96], strides = [1, 1]} : vector<2x128xf32> to vector<2x96xf32>
    %184 = arith.negf %183 : vector<2x96xf32>
    %185 = math.exp %184 : vector<2x96xf32>
    %cst_49 = arith.constant 1.000000e+00 : f32
    %186 = vector.broadcast %cst_49 : f32 to vector<2x96xf32>
    %187 = arith.addf %186, %185 : vector<2x96xf32>
    %188 = arith.divf %186, %187 : vector<2x96xf32>
    %189 = vector.extract_strided_slice %182 {offsets = [0, 0], sizes = [2, 96], strides = [1, 1]} : vector<2x128xf32> to vector<2x96xf32>
    %190 = arith.negf %189 : vector<2x96xf32>
    %191 = math.exp %190 : vector<2x96xf32>
    %cst_50 = arith.constant 1.000000e+00 : f32
    %192 = vector.broadcast %cst_50 : f32 to vector<2x96xf32>
    %193 = arith.addf %192, %191 : vector<2x96xf32>
    %194 = arith.divf %192, %193 : vector<2x96xf32>
    %195 = vector.extract_strided_slice %179 {offsets = [0, 96], sizes = [2, 32], strides = [1, 1]} : vector<2x128xf32> to vector<2x32xf32>
    %196 = math.tanh %195 : vector<2x32xf32>
    %197 = vector.extract_strided_slice %182 {offsets = [0, 96], sizes = [2, 32], strides = [1, 1]} : vector<2x128xf32> to vector<2x32xf32>
    %198 = math.tanh %197 : vector<2x32xf32>
    %199 = vector.extract_strided_slice %188 {offsets = [0, 32], sizes = [2, 32], strides = [1, 1]} : vector<2x96xf32> to vector<2x32xf32>
    %200 = arith.mulf %199, %148 : vector<2x32xf32>
    %201 = vector.extract_strided_slice %188 {offsets = [0, 0], sizes = [2, 32], strides = [1, 1]} : vector<2x96xf32> to vector<2x32xf32>
    %202 = arith.mulf %201, %196 : vector<2x32xf32>
    %203 = arith.addf %200, %202 : vector<2x32xf32>
    %204 = vector.extract_strided_slice %194 {offsets = [0, 32], sizes = [2, 32], strides = [1, 1]} : vector<2x96xf32> to vector<2x32xf32>
    %205 = arith.mulf %204, %153 : vector<2x32xf32>
    %206 = vector.extract_strided_slice %194 {offsets = [0, 0], sizes = [2, 32], strides = [1, 1]} : vector<2x96xf32> to vector<2x32xf32>
    %207 = arith.mulf %206, %198 : vector<2x32xf32>
    %208 = arith.addf %205, %207 : vector<2x32xf32>
    %209 = vector.extract_strided_slice %188 {offsets = [0, 64], sizes = [2, 32], strides = [1, 1]} : vector<2x96xf32> to vector<2x32xf32>
    %210 = math.tanh %203 : vector<2x32xf32>
    %211 = arith.mulf %209, %210 : vector<2x32xf32>
    %212 = vector.extract_strided_slice %194 {offsets = [0, 64], sizes = [2, 32], strides = [1, 1]} : vector<2x96xf32> to vector<2x32xf32>
    %213 = math.tanh %208 : vector<2x32xf32>
    %214 = arith.mulf %212, %213 : vector<2x32xf32>
    %c0_51 = arith.constant 0 : index
    %215 = arith.index_cast %c3_i32 : i32 to index
    %c0_52 = arith.constant 0 : index
    %c0_53 = arith.constant 0 : index
    %216 = vector.load %arg2[%c0_51, %215, %c0_52, %c0_53] : memref<2x8x2x32xf32, #tpu.memory_space<vmem>>, vector<1x1x2x32xf32>
    %217 = vector.shape_cast %216 : vector<1x1x2x32xf32> to vector<2x32xf32>
    %218 = vector.shape_cast %211 : vector<2x32xf32> to vector<1x1x2x32xf32>
    tpu.vector_store %arg2[%c0_51, %215, %c0_52, %c0_53], %218 {strides = array<i32>} : memref<2x8x2x32xf32, #tpu.memory_space<vmem>>, vector<1x1x2x32xf32>,
    %c1_54 = arith.constant 1 : index
    %219 = arith.index_cast %169 : i32 to index
    %c0_55 = arith.constant 0 : index
    %c0_56 = arith.constant 0 : index
    %220 = vector.load %arg2[%c1_54, %219, %c0_55, %c0_56] : memref<2x8x2x32xf32, #tpu.memory_space<vmem>>, vector<1x1x2x32xf32>
    %221 = vector.shape_cast %220 : vector<1x1x2x32xf32> to vector<2x32xf32>
    %222 = vector.shape_cast %214 : vector<2x32xf32> to vector<1x1x2x32xf32>
    tpu.vector_store %arg2[%c1_54, %219, %c0_55, %c0_56], %222 {strides = array<i32>} : memref<2x8x2x32xf32, #tpu.memory_space<vmem>>, vector<1x1x2x32xf32>,
    %223 = tpu.concatenate %211, %214 in 1 : vector<2x32xf32>, vector<2x32xf32> -> vector<2x64xf32>
    %c4_i32 = arith.constant 4 : i32
    %c7_i32_57 = arith.constant 7 : i32
    %224 = arith.subi %c7_i32_57, %c4_i32 : i32
    %cst_58 = arith.constant dense<0.000000e+00> : vector<2x256xf32>
    %225 = tpu.matmul %223, %0, %cst_58 {dimension_numbers = #tpu.dot_dimension_numbers<[1], [0], [0], [1], [0, 0, 1, 1], [], []>, precision = #tpu.contract_precision<fp32>} : vector<2x64xf32>, vector<64x256xf32>, vector<2x256xf32> -> vector<2x256xf32>
    %226 = arith.index_cast %c4_i32 : i32 to index
    %c0_59 = arith.constant 0 : index
    %c0_60 = arith.constant 0 : index
    %227 = vector.load %arg0[%226, %c0_59, %c0_60] : memref<8x2x256xf32, #tpu.memory_space<vmem>>, vector<1x2x256xf32>
    %228 = vector.shape_cast %227 : vector<1x2x256xf32> to vector<2x256xf32>
    %229 = arith.index_cast %224 : i32 to index
    %c0_61 = arith.constant 0 : index
    %c0_62 = arith.constant 0 : index
    %230 = vector.load %arg0[%229, %c0_61, %c0_62] : memref<8x2x256xf32, #tpu.memory_space<vmem>>, vector<1x2x256xf32>
    %231 = vector.shape_cast %230 : vector<1x2x256xf32> to vector<2x256xf32>
    %232 = vector.extract_strided_slice %225 {offsets = [0, 0], sizes = [2, 128], strides = [1, 1]} : vector<2x256xf32> to vector<2x128xf32>
    %233 = vector.extract_strided_slice %228 {offsets = [0, 0], sizes = [2, 128], strides = [1, 1]} : vector<2x256xf32> to vector<2x128xf32>
    %234 = arith.addf %232, %233 : vector<2x128xf32>
    %235 = vector.extract_strided_slice %225 {offsets = [0, 128], sizes = [2, 128], strides = [1, 1]} : vector<2x256xf32> to vector<2x128xf32>
    %236 = vector.extract_strided_slice %231 {offsets = [0, 128], sizes = [2, 128], strides = [1, 1]} : vector<2x256xf32> to vector<2x128xf32>
    %237 = arith.addf %235, %236 : vector<2x128xf32>
    %238 = vector.extract_strided_slice %234 {offsets = [0, 0], sizes = [2, 96], strides = [1, 1]} : vector<2x128xf32> to vector<2x96xf32>
    %239 = arith.negf %238 : vector<2x96xf32>
    %240 = math.exp %239 : vector<2x96xf32>
    %cst_63 = arith.constant 1.000000e+00 : f32
    %241 = vector.broadcast %cst_63 : f32 to vector<2x96xf32>
    %242 = arith.addf %241, %240 : vector<2x96xf32>
    %243 = arith.divf %241, %242 : vector<2x96xf32>
    %244 = vector.extract_strided_slice %237 {offsets = [0, 0], sizes = [2, 96], strides = [1, 1]} : vector<2x128xf32> to vector<2x96xf32>
    %245 = arith.negf %244 : vector<2x96xf32>
    %246 = math.exp %245 : vector<2x96xf32>
    %cst_64 = arith.constant 1.000000e+00 : f32
    %247 = vector.broadcast %cst_64 : f32 to vector<2x96xf32>
    %248 = arith.addf %247, %246 : vector<2x96xf32>
    %249 = arith.divf %247, %248 : vector<2x96xf32>
    %250 = vector.extract_strided_slice %234 {offsets = [0, 96], sizes = [2, 32], strides = [1, 1]} : vector<2x128xf32> to vector<2x32xf32>
    %251 = math.tanh %250 : vector<2x32xf32>
    %252 = vector.extract_strided_slice %237 {offsets = [0, 96], sizes = [2, 32], strides = [1, 1]} : vector<2x128xf32> to vector<2x32xf32>
    %253 = math.tanh %252 : vector<2x32xf32>
    %254 = vector.extract_strided_slice %243 {offsets = [0, 32], sizes = [2, 32], strides = [1, 1]} : vector<2x96xf32> to vector<2x32xf32>
    %255 = arith.mulf %254, %203 : vector<2x32xf32>
    %256 = vector.extract_strided_slice %243 {offsets = [0, 0], sizes = [2, 32], strides = [1, 1]} : vector<2x96xf32> to vector<2x32xf32>
    %257 = arith.mulf %256, %251 : vector<2x32xf32>
    %258 = arith.addf %255, %257 : vector<2x32xf32>
    %259 = vector.extract_strided_slice %249 {offsets = [0, 32], sizes = [2, 32], strides = [1, 1]} : vector<2x96xf32> to vector<2x32xf32>
    %260 = arith.mulf %259, %208 : vector<2x32xf32>
    %261 = vector.extract_strided_slice %249 {offsets = [0, 0], sizes = [2, 32], strides = [1, 1]} : vector<2x96xf32> to vector<2x32xf32>
    %262 = arith.mulf %261, %253 : vector<2x32xf32>
    %263 = arith.addf %260, %262 : vector<2x32xf32>
    %264 = vector.extract_strided_slice %243 {offsets = [0, 64], sizes = [2, 32], strides = [1, 1]} : vector<2x96xf32> to vector<2x32xf32>
    %265 = math.tanh %258 : vector<2x32xf32>
    %266 = arith.mulf %264, %265 : vector<2x32xf32>
    %267 = vector.extract_strided_slice %249 {offsets = [0, 64], sizes = [2, 32], strides = [1, 1]} : vector<2x96xf32> to vector<2x32xf32>
    %268 = math.tanh %263 : vector<2x32xf32>
    %269 = arith.mulf %267, %268 : vector<2x32xf32>
    %c0_65 = arith.constant 0 : index
    %270 = arith.index_cast %c4_i32 : i32 to index
    %c0_66 = arith.constant 0 : index
    %c0_67 = arith.constant 0 : index
    %271 = vector.load %arg2[%c0_65, %270, %c0_66, %c0_67] : memref<2x8x2x32xf32, #tpu.memory_space<vmem>>, vector<1x1x2x32xf32>
    %272 = vector.shape_cast %271 : vector<1x1x2x32xf32> to vector<2x32xf32>
    %273 = vector.shape_cast %266 : vector<2x32xf32> to vector<1x1x2x32xf32>
    tpu.vector_store %arg2[%c0_65, %270, %c0_66, %c0_67], %273 {strides = array<i32>} : memref<2x8x2x32xf32, #tpu.memory_space<vmem>>, vector<1x1x2x32xf32>,
    %c1_68 = arith.constant 1 : index
    %274 = arith.index_cast %224 : i32 to index
    %c0_69 = arith.constant 0 : index
    %c0_70 = arith.constant 0 : index
    %275 = vector.load %arg2[%c1_68, %274, %c0_69, %c0_70] : memref<2x8x2x32xf32, #tpu.memory_space<vmem>>, vector<1x1x2x32xf32>
    %276 = vector.shape_cast %275 : vector<1x1x2x32xf32> to vector<2x32xf32>
    %277 = vector.shape_cast %269 : vector<2x32xf32> to vector<1x1x2x32xf32>
    tpu.vector_store %arg2[%c1_68, %274, %c0_69, %c0_70], %277 {strides = array<i32>} : memref<2x8x2x32xf32, #tpu.memory_space<vmem>>, vector<1x1x2x32xf32>,
    %278 = tpu.concatenate %266, %269 in 1 : vector<2x32xf32>, vector<2x32xf32> -> vector<2x64xf32>
    %c5_i32 = arith.constant 5 : i32
    %c7_i32_71 = arith.constant 7 : i32
    %279 = arith.subi %c7_i32_71, %c5_i32 : i32
    %cst_72 = arith.constant dense<0.000000e+00> : vector<2x256xf32>
    %280 = tpu.matmul %278, %0, %cst_72 {dimension_numbers = #tpu.dot_dimension_numbers<[1], [0], [0], [1], [0, 0, 1, 1], [], []>, precision = #tpu.contract_precision<fp32>} : vector<2x64xf32>, vector<64x256xf32>, vector<2x256xf32> -> vector<2x256xf32>
    %281 = arith.index_cast %c5_i32 : i32 to index
    %c0_73 = arith.constant 0 : index
    %c0_74 = arith.constant 0 : index
    %282 = vector.load %arg0[%281, %c0_73, %c0_74] : memref<8x2x256xf32, #tpu.memory_space<vmem>>, vector<1x2x256xf32>
    %283 = vector.shape_cast %282 : vector<1x2x256xf32> to vector<2x256xf32>
    %284 = arith.index_cast %279 : i32 to index
    %c0_75 = arith.constant 0 : index
    %c0_76 = arith.constant 0 : index
    %285 = vector.load %arg0[%284, %c0_75, %c0_76] : memref<8x2x256xf32, #tpu.memory_space<vmem>>, vector<1x2x256xf32>
    %286 = vector.shape_cast %285 : vector<1x2x256xf32> to vector<2x256xf32>
    %287 = vector.extract_strided_slice %280 {offsets = [0, 0], sizes = [2, 128], strides = [1, 1]} : vector<2x256xf32> to vector<2x128xf32>
    %288 = vector.extract_strided_slice %283 {offsets = [0, 0], sizes = [2, 128], strides = [1, 1]} : vector<2x256xf32> to vector<2x128xf32>
    %289 = arith.addf %287, %288 : vector<2x128xf32>
    %290 = vector.extract_strided_slice %280 {offsets = [0, 128], sizes = [2, 128], strides = [1, 1]} : vector<2x256xf32> to vector<2x128xf32>
    %291 = vector.extract_strided_slice %286 {offsets = [0, 128], sizes = [2, 128], strides = [1, 1]} : vector<2x256xf32> to vector<2x128xf32>
    %292 = arith.addf %290, %291 : vector<2x128xf32>
    %293 = vector.extract_strided_slice %289 {offsets = [0, 0], sizes = [2, 96], strides = [1, 1]} : vector<2x128xf32> to vector<2x96xf32>
    %294 = arith.negf %293 : vector<2x96xf32>
    %295 = math.exp %294 : vector<2x96xf32>
    %cst_77 = arith.constant 1.000000e+00 : f32
    %296 = vector.broadcast %cst_77 : f32 to vector<2x96xf32>
    %297 = arith.addf %296, %295 : vector<2x96xf32>
    %298 = arith.divf %296, %297 : vector<2x96xf32>
    %299 = vector.extract_strided_slice %292 {offsets = [0, 0], sizes = [2, 96], strides = [1, 1]} : vector<2x128xf32> to vector<2x96xf32>
    %300 = arith.negf %299 : vector<2x96xf32>
    %301 = math.exp %300 : vector<2x96xf32>
    %cst_78 = arith.constant 1.000000e+00 : f32
    %302 = vector.broadcast %cst_78 : f32 to vector<2x96xf32>
    %303 = arith.addf %302, %301 : vector<2x96xf32>
    %304 = arith.divf %302, %303 : vector<2x96xf32>
    %305 = vector.extract_strided_slice %289 {offsets = [0, 96], sizes = [2, 32], strides = [1, 1]} : vector<2x128xf32> to vector<2x32xf32>
    %306 = math.tanh %305 : vector<2x32xf32>
    %307 = vector.extract_strided_slice %292 {offsets = [0, 96], sizes = [2, 32], strides = [1, 1]} : vector<2x128xf32> to vector<2x32xf32>
    %308 = math.tanh %307 : vector<2x32xf32>
    %309 = vector.extract_strided_slice %298 {offsets = [0, 32], sizes = [2, 32], strides = [1, 1]} : vector<2x96xf32> to vector<2x32xf32>
    %310 = arith.mulf %309, %258 : vector<2x32xf32>
    %311 = vector.extract_strided_slice %298 {offsets = [0, 0], sizes = [2, 32], strides = [1, 1]} : vector<2x96xf32> to vector<2x32xf32>
    %312 = arith.mulf %311, %306 : vector<2x32xf32>
    %313 = arith.addf %310, %312 : vector<2x32xf32>
    %314 = vector.extract_strided_slice %304 {offsets = [0, 32], sizes = [2, 32], strides = [1, 1]} : vector<2x96xf32> to vector<2x32xf32>
    %315 = arith.mulf %314, %263 : vector<2x32xf32>
    %316 = vector.extract_strided_slice %304 {offsets = [0, 0], sizes = [2, 32], strides = [1, 1]} : vector<2x96xf32> to vector<2x32xf32>
    %317 = arith.mulf %316, %308 : vector<2x32xf32>
    %318 = arith.addf %315, %317 : vector<2x32xf32>
    %319 = vector.extract_strided_slice %298 {offsets = [0, 64], sizes = [2, 32], strides = [1, 1]} : vector<2x96xf32> to vector<2x32xf32>
    %320 = math.tanh %313 : vector<2x32xf32>
    %321 = arith.mulf %319, %320 : vector<2x32xf32>
    %322 = vector.extract_strided_slice %304 {offsets = [0, 64], sizes = [2, 32], strides = [1, 1]} : vector<2x96xf32> to vector<2x32xf32>
    %323 = math.tanh %318 : vector<2x32xf32>
    %324 = arith.mulf %322, %323 : vector<2x32xf32>
    %c0_79 = arith.constant 0 : index
    %325 = arith.index_cast %c5_i32 : i32 to index
    %c0_80 = arith.constant 0 : index
    %c0_81 = arith.constant 0 : index
    %326 = vector.load %arg2[%c0_79, %325, %c0_80, %c0_81] : memref<2x8x2x32xf32, #tpu.memory_space<vmem>>, vector<1x1x2x32xf32>
    %327 = vector.shape_cast %326 : vector<1x1x2x32xf32> to vector<2x32xf32>
    %328 = vector.shape_cast %321 : vector<2x32xf32> to vector<1x1x2x32xf32>
    tpu.vector_store %arg2[%c0_79, %325, %c0_80, %c0_81], %328 {strides = array<i32>} : memref<2x8x2x32xf32, #tpu.memory_space<vmem>>, vector<1x1x2x32xf32>,
    %c1_82 = arith.constant 1 : index
    %329 = arith.index_cast %279 : i32 to index
    %c0_83 = arith.constant 0 : index
    %c0_84 = arith.constant 0 : index
    %330 = vector.load %arg2[%c1_82, %329, %c0_83, %c0_84] : memref<2x8x2x32xf32, #tpu.memory_space<vmem>>, vector<1x1x2x32xf32>
    %331 = vector.shape_cast %330 : vector<1x1x2x32xf32> to vector<2x32xf32>
    %332 = vector.shape_cast %324 : vector<2x32xf32> to vector<1x1x2x32xf32>
    tpu.vector_store %arg2[%c1_82, %329, %c0_83, %c0_84], %332 {strides = array<i32>} : memref<2x8x2x32xf32, #tpu.memory_space<vmem>>, vector<1x1x2x32xf32>,
    %333 = tpu.concatenate %321, %324 in 1 : vector<2x32xf32>, vector<2x32xf32> -> vector<2x64xf32>
    %c6_i32 = arith.constant 6 : i32
    %c7_i32_85 = arith.constant 7 : i32
    %334 = arith.subi %c7_i32_85, %c6_i32 : i32
    %cst_86 = arith.constant dense<0.000000e+00> : vector<2x256xf32>
    %335 = tpu.matmul %333, %0, %cst_86 {dimension_numbers = #tpu.dot_dimension_numbers<[1], [0], [0], [1], [0, 0, 1, 1], [], []>, precision = #tpu.contract_precision<fp32>} : vector<2x64xf32>, vector<64x256xf32>, vector<2x256xf32> -> vector<2x256xf32>
    %336 = arith.index_cast %c6_i32 : i32 to index
    %c0_87 = arith.constant 0 : index
    %c0_88 = arith.constant 0 : index
    %337 = vector.load %arg0[%336, %c0_87, %c0_88] : memref<8x2x256xf32, #tpu.memory_space<vmem>>, vector<1x2x256xf32>
    %338 = vector.shape_cast %337 : vector<1x2x256xf32> to vector<2x256xf32>
    %339 = arith.index_cast %334 : i32 to index
    %c0_89 = arith.constant 0 : index
    %c0_90 = arith.constant 0 : index
    %340 = vector.load %arg0[%339, %c0_89, %c0_90] : memref<8x2x256xf32, #tpu.memory_space<vmem>>, vector<1x2x256xf32>
    %341 = vector.shape_cast %340 : vector<1x2x256xf32> to vector<2x256xf32>
    %342 = vector.extract_strided_slice %335 {offsets = [0, 0], sizes = [2, 128], strides = [1, 1]} : vector<2x256xf32> to vector<2x128xf32>
    %343 = vector.extract_strided_slice %338 {offsets = [0, 0], sizes = [2, 128], strides = [1, 1]} : vector<2x256xf32> to vector<2x128xf32>
    %344 = arith.addf %342, %343 : vector<2x128xf32>
    %345 = vector.extract_strided_slice %335 {offsets = [0, 128], sizes = [2, 128], strides = [1, 1]} : vector<2x256xf32> to vector<2x128xf32>
    %346 = vector.extract_strided_slice %341 {offsets = [0, 128], sizes = [2, 128], strides = [1, 1]} : vector<2x256xf32> to vector<2x128xf32>
    %347 = arith.addf %345, %346 : vector<2x128xf32>
    %348 = vector.extract_strided_slice %344 {offsets = [0, 0], sizes = [2, 96], strides = [1, 1]} : vector<2x128xf32> to vector<2x96xf32>
    %349 = arith.negf %348 : vector<2x96xf32>
    %350 = math.exp %349 : vector<2x96xf32>
    %cst_91 = arith.constant 1.000000e+00 : f32
    %351 = vector.broadcast %cst_91 : f32 to vector<2x96xf32>
    %352 = arith.addf %351, %350 : vector<2x96xf32>
    %353 = arith.divf %351, %352 : vector<2x96xf32>
    %354 = vector.extract_strided_slice %347 {offsets = [0, 0], sizes = [2, 96], strides = [1, 1]} : vector<2x128xf32> to vector<2x96xf32>
    %355 = arith.negf %354 : vector<2x96xf32>
    %356 = math.exp %355 : vector<2x96xf32>
    %cst_92 = arith.constant 1.000000e+00 : f32
    %357 = vector.broadcast %cst_92 : f32 to vector<2x96xf32>
    %358 = arith.addf %357, %356 : vector<2x96xf32>
    %359 = arith.divf %357, %358 : vector<2x96xf32>
    %360 = vector.extract_strided_slice %344 {offsets = [0, 96], sizes = [2, 32], strides = [1, 1]} : vector<2x128xf32> to vector<2x32xf32>
    %361 = math.tanh %360 : vector<2x32xf32>
    %362 = vector.extract_strided_slice %347 {offsets = [0, 96], sizes = [2, 32], strides = [1, 1]} : vector<2x128xf32> to vector<2x32xf32>
    %363 = math.tanh %362 : vector<2x32xf32>
    %364 = vector.extract_strided_slice %353 {offsets = [0, 32], sizes = [2, 32], strides = [1, 1]} : vector<2x96xf32> to vector<2x32xf32>
    %365 = arith.mulf %364, %313 : vector<2x32xf32>
    %366 = vector.extract_strided_slice %353 {offsets = [0, 0], sizes = [2, 32], strides = [1, 1]} : vector<2x96xf32> to vector<2x32xf32>
    %367 = arith.mulf %366, %361 : vector<2x32xf32>
    %368 = arith.addf %365, %367 : vector<2x32xf32>
    %369 = vector.extract_strided_slice %359 {offsets = [0, 32], sizes = [2, 32], strides = [1, 1]} : vector<2x96xf32> to vector<2x32xf32>
    %370 = arith.mulf %369, %318 : vector<2x32xf32>
    %371 = vector.extract_strided_slice %359 {offsets = [0, 0], sizes = [2, 32], strides = [1, 1]} : vector<2x96xf32> to vector<2x32xf32>
    %372 = arith.mulf %371, %363 : vector<2x32xf32>
    %373 = arith.addf %370, %372 : vector<2x32xf32>
    %374 = vector.extract_strided_slice %353 {offsets = [0, 64], sizes = [2, 32], strides = [1, 1]} : vector<2x96xf32> to vector<2x32xf32>
    %375 = math.tanh %368 : vector<2x32xf32>
    %376 = arith.mulf %374, %375 : vector<2x32xf32>
    %377 = vector.extract_strided_slice %359 {offsets = [0, 64], sizes = [2, 32], strides = [1, 1]} : vector<2x96xf32> to vector<2x32xf32>
    %378 = math.tanh %373 : vector<2x32xf32>
    %379 = arith.mulf %377, %378 : vector<2x32xf32>
    %c0_93 = arith.constant 0 : index
    %380 = arith.index_cast %c6_i32 : i32 to index
    %c0_94 = arith.constant 0 : index
    %c0_95 = arith.constant 0 : index
    %381 = vector.load %arg2[%c0_93, %380, %c0_94, %c0_95] : memref<2x8x2x32xf32, #tpu.memory_space<vmem>>, vector<1x1x2x32xf32>
    %382 = vector.shape_cast %381 : vector<1x1x2x32xf32> to vector<2x32xf32>
    %383 = vector.shape_cast %376 : vector<2x32xf32> to vector<1x1x2x32xf32>
    tpu.vector_store %arg2[%c0_93, %380, %c0_94, %c0_95], %383 {strides = array<i32>} : memref<2x8x2x32xf32, #tpu.memory_space<vmem>>, vector<1x1x2x32xf32>,
    %c1_96 = arith.constant 1 : index
    %384 = arith.index_cast %334 : i32 to index
    %c0_97 = arith.constant 0 : index
    %c0_98 = arith.constant 0 : index
    %385 = vector.load %arg2[%c1_96, %384, %c0_97, %c0_98] : memref<2x8x2x32xf32, #tpu.memory_space<vmem>>, vector<1x1x2x32xf32>
    %386 = vector.shape_cast %385 : vector<1x1x2x32xf32> to vector<2x32xf32>
    %387 = vector.shape_cast %379 : vector<2x32xf32> to vector<1x1x2x32xf32>
    tpu.vector_store %arg2[%c1_96, %384, %c0_97, %c0_98], %387 {strides = array<i32>} : memref<2x8x2x32xf32, #tpu.memory_space<vmem>>, vector<1x1x2x32xf32>,
    %388 = tpu.concatenate %376, %379 in 1 : vector<2x32xf32>, vector<2x32xf32> -> vector<2x64xf32>
    %c7_i32_99 = arith.constant 7 : i32
    %c7_i32_100 = arith.constant 7 : i32
    %389 = arith.subi %c7_i32_100, %c7_i32_99 : i32
    %cst_101 = arith.constant dense<0.000000e+00> : vector<2x256xf32>
    %390 = tpu.matmul %388, %0, %cst_101 {dimension_numbers = #tpu.dot_dimension_numbers<[1], [0], [0], [1], [0, 0, 1, 1], [], []>, precision = #tpu.contract_precision<fp32>} : vector<2x64xf32>, vector<64x256xf32>, vector<2x256xf32> -> vector<2x256xf32>
    %391 = arith.index_cast %c7_i32_99 : i32 to index
    %c0_102 = arith.constant 0 : index
    %c0_103 = arith.constant 0 : index
    %392 = vector.load %arg0[%391, %c0_102, %c0_103] : memref<8x2x256xf32, #tpu.memory_space<vmem>>, vector<1x2x256xf32>
    %393 = vector.shape_cast %392 : vector<1x2x256xf32> to vector<2x256xf32>
    %394 = arith.index_cast %389 : i32 to index
    %c0_104 = arith.constant 0 : index
    %c0_105 = arith.constant 0 : index
    %395 = vector.load %arg0[%394, %c0_104, %c0_105] : memref<8x2x256xf32, #tpu.memory_space<vmem>>, vector<1x2x256xf32>
    %396 = vector.shape_cast %395 : vector<1x2x256xf32> to vector<2x256xf32>
    %397 = vector.extract_strided_slice %390 {offsets = [0, 0], sizes = [2, 128], strides = [1, 1]} : vector<2x256xf32> to vector<2x128xf32>
    %398 = vector.extract_strided_slice %393 {offsets = [0, 0], sizes = [2, 128], strides = [1, 1]} : vector<2x256xf32> to vector<2x128xf32>
    %399 = arith.addf %397, %398 : vector<2x128xf32>
    %400 = vector.extract_strided_slice %390 {offsets = [0, 128], sizes = [2, 128], strides = [1, 1]} : vector<2x256xf32> to vector<2x128xf32>
    %401 = vector.extract_strided_slice %396 {offsets = [0, 128], sizes = [2, 128], strides = [1, 1]} : vector<2x256xf32> to vector<2x128xf32>
    %402 = arith.addf %400, %401 : vector<2x128xf32>
    %403 = vector.extract_strided_slice %399 {offsets = [0, 0], sizes = [2, 96], strides = [1, 1]} : vector<2x128xf32> to vector<2x96xf32>
    %404 = arith.negf %403 : vector<2x96xf32>
    %405 = math.exp %404 : vector<2x96xf32>
    %cst_106 = arith.constant 1.000000e+00 : f32
    %406 = vector.broadcast %cst_106 : f32 to vector<2x96xf32>
    %407 = arith.addf %406, %405 : vector<2x96xf32>
    %408 = arith.divf %406, %407 : vector<2x96xf32>
    %409 = vector.extract_strided_slice %402 {offsets = [0, 0], sizes = [2, 96], strides = [1, 1]} : vector<2x128xf32> to vector<2x96xf32>
    %410 = arith.negf %409 : vector<2x96xf32>
    %411 = math.exp %410 : vector<2x96xf32>
    %cst_107 = arith.constant 1.000000e+00 : f32
    %412 = vector.broadcast %cst_107 : f32 to vector<2x96xf32>
    %413 = arith.addf %412, %411 : vector<2x96xf32>
    %414 = arith.divf %412, %413 : vector<2x96xf32>
    %415 = vector.extract_strided_slice %399 {offsets = [0, 96], sizes = [2, 32], strides = [1, 1]} : vector<2x128xf32> to vector<2x32xf32>
    %416 = math.tanh %415 : vector<2x32xf32>
    %417 = vector.extract_strided_slice %402 {offsets = [0, 96], sizes = [2, 32], strides = [1, 1]} : vector<2x128xf32> to vector<2x32xf32>
    %418 = math.tanh %417 : vector<2x32xf32>
    %419 = vector.extract_strided_slice %408 {offsets = [0, 32], sizes = [2, 32], strides = [1, 1]} : vector<2x96xf32> to vector<2x32xf32>
    %420 = arith.mulf %419, %368 : vector<2x32xf32>
    %421 = vector.extract_strided_slice %408 {offsets = [0, 0], sizes = [2, 32], strides = [1, 1]} : vector<2x96xf32> to vector<2x32xf32>
    %422 = arith.mulf %421, %416 : vector<2x32xf32>
    %423 = arith.addf %420, %422 : vector<2x32xf32>
    %424 = vector.extract_strided_slice %414 {offsets = [0, 32], sizes = [2, 32], strides = [1, 1]} : vector<2x96xf32> to vector<2x32xf32>
    %425 = arith.mulf %424, %373 : vector<2x32xf32>
    %426 = vector.extract_strided_slice %414 {offsets = [0, 0], sizes = [2, 32], strides = [1, 1]} : vector<2x96xf32> to vector<2x32xf32>
    %427 = arith.mulf %426, %418 : vector<2x32xf32>
    %428 = arith.addf %425, %427 : vector<2x32xf32>
    %429 = vector.extract_strided_slice %408 {offsets = [0, 64], sizes = [2, 32], strides = [1, 1]} : vector<2x96xf32> to vector<2x32xf32>
    %430 = math.tanh %423 : vector<2x32xf32>
    %431 = arith.mulf %429, %430 : vector<2x32xf32>
    %432 = vector.extract_strided_slice %414 {offsets = [0, 64], sizes = [2, 32], strides = [1, 1]} : vector<2x96xf32> to vector<2x32xf32>
    %433 = math.tanh %428 : vector<2x32xf32>
    %434 = arith.mulf %432, %433 : vector<2x32xf32>
    %c0_108 = arith.constant 0 : index
    %435 = arith.index_cast %c7_i32_99 : i32 to index
    %c0_109 = arith.constant 0 : index
    %c0_110 = arith.constant 0 : index
    %436 = vector.load %arg2[%c0_108, %435, %c0_109, %c0_110] : memref<2x8x2x32xf32, #tpu.memory_space<vmem>>, vector<1x1x2x32xf32>
    %437 = vector.shape_cast %436 : vector<1x1x2x32xf32> to vector<2x32xf32>
    %438 = vector.shape_cast %431 : vector<2x32xf32> to vector<1x1x2x32xf32>
    tpu.vector_store %arg2[%c0_108, %435, %c0_109, %c0_110], %438 {strides = array<i32>} : memref<2x8x2x32xf32, #tpu.memory_space<vmem>>, vector<1x1x2x32xf32>,
    %c1_111 = arith.constant 1 : index
    %439 = arith.index_cast %389 : i32 to index
    %c0_112 = arith.constant 0 : index
    %c0_113 = arith.constant 0 : index
    %440 = vector.load %arg2[%c1_111, %439, %c0_112, %c0_113] : memref<2x8x2x32xf32, #tpu.memory_space<vmem>>, vector<1x1x2x32xf32>
    %441 = vector.shape_cast %440 : vector<1x1x2x32xf32> to vector<2x32xf32>
    %442 = vector.shape_cast %434 : vector<2x32xf32> to vector<1x1x2x32xf32>
    tpu.vector_store %arg2[%c1_111, %439, %c0_112, %c0_113], %442 {strides = array<i32>} : memref<2x8x2x32xf32, #tpu.memory_space<vmem>>, vector<1x1x2x32xf32>,
    %443 = tpu.concatenate %431, %434 in 1 : vector<2x32xf32>, vector<2x32xf32> -> vector<2x64xf32>
    %c8_i32 = arith.constant 8 : i32
    return
  }
}

</mosaic_0001>

<bundles_post_ra>
// kernel: output_lstm_forward.1
= control target key start
LH: loop header
LB: loop body
LE: loop exit
PB: predicated region body
PF: predicated region fallthrough
CT: control target
= control target key end

     0   :  { %v7460_v3 = vmov 0.0   ;;  %s6046_s16 = smov 32   ;;  %s6047_s17 = smov 64   ;;  %vm745_vm0 = vcmask 254976   ;;  %vm756_vm1 = vcmask 261120   ;;  %vm27_vm2 = vcmask 523264   ;;  %s7457_s1 = inlined_call_operand.vmem [shape: f32[64,256], index: 1, kind: input, shape index: {}]   ;;  %s7458_s0 = inlined_call_operand.vmem [shape: f32[8,2,256], index: 0, kind: input, shape index: {}]   ;;  %s7459_s2 = inlined_call_operand.vmem [shape: f32[2,8,2,32], index: 2, kind: output, shape index: {}]  }
   0x1   :  { %v26_v0 = vld [vmem:[%s7457_s1 + $0x78] sm:$0xff]  ;;  %v25_v1 = vld [vmem:[%s7457_s1 + $0x70] sm:$0xff]  ;;  %v24_v2 = vld [vmem:[%s7457_s1 + $0x68] sm:$0xff]  ;;  %111 = vmatprep.mubr.f32.mxu0 %v7460_v3  ;;  %267 = vmatprep.mubr.f32.mxu1 %v7460_v3  ;;  %s6048_s18 = smov 96  }
   0x2   :  { %v6075_v4 = vand.u32 4294901760, %v26_v0  ;;  %v6077_v5 = vand.u32 4294901760, %v25_v1  ;;  %v6079_v6 = vand.u32 4294901760, %v24_v2  ;;  %v23_v7 = vld [vmem:[%s7457_s1 + $0x60] sm:$0xff]  ;;  %v22_v8 = vld [vmem:[%s7457_s1 + $0x58] sm:$0xff]  ;;  %v21_v9 = vld [vmem:[%s7457_s1 + $0x50] sm:$0xff] }
   0x3   :  { %v6090_v10 = vand.u32 4294901760, %v23_v7  ;;  %v6092_v11 = vand.u32 4294901760, %v22_v8  ;;  %v6094_v12 = vand.u32 4294901760, %v21_v9  ;;  %v20_v13 = vld [vmem:[%s7457_s1 + $0x48] sm:$0xff]  ;;  %v19_v14 = vld [vmem:[%s7457_s1 + $0x40] sm:$0xff]  ;;  %v18_v15 = vld [vmem:[%s7457_s1 + $0x38] sm:$0xff] }
   0x4   :  { %48 = vmatprep.subr.mxu0 %v6075_v4  ;;  %v6106_v16 = vand.u32 4294901760, %v20_v13  ;;  %v6108_v17 = vand.u32 4294901760, %v19_v14  ;;  %v6110_v18 = vand.u32 4294901760, %v18_v15  ;;  %v6113_v19 = vsub.f32 %v26_v0, %v6075_v4  ;;  %v17_v20 = vld [vmem:[%s7457_s1 + $0x30] sm:$0xff]  ;;  %v16_v21 = vld [vmem:[%s7457_s1 + $0x28] sm:$0xff]  ;;  %v15_v22 = vld [vmem:[%s7457_s1 + $0x20] sm:$0xff] }
   0x5   :  { %50 = vmatpush1.msra.mxu0 %v6077_v5  ;;  %v6125_v23 = vand.u32 4294901760, %v17_v20  ;;  %v6128_v24 = vsub.f32 %v25_v1, %v6077_v5  ;;  %v6130_v25 = vand.u32 4294901760, %v16_v21  ;;  %v6133_v26 = vsub.f32 %v24_v2, %v6079_v6  ;;  %v14_v27 = vld [vmem:[%s7457_s1 + $0x18] sm:$0xff]  ;;  %v13_v28 = vld [vmem:[%s7457_s1 + $0x10] sm:$0xff]  ;;  %v6144_v29 = vld [vmem:[%s7457_s1 + $0x8] sm:$0xff] }
   0x6   :  { %7514 = vst [vmem:[#allocation2_spill] sm:$0xff] %v6113_v19  ;;  %52 = vmatprep.subr.mxu0 %v6079_v6  ;;  %v6148_v30 = vand.u32 4294901760, %v6113_v19  ;;  %v6150_v31 = vand.u32 4294901760, %v15_v22  ;;  %v6153_v32 = vsub.f32 %v23_v7, %v6090_v10  ;;  %v6155_v33 = vand.u32 4294901760, %v14_v27  ;;  %v6172_v38 = vld [vmem:[%s7457_s1] sm:$0xff] }
   0x7   :  { %54 = vmatpush1.msra.mxu0 %v6090_v10  ;;  %v6159_v34 = vand.u32 4294901760, %v6128_v24  ;;  %v6162_v35 = vand.u32 4294901760, %v6133_v26  ;;  %v6165_v36 = vsub.f32 %v22_v8, %v6092_v11  ;;  %v6167_v37 = vand.u32 4294901760, %v13_v28 }
   0x8   :  { %56 = vmatprep.subr.mxu0 %v6092_v11  ;;  %v142_v39 = vsub.f32 %v6113_v19, %v6148_v30  ;;  %v6178_v40 = vand.u32 4294901760, %v6153_v32  ;;  %v6181_v41 = vsub.f32 %v21_v9, %v6094_v12  ;;  %v6184_v42 = vand.u32 4294901760, %v6144_v29 }
   0x9   :  { %58 = vmatpush1.msra.mxu0 %v6094_v12  ;;  %v148_v43 = vsub.f32 %v6128_v24, %v6159_v34  ;;  %v154_v44 = vsub.f32 %v6133_v26, %v6162_v35  ;;  %v6192_v45 = vand.u32 4294901760, %v6165_v36  ;;  %v6195_v46 = vsub.f32 %v20_v13, %v6106_v16 }
   0xa   :  { %60 = vmatprep.subr.mxu0 %v6106_v16  ;;  %v6198_v47 = vand.u32 4294901760, %v142_v39  ;;  %v160_v48 = vsub.f32 %v6153_v32, %v6178_v40  ;;  %v6203_v49 = vand.u32 4294901760, %v6181_v41  ;;  %v6206_v50 = vand.u32 4294901760, %v6172_v38 }
   0xb   :  { %62 = vmatpush1.msra.mxu0 %v6108_v17  ;;  %v6209_v51 = vand.u32 4294901760, %v148_v43  ;;  %v6211_v52 = vand.u32 4294901760, %v154_v44  ;;  %v166_v53 = vsub.f32 %v6165_v36, %v6192_v45  ;;  %v6216_v54 = vand.u32 4294901760, %v6195_v46 }
   0xc   :  { %7515 = vst [vmem:[#allocation3_spill] sm:$0xff] %v6198_v47  ;;  %64 = vmatprep.subr.mxu0 %v6110_v18  ;;  %144 = vmatprep.subr.mxu1 %v6198_v47  ;;  %v6220_v55 = vand.u32 4294901760, %v160_v48  ;;  %v172_v56 = vsub.f32 %v6181_v41, %v6203_v49  ;;  %v6225_v57 = vsub.f32 %v19_v14, %v6108_v17 }
   0xd   :  { %7516 = vst [vmem:[#allocation4_spill] sm:$0xff] %v6209_v51  ;;  %7517 = vst [vmem:[#allocation5_spill] sm:$0xff] %v6211_v52  ;;  %v6228_v58 = vsub.f32 %v18_v15, %v6110_v18  ;;  %66 = vmatpush1.msra.mxu0 %v6125_v23  ;;  %150 = vmatpush1.msra.mxu1 %v6209_v51  ;;  %v6232_v59 = vand.u32 4294901760, %v166_v53  ;;  %v178_v60 = vsub.f32 %v6195_v46, %v6216_v54 }
   0xe   :  { %7518 = vst [vmem:[#allocation6_spill] sm:$0xff] %v6220_v55  ;;  %v6237_v61 = vsub.f32 %v17_v20, %v6125_v23  ;;  %v6240_v62 = vsub.f32 %v16_v21, %v6130_v25  ;;  %68 = vmatprep.subr.mxu0 %v6130_v25  ;;  %156 = vmatprep.subr.mxu1 %v6211_v52  ;;  %v6244_v63 = vand.u32 4294901760, %v172_v56  ;;  %v6247_v0 = vand.u32 4294901760, %v6225_v57 }
   0xf   :  { %7519 = vst [vmem:[#allocation7_spill] sm:$0xff] %v6232_v59  ;;  %v6250_v1 = vand.u32 4294901760, %v6228_v58  ;;  %v6253_v2 = vsub.f32 %v15_v22, %v6150_v31  ;;  %70 = vmatpush1.msra.mxu0 %v6150_v31  ;;  %162 = vmatpush1.msra.mxu1 %v6220_v55  ;;  %v6257_v7 = vand.u32 4294901760, %v178_v60  ;;  %v6266_v13 = vsub.f32 %v14_v27, %v6155_v33 }
  0x10   :  { %7520 = vst [vmem:[#allocation8_spill] sm:$0xff] %v6244_v63  ;;  %v6260_v8 = vand.u32 4294901760, %v6237_v61  ;;  %v6263_v9 = vand.u32 4294901760, %v6240_v62  ;;  %72 = vmatprep.subr.mxu0 %v6155_v33  ;;  %168 = vmatprep.subr.mxu1 %v6232_v59  ;;  %v184_v14 = vsub.f32 %v6225_v57, %v6247_v0  ;;  %v6278_v21 = vsub.f32 %v13_v28, %v6167_v37 }
  0x11   :  { %7521 = vst [vmem:[#allocation9_spill] sm:$0xff] %v6257_v7  ;;  %v190_v15 = vsub.f32 %v6228_v58, %v6250_v1  ;;  %v6275_v20 = vand.u32 4294901760, %v6253_v2  ;;  %74 = vmatpush1.msra.mxu0 %v6167_v37  ;;  %174 = vmatpush1.msra.mxu1 %v6244_v63  ;;  %v6287_v39 = vand.u32 4294901760, %v6266_v13  ;;  %v6291_v43 = vsub.f32 %v6144_v29, %v6184_v42 }
  0x12   :  { %7522 = vst [vmem:[#allocation10_spill] sm:$0xff] %v6263_v9  ;;  %v196_v22 = vsub.f32 %v6237_v61, %v6260_v8  ;;  %v202_v27 = vsub.f32 %v6240_v62, %v6263_v9  ;;  %76 = vmatprep.subr.mxu0 %v6184_v42  ;;  %180 = vmatprep.subr.mxu1 %v6257_v7  ;;  %v6295_v28 = vand.u32 4294901760, %v184_v14  ;;  %v6302_v53 = vand.u32 4294901760, %v6278_v21 }
  0x13   :  { %7523 = vst [vmem:[#allocation11_spill] sm:$0xff] %v6275_v20  ;;  %7524 = vst [vmem:[#allocation12_spill] sm:$0xff] %v6287_v39  ;;  %v6297_v44 = vand.u32 4294901760, %v190_v15  ;;  %v208_v48 = vsub.f32 %v6253_v2, %v6275_v20  ;;  %78 = vmatpush1.msra.mxu0 %v6206_v50  ;;  %v214_v60 = vsub.f32 %v6266_v13, %v6287_v39  ;;  %v6312_v14 = vand.u32 4294901760, %v6291_v43 }
  0x14   :  { %7525 = vst [vmem:[#allocation13_spill] sm:$0xff] %v6295_v28  ;;  %7527 = vst [vmem:[#allocation15_spill] sm:$0xff] %v6302_v53  ;;  %v6305_v56 = vand.u32 4294901760, %v196_v22  ;;  %v6307_v29 = vand.u32 4294901760, %v202_v27  ;;  %186 = vmatpush1.msra.mxu1 %v6295_v28  ;;  %293 = vmatprep.subr.mxu0 %v6113_v19  ;;  %v220_v3 = vsub.f32 %v6278_v21, %v6302_v53  ;;  %v7532_v27 = vmov 0.0  }
  0x15   :  { %7526 = vst [vmem:[#allocation14_spill] sm:$0xff] %v6297_v44  ;;  %7530 = vst [vmem:[#allocation18_spill] sm:$0xff] %v6312_v14  ;;  %v6316_v15 = vand.u32 4294901760, %v208_v48  ;;  %v6322_v22 = vsub.f32 %v6172_v38, %v6206_v50  ;;  %192 = vmatprep.subr.mxu1 %v6297_v44  ;;  %117 = vmatmul.mubr.f32.vlgmr.msra.gmra.mxu0 %v7532_v27  ;;  %v6326_v7 = vand.u32 4294901760, %v214_v60 }
  0x16   :  { %7528 = vst [vmem:[#allocation16_spill] sm:$0xff] %v6305_v56  ;;  %7529 = vst [vmem:[#allocation17_spill] sm:$0xff] %v6307_v29  ;;  %v226_v28 = vsub.f32 %v6291_v43, %v6312_v14  ;;  %198 = vmatpush1.msra.mxu1 %v6305_v56  ;;  %296 = vmatpush1.msra.mxu0 %v6128_v24  ;;  %v6332_v48 = vand.u32 4294901760, %v220_v3 }
  0x17   :  { %7531 = vst [vmem:[#allocation19_spill] sm:$0xff] %v6316_v15  ;;  %7533 = vst [vmem:[#allocation20_spill] sm:$0xff] %v6326_v7  ;;  %v6335_v19 = vand.u32 4294901760, %v6322_v22  ;;  %204 = vmatprep.subr.mxu1 %v6307_v29  ;;  %299 = vmatprep.subr.mxu0 %v6133_v26 }
  0x18   :  { %7534 = vst [vmem:[#allocation21_spill] sm:$0xff] %v6332_v48  ;;  %v6339_v38 = vand.u32 4294901760, %v226_v28  ;;  %210 = vmatpush1.msra.mxu1 %v6316_v15  ;;  %302 = vmatpush1.msra.mxu0 %v6153_v32  ;;  %v7538_v28 = vld [vmem:[#allocation9_spill] sm:$0xff] }
  0x19   :  { %7535 = vst [vmem:[#allocation22_spill] sm:$0xff] %v6335_v19  ;;  %v232_v60 = vsub.f32 %v6322_v22, %v6335_v19  ;;  %216 = vmatprep.subr.mxu1 %v6326_v7  ;;  %305 = vmatprep.subr.mxu0 %v6165_v36 }
  0x1a   :  { %7536 = vst [vmem:[#allocation23_spill] sm:$0xff] %v6339_v38  ;;  %222 = vmatpush1.msra.mxu1 %v6332_v48  ;;  %308 = vmatpush1.msra.mxu0 %v6181_v41 }
  0x1b   :  { %v6349_v3 = vand.u32 4294901760, %v232_v60  ;;  %228 = vmatprep.subr.mxu1 %v6339_v38  ;;  %311 = vmatprep.subr.mxu0 %v6195_v46  ;;  %v7539_v60 = vld [vmem:[#allocation13_spill] sm:$0xff] }
  0x1c   :  { %314 = vmatpush1.msra.mxu0 %v6225_v57  ;;  %371 = vmatprep.mubr.f32.mxu0 %v7532_v27 }
  0x1d   :  { %7537 = vst [vmem:[#allocation24_spill] sm:$0xff] %v6349_v3  ;;  %234 = vmatpush1.msra.mxu1 %v6349_v3  ;;  %317 = vmatprep.subr.mxu0 %v6228_v58 }
  0x1e   :  { %269 = vmatmul.mubr.f32.vlgmr.msra.gmra.mxu1 %v7532_v27  ;;  %397 = vmatprep.subr.mxu1 %v6075_v4 }
  0x1f   :  { %320 = vmatpush1.msra.mxu0 %v6237_v61  ;;  %399 = vmatpush1.msra.mxu1 %v6077_v5 }
  0x20   :  { %323 = vmatprep.subr.mxu0 %v6240_v62  ;;  %401 = vmatprep.subr.mxu1 %v6079_v6 }
  0x21   :  { %326 = vmatpush1.msra.mxu0 %v6253_v2  ;;  %403 = vmatpush1.msra.mxu1 %v6090_v10 }
  0x22   :  { %329 = vmatprep.subr.mxu0 %v6266_v13  ;;  %405 = vmatprep.subr.mxu1 %v6092_v11 }
  0x23   :  { %332 = vmatpush1.msra.mxu0 %v6278_v21  ;;  %407 = vmatpush1.msra.mxu1 %v6094_v12 }
  0x24   :  { %335 = vmatprep.subr.mxu0 %v6291_v43  ;;  %409 = vmatprep.subr.mxu1 %v6106_v16 }
  0x25   :  { %338 = vmatpush1.msra.mxu0 %v6322_v22  ;;  %411 = vmatpush1.msra.mxu1 %v6108_v17 }
  0x26   :  { %374 = vmatmul.mubr.f32.vlgmr.msra.gmra.mxu0 %v7532_v27  ;;  %413 = vmatprep.subr.mxu1 %v6110_v18 }
  0x27   :  { %489 = vmatprep.subr.mxu0 %v6148_v30  ;;  %415 = vmatpush1.msra.mxu1 %v6125_v23 }
  0x28   :  { %493 = vmatpush1.msra.mxu0 %v6159_v34  ;;  %417 = vmatprep.subr.mxu1 %v6130_v25 }
  0x29   :  { %497 = vmatprep.subr.mxu0 %v6162_v35  ;;  %419 = vmatpush1.msra.mxu1 %v6150_v31 }
  0x2a   :  { %501 = vmatpush1.msra.mxu0 %v6178_v40  ;;  %421 = vmatprep.subr.mxu1 %v6155_v33 }
  0x2b   :  { %505 = vmatprep.subr.mxu0 %v6192_v45  ;;  %423 = vmatpush1.msra.mxu1 %v6167_v37 }
  0x2c   :  { %509 = vmatpush1.msra.mxu0 %v6203_v49  ;;  %425 = vmatprep.subr.mxu1 %v6184_v42 }
  0x2d   :  { %513 = vmatprep.subr.mxu0 %v6216_v54  ;;  %427 = vmatpush1.msra.mxu1 %v6206_v50 }
  0x2e   :  { %460 = vmatprep.mubr.f32.mxu1 %v7532_v27  ;;  %517 = vmatpush1.msra.mxu0 %v6247_v0 }
  0x2f   :  { %464 = vmatmul.mubr.f32.vlgmr.msra.gmra.mxu1 %v7532_v27  ;;  %521 = vmatprep.subr.mxu0 %v6250_v1 }
  0x30   :  { %607 = vmatprep.subr.mxu1 %v6075_v4  ;;  %525 = vmatpush1.msra.mxu0 %v6260_v8 }
  0x31   :  { %609 = vmatpush1.msra.mxu1 %v6077_v5  ;;  %529 = vmatprep.subr.mxu0 %v6263_v9 }
  0x32   :  { %611 = vmatprep.subr.mxu1 %v6079_v6  ;;  %533 = vmatpush1.msra.mxu0 %v6275_v20  ;;  %v678_v20 = vld [vmem:[%s7458_s0] sm:$0xf] }
  0x33   :  { %613 = vmatpush1.msra.mxu1 %v6090_v10  ;;  %537 = vmatprep.subr.mxu0 %v6287_v39 }
  0x34   :  { %615 = vmatprep.subr.mxu1 %v6092_v11  ;;  %541 = vmatpush1.msra.mxu0 %v6302_v53 }
  0x35   :  { %617 = vmatpush1.msra.mxu1 %v6094_v12  ;;  %545 = vmatprep.subr.mxu0 %v6312_v14 }
  0x36   :  { %619 = vmatprep.subr.mxu1 %v6106_v16  ;;  %549 = vmatpush1.msra.mxu0 %v6335_v19 }
  0x37   :  { %582 = vmatprep.mubr.f32.mxu0 %v7532_v27  ;;  %621 = vmatpush1.msra.mxu1 %v6108_v17 }
  0x38   :  { %584 = vmatmul.mubr.f32.vlgmr.msra.gmra.mxu0 %v7532_v27  ;;  %623 = vmatprep.subr.mxu1 %v6110_v18 }
  0x39   :  { %625 = vmatpush1.msra.mxu1 %v6125_v23  ;;  %670 = vmatprep.mubr.f32.mxu1 %v7532_v27 }
  0x3a   :  { %627 = vmatprep.subr.mxu1 %v6130_v25  ;;  %778 = vmatprep.subr.mxu0 %v6075_v4 }
  0x3b   :  { %629 = vmatpush1.msra.mxu1 %v6150_v31  ;;  %780 = vmatpush1.msra.mxu0 %v6077_v5 }
  0x3c   :  { %631 = vmatprep.subr.mxu1 %v6155_v33  ;;  %782 = vmatprep.subr.mxu0 %v6079_v6 }
  0x3d   :  { %633 = vmatpush1.msra.mxu1 %v6167_v37  ;;  %784 = vmatpush1.msra.mxu0 %v6090_v10 }
  0x3e   :  { %635 = vmatprep.subr.mxu1 %v6184_v42  ;;  %786 = vmatprep.subr.mxu0 %v6092_v11 }
  0x3f   :  { %637 = vmatpush1.msra.mxu1 %v6206_v50  ;;  %788 = vmatpush1.msra.mxu0 %v6094_v12 }
  0x40   :  { %672 = vmatmul.mubr.f32.vlgmr.msra.gmra.mxu1 %v7532_v27  ;;  %874 = vmatprep.subr.mxu1 %v6198_v47 }
  0x41   :  { %880 = vmatpush1.msra.mxu1 %v6209_v51  ;;  %790 = vmatprep.subr.mxu0 %v6106_v16 }
  0x42   :  { %886 = vmatprep.subr.mxu1 %v6211_v52  ;;  %792 = vmatpush1.msra.mxu0 %v6108_v17 }
  0x43   :  { %892 = vmatpush1.msra.mxu1 %v6220_v55  ;;  %794 = vmatprep.subr.mxu0 %v6110_v18 }
  0x44   :  { %898 = vmatprep.subr.mxu1 %v6232_v59  ;;  %997 = vmatprep.mubr.f32.mxu1 %v7532_v27 }
  0x45   :  { %904 = vmatpush1.msra.mxu1 %v6244_v63  ;;  %796 = vmatpush1.msra.mxu0 %v6125_v23 }
  0x46   :  { %910 = vmatprep.subr.mxu1 %v7538_v28  ;;  %798 = vmatprep.subr.mxu0 %v6130_v25 }
  0x47   :  { %916 = vmatpush1.msra.mxu1 %v7539_v60  ;;  %800 = vmatpush1.msra.mxu0 %v6150_v31 }
  0x48   :  { %922 = vmatprep.subr.mxu1 %v6297_v44  ;;  %802 = vmatprep.subr.mxu0 %v6155_v33  ;;  %v7540_v44 = vld [vmem:[#allocation2_spill] sm:$0xff] }
  0x49   :  { %928 = vmatpush1.msra.mxu1 %v6305_v56  ;;  %804 = vmatpush1.msra.mxu0 %v6167_v37 }
  0x4a   :  { %934 = vmatprep.subr.mxu1 %v6307_v29  ;;  %806 = vmatprep.subr.mxu0 %v6184_v42 }
  0x4b   :  { %940 = vmatpush1.msra.mxu1 %v6316_v15  ;;  %808 = vmatpush1.msra.mxu0 %v6206_v50 }
  0x4c   :  { %946 = vmatprep.subr.mxu1 %v6326_v7  ;;  %841 = vmatprep.mubr.f32.mxu0 %v7532_v27 }
  0x4d   :  { %952 = vmatpush1.msra.mxu1 %v6332_v48  ;;  %1023 = vmatprep.subr.mxu0 %v7540_v44 }
  0x4e   :  { %958 = vmatprep.subr.mxu1 %v6339_v38 }
  0x4f   :  { %964 = vmatpush1.msra.mxu1 %v6349_v3  ;;  %v5861_v3 = vld.sshfl [vmem:[%s7458_s0 + $0x1c] sm:$0x33 pattern:$0x76325410] }
  0x50   :  { %1127 = vmatprep.subr.mxu1 %v6075_v4 }
  0xd5   :  { %v118_v29 = vpop.f32.mrf.mxu0 }
  0xd7   :  { %v120_v56 = vpop.f32.mrf.mxu0 }
  0xde   :  { %v270_v60 = vpop.f32.mrf.mxu1 }
  0xdf   :  { %v271_v7 = vadd.f32 %v270_v60, %v118_v29  ;;  %v690_v60 = vcombine.high %v5861_v3, %v5861_v3 }
  0xe0   :  { %v272_v28 = vpop.f32.mrf.mxu1 }
  0xe1   :  { %v273_v14 = vadd.f32 %v272_v28, %v120_v56 }
  0xe6   :  { %v375_v15 = vpop.f32.mrf.mxu0 }
  0xe7   :  { %v376_v55 = vadd.f32 %v375_v15, %v271_v7 }
  0xe8   :  { %v377_v63 = vpop.f32.mrf.mxu0 }
  0xe9   :  { %v378_v53 = vadd.f32 %v377_v63, %v273_v14 }
  0xef   :  { %v465_v19 = vpop.f32.mrf.mxu1 }
  0xf0   :  { %v466_v44 = vadd.f32 %v465_v19, %v376_v55 }
  0xf1   :  { %v467_v48 = vpop.f32.mrf.mxu1 }
  0xf2   :  { %v468_v38 = vadd.f32 %v467_v48, %v378_v53 }
  0xf8   :  { %v585_v59 = vpop.f32.mrf.mxu0 }
  0xf9   :  { %v586_v39 = vadd.f32 %v585_v59, %v466_v44 }
  0xfa   :  { %v587_v52 = vpop.f32.mrf.mxu0 }
  0xfb   :  { %v588_v47 = vadd.f32 %v587_v52, %v468_v38 }
 0x100   :  { %v673_v51 = vpop.f32.mrf.mxu1 }
 0x101   :  { %v674_v29 = vadd.f32 %v673_v51, %v586_v39 }
 0x102   :  { %v675_v56 = vpop.f32.mrf.mxu1 }
 0x103   :  { %v681_v7 = vadd.f32 %v678_v20, %v674_v29  ;;  %v676_v15 = vadd.f32 %v675_v56, %v588_v47 }
 0x105   :  { %5917 = vtanh.f32 %v681_v7  ;;  %v692_v19 = vadd.f32 %v690_v60, %v676_v15  ;;  %v5862_v59 = vmul.f32 -1.442695, %v681_v7 }
 0x107   :  { %5919 = vtanh.f32 %v692_v19  ;;  %v5863_v44 = vmul.f32 -1.442695, %v692_v19 }
 0x108   :  { %5921 = vpow2.f32 %v5862_v59 }
 0x109   :  { %5923 = vpow2.f32 %v5863_v44 }
 0x112   :  { %v5918_v55 = vpop.eup %5917 }
 0x113   :  { %709 = vrot.lane.b32.xlu0 %v5918_v55, %s6046_s16 }
 0x114   :  { %v5920_v63 = vpop.eup %5919 }
 0x115   :  { %v5922_v52 = vpop.eup %5921 }
 0x116   :  { %v696_v51 = vadd.f32 1.0, %v5922_v52  ;;  %v5924_v39 = vpop.eup %5923 }
 0x117   :  { %720 = vrot.lane.b32.xlu0 %v5920_v63, %s6046_s16  ;;  %v702_v20 = vadd.f32 1.0, %v5924_v39 }
 0x118   :  { %5925 = vrcp.f32 %v696_v51 }
 0x119   :  { %5927 = vrcp.f32 %v702_v20 }
 0x125   :  { %v5926_v47 = vpop.eup %5925 }
 0x126   :  { %v5928_v48 = vpop.eup %5927  ;;  %v707_v28 = vmul.f32 0.0, %v5926_v47 }
 0x127   :  { %v718_v56 = vmul.f32 0.0, %v5928_v48 }
 0x185   :  { %v710_v53 = vpop.permute.xlu0 %709 }
 0x186   :  { %v712_v14 = vmul.f32 %v5926_v47, %v710_v53 }
 0x188   :  { %714 = vrot.lane.b32.xlu1 %v712_v14, %s6046_s16 }
 0x189   :  { %v721_v38 = vpop.permute.xlu0 %720 }
 0x18a   :  { %v723_v3 = vmul.f32 %v5928_v48, %v721_v38 }
 0x18c   :  { %725 = vrot.lane.b32.xlu1 %v723_v3, %s6046_s16 }
 0x1fa   :  { %v715_v29 = vpop.permute.xlu1 %714 }
 0x1fb   :  { %v6466_v60 = vadd.f32 %v715_v29, %v707_v28  ;;  %v7542_v28 = vld [vmem:[#allocation3_spill] sm:$0xff] }
 0x1fc   :  { %v7543_v29 = vld [vmem:[#allocation11_spill] sm:$0xff] }
 0x1fd   :  { %5929 = vtanh.f32 %v6466_v60 }
 0x1fe   :  { %v726_v7 = vpop.permute.xlu1 %725 }
 0x1ff   :  { %v6469_v15 = vadd.f32 %v726_v7, %v718_v56  ;;  %v7544_v56 = vld [vmem:[#allocation4_spill] sm:$0xff] }
 0x200   :  { %v7545_v7 = vld [vmem:[#allocation12_spill] sm:$0xff] }
 0x201   :  { %5931 = vtanh.f32 %v6469_v15 }
 0x20a   :  { %v5930_v19 = vpop.eup %5929 }
 0x20b   :  { %731 = vrot.lane.b32.xlu0 %v5930_v19, %s6046_s16  ;;  %v7546_v19 = vld [vmem:[#allocation5_spill] sm:$0xff] }
 0x20e   :  { %v5932_v55 = vpop.eup %5931 }
 0x20f   :  { %737 = vrot.lane.b32.xlu1 %v5932_v55, %s6046_s16  ;;  %v7547_v55 = vld [vmem:[#allocation15_spill] sm:$0xff] }
 0x27d   :  { %v732_v63 = vpop.permute.xlu0 %731 }
 0x27e   :  { %v734_v59 = vmul.f32 %v5926_v47, %v732_v63  ;;  %v7548_v63 = vld [vmem:[#allocation6_spill] sm:$0xff] }
 0x280   :  { %742 = vrot.lane.b32.xlu0 %v734_v59, %s6047_s17  ;;  %v7549_v59 = vld [vmem:[#allocation18_spill] sm:$0xff] }
 0x281   :  { %v738_v44 = vpop.permute.xlu1 %737 }
 0x282   :  { %v6475_v52 = vmul.f32 %v5928_v48, %v738_v44  ;;  %v7550_v44 = vld [vmem:[#allocation7_spill] sm:$0xff] }
 0x284   :  { %7541 = vst [vmem:[#allocation25_spill] sm:$0xff] %v6475_v52  ;;  %753 = vrot.lane.b32.xlu1 %v6475_v52, %s6048_s18  ;;  %v7560_v52 = vld [vmem:[#allocation21_spill] sm:$0xff] }
 0x2f2   :  { %v743_v51 = vpop.permute.xlu0 %742 }
 0x2f3   :  { %746 = vst.msk [vmem:[%s7459_s2] sm:$0x3] %vm745_vm0, %v743_v51 }
 0x2f6   :  { %v754_v39 = vpop.permute.xlu1 %753 }
 0x2f7   :  { %v757_v20 = vsel %vm756_vm1, %v743_v51, %v754_v39  ;;  %v7551_v51 = vld [vmem:[#allocation22_spill] sm:$0xff]  ;;  %v7552_v39 = vld [vmem:[#allocation8_spill] sm:$0xff] }
 0x2f8   :  { %v759_v47 = vsel %vm27_vm2, %v757_v20, 0  ;;  %v7553_v20 = vld [vmem:[#allocation9_spill] sm:$0xff] }
 0x2f9   :  { %v6485_v53 = vand.u32 4294901760, %v759_v47 }
 0x2fb   :  { %v843_v14 = vsub.f32 %v759_v47, %v6485_v53  ;;  %999 = vmatmul.mubr.f32.vlgmr.msra.gmra.mxu1 %v6485_v53  ;;  %v7554_v47 = vld [vmem:[#allocation13_spill] sm:$0xff] }
 0x2fc   :  { %1129 = vmatpush1.msra.mxu1 %v6077_v5  ;;  %1190 = vmatprep.mubr.f32.mxu1 %v7532_v27 }
 0x2fd   :  { %v844_v48 = vand.u32 4294901760, %v843_v14  ;;  %1131 = vmatprep.subr.mxu1 %v6079_v6 }
 0x2fe   :  { %1133 = vmatpush1.msra.mxu1 %v6090_v10 }
 0x2ff   :  { %1135 = vmatprep.subr.mxu1 %v6092_v11  ;;  %v845_v38 = vsub.f32 %v843_v14, %v844_v48 }
 0x300   :  { %1137 = vmatpush1.msra.mxu1 %v6094_v12 }
 0x301   :  { %1139 = vmatprep.subr.mxu1 %v6106_v16  ;;  %v846_v3 = vand.u32 4294901760, %v845_v38  ;;  %v7557_v38 = vld [vmem:[#allocation17_spill] sm:$0xff] }
 0x302   :  { %1141 = vmatpush1.msra.mxu1 %v6108_v17 }
 0x303   :  { %1143 = vmatprep.subr.mxu1 %v6110_v18  ;;  %847 = vmatmul.mubr.f32.vlgmr.msra.gmra.mxu0 %v846_v3  ;;  %v7558_v3 = vld [vmem:[#allocation19_spill] sm:$0xff] }
 0x304   :  { %1026 = vmatpush1.msra.mxu0 %v6128_v24  ;;  %1145 = vmatpush1.msra.mxu1 %v6125_v23 }
 0x305   :  { %1029 = vmatprep.subr.mxu0 %v6133_v26  ;;  %1147 = vmatprep.subr.mxu1 %v6130_v25 }
 0x306   :  { %1032 = vmatpush1.msra.mxu0 %v6153_v32  ;;  %1149 = vmatpush1.msra.mxu1 %v6150_v31 }
 0x307   :  { %1035 = vmatprep.subr.mxu0 %v6165_v36  ;;  %1151 = vmatprep.subr.mxu1 %v6155_v33 }
 0x308   :  { %1038 = vmatpush1.msra.mxu0 %v6181_v41  ;;  %1153 = vmatpush1.msra.mxu1 %v6167_v37 }
 0x309   :  { %1041 = vmatprep.subr.mxu0 %v6195_v46  ;;  %1155 = vmatprep.subr.mxu1 %v6184_v42 }
 0x30a   :  { %1044 = vmatpush1.msra.mxu0 %v6225_v57  ;;  %1157 = vmatpush1.msra.mxu1 %v6206_v50 }
 0x30b   :  { %1047 = vmatprep.subr.mxu0 %v6228_v58  ;;  %1194 = vmatmul.mubr.f32.vlgmr.msra.gmra.mxu1 %v844_v48  ;;  %v7556_v48 = vld [vmem:[#allocation16_spill] sm:$0xff] }
 0x30c   :  { %1337 = vmatprep.subr.mxu1 %v6075_v4  ;;  %1050 = vmatpush1.msra.mxu0 %v6237_v61 }
 0x30d   :  { %1339 = vmatpush1.msra.mxu1 %v6077_v5  ;;  %1053 = vmatprep.subr.mxu0 %v6240_v62 }
 0x30e   :  { %1341 = vmatprep.subr.mxu1 %v6079_v6  ;;  %1056 = vmatpush1.msra.mxu0 %v6253_v2 }
 0x30f   :  { %1343 = vmatpush1.msra.mxu1 %v6090_v10  ;;  %1059 = vmatprep.subr.mxu0 %v6266_v13 }
 0x310   :  { %1345 = vmatprep.subr.mxu1 %v6092_v11  ;;  %1062 = vmatpush1.msra.mxu0 %v6278_v21 }
 0x311   :  { %1347 = vmatpush1.msra.mxu1 %v6094_v12  ;;  %1065 = vmatprep.subr.mxu0 %v6291_v43 }
 0x312   :  { %1349 = vmatprep.subr.mxu1 %v6106_v16  ;;  %1068 = vmatpush1.msra.mxu0 %v6322_v22 }
 0x313   :  { %1101 = vmatprep.mubr.f32.mxu0 %v7532_v27  ;;  %1351 = vmatpush1.msra.mxu1 %v6108_v17 }
 0x314   :  { %1104 = vmatmul.mubr.f32.vlgmr.msra.gmra.mxu0 %v843_v14  ;;  %1219 = vmatprep.subr.mxu0 %v6148_v30  ;;  %v7555_v14 = vld [vmem:[#allocation14_spill] sm:$0xff] }
 0x315   :  { %1353 = vmatprep.subr.mxu1 %v6110_v18  ;;  %1223 = vmatpush1.msra.mxu0 %v6159_v34 }
 0x316   :  { %1355 = vmatpush1.msra.mxu1 %v6125_v23  ;;  %1227 = vmatprep.subr.mxu0 %v6162_v35 }
 0x317   :  { %1357 = vmatprep.subr.mxu1 %v6130_v25  ;;  %1231 = vmatpush1.msra.mxu0 %v6178_v40 }
 0x318   :  { %1359 = vmatpush1.msra.mxu1 %v6150_v31  ;;  %1235 = vmatprep.subr.mxu0 %v6192_v45 }
 0x319   :  { %1361 = vmatprep.subr.mxu1 %v6155_v33  ;;  %1239 = vmatpush1.msra.mxu0 %v6203_v49 }
 0x31a   :  { %1363 = vmatpush1.msra.mxu1 %v6167_v37  ;;  %1243 = vmatprep.subr.mxu0 %v6216_v54 }
 0x31b   :  { %1365 = vmatprep.subr.mxu1 %v6184_v42  ;;  %1247 = vmatpush1.msra.mxu0 %v6247_v0 }
 0x31c   :  { %1367 = vmatpush1.msra.mxu1 %v6206_v50  ;;  %1400 = vmatprep.mubr.f32.mxu1 %v7532_v27 }
 0x31d   :  { %1251 = vmatprep.subr.mxu0 %v6250_v1  ;;  %1402 = vmatmul.mubr.f32.vlgmr.msra.gmra.mxu1 %v6485_v53 }
 0x31e   :  { %1255 = vmatpush1.msra.mxu0 %v6260_v8  ;;  %1312 = vmatprep.mubr.f32.mxu0 %v7532_v27 }
 0x31f   :  { %1259 = vmatprep.subr.mxu0 %v6263_v9  ;;  %1604 = vmatprep.subr.mxu1 %v7542_v28  ;;  %v5865_v28 = vld [vmem:[%s7458_s0 + $0x4] sm:$0xf] }
 0x320   :  { %1263 = vmatpush1.msra.mxu0 %v7543_v29  ;;  %1610 = vmatpush1.msra.mxu1 %v7544_v56  ;;  %v5867_v56 = vld.sshfl [vmem:[%s7458_s0 + $0x18] sm:$0x33 pattern:$0x76325410] }
 0x321   :  { %1267 = vmatprep.subr.mxu0 %v7545_v7  ;;  %1616 = vmatprep.subr.mxu1 %v7546_v19 }
 0x322   :  { %1271 = vmatpush1.msra.mxu0 %v7547_v55  ;;  %1622 = vmatpush1.msra.mxu1 %v7548_v63 }
 0x323   :  { %1275 = vmatprep.subr.mxu0 %v7549_v59  ;;  %1628 = vmatprep.subr.mxu1 %v7550_v44 }
 0x324   :  { %1279 = vmatpush1.msra.mxu0 %v7551_v51  ;;  %1634 = vmatpush1.msra.mxu1 %v7552_v39 }
 0x325   :  { %1314 = vmatmul.mubr.f32.vlgmr.msra.gmra.mxu0 %v6485_v53  ;;  %1640 = vmatprep.subr.mxu1 %v7553_v20  ;;  %v7559_v53 = vld [vmem:[#allocation20_spill] sm:$0xff] }
 0x326   :  { %1646 = vmatpush1.msra.mxu1 %v7554_v47  ;;  %1508 = vmatprep.subr.mxu0 %v6075_v4 }
 0x327   :  { %1652 = vmatprep.subr.mxu1 %v7555_v14  ;;  %1510 = vmatpush1.msra.mxu0 %v6077_v5  ;;  %v7561_v14 = vld [vmem:[#allocation23_spill] sm:$0xff] }
 0x328   :  { %1658 = vmatpush1.msra.mxu1 %v7556_v48  ;;  %1512 = vmatprep.subr.mxu0 %v6079_v6  ;;  %v7562_v48 = vld [vmem:[#allocation24_spill] sm:$0xff] }
 0x329   :  { %1664 = vmatprep.subr.mxu1 %v7557_v38  ;;  %1514 = vmatpush1.msra.mxu0 %v6090_v10 }
 0x32a   :  { %1670 = vmatpush1.msra.mxu1 %v7558_v3  ;;  %1516 = vmatprep.subr.mxu0 %v6092_v11 }
 0x32b   :  { %1676 = vmatprep.subr.mxu1 %v7559_v53  ;;  %1518 = vmatpush1.msra.mxu0 %v6094_v12 }
 0x32c   :  { %1682 = vmatpush1.msra.mxu1 %v7560_v52  ;;  %1520 = vmatprep.subr.mxu0 %v6106_v16 }
 0x32d   :  { %1688 = vmatprep.subr.mxu1 %v7561_v14  ;;  %1522 = vmatpush1.msra.mxu0 %v6108_v17 }
 0x32e   :  { %1694 = vmatpush1.msra.mxu1 %v7562_v48  ;;  %1524 = vmatprep.subr.mxu0 %v6110_v18  ;;  %v7563_v48 = vld [vmem:[#allocation2_spill] sm:$0xff] }
 0x32f   :  { %1727 = vmatprep.mubr.f32.mxu1 %v7532_v27  ;;  %1857 = vmatprep.subr.mxu1 %v6075_v4 }
 0x330   :  { %1526 = vmatpush1.msra.mxu0 %v6125_v23  ;;  %1571 = vmatprep.mubr.f32.mxu0 %v7532_v27 }
 0x331   :  { %1528 = vmatprep.subr.mxu0 %v6130_v25 }
 0x332   :  { %1530 = vmatpush1.msra.mxu0 %v6150_v31 }
 0x333   :  { %1532 = vmatprep.subr.mxu0 %v6155_v33 }
 0x334   :  { %1534 = vmatpush1.msra.mxu0 %v6167_v37 }
 0x335   :  { %1536 = vmatprep.subr.mxu0 %v6184_v42 }
 0x336   :  { %1538 = vmatpush1.msra.mxu0 %v6206_v50 }
 0x337   :  { %1753 = vmatprep.subr.mxu0 %v7563_v48 }
 0x3bb   :  { %v1000_v52 = vpop.f32.mrf.mxu1 }
 0x3bd   :  { %v1002_v38 = vpop.f32.mrf.mxu1 }
 0x3c3   :  { %v848_v14 = vpop.f32.mrf.mxu0 }
 0x3c4   :  { %v1001_v47 = vadd.f32 %v1000_v52, %v848_v14 }
 0x3c5   :  { %v850_v53 = vpop.f32.mrf.mxu0 }
 0x3c6   :  { %v1003_v51 = vadd.f32 %v1002_v38, %v850_v53  ;;  %v1421_v38 = vcombine.high %v5867_v56, %v5867_v56 }
 0x3cb   :  { %v1195_v20 = vpop.f32.mrf.mxu1 }
 0x3cd   :  { %v1197_v63 = vpop.f32.mrf.mxu1 }
 0x3d4   :  { %v1105_v3 = vpop.f32.mrf.mxu0 }
 0x3d5   :  { %v1106_v44 = vadd.f32 %v1105_v3, %v1001_v47 }
 0x3d6   :  { %v1107_v39 = vpop.f32.mrf.mxu0 }
 0x3d7   :  { %v1108_v59 = vadd.f32 %v1107_v39, %v1003_v51  ;;  %v1196_v55 = vadd.f32 %v1195_v20, %v1106_v44 }
 0x3d9   :  { %v1198_v29 = vadd.f32 %v1197_v63, %v1108_v59 }
 0x3dd   :  { %v1403_v19 = vpop.f32.mrf.mxu1 }
 0x3df   :  { %v1405_v47 = vpop.f32.mrf.mxu1 }
 0x3e5   :  { %v1315_v7 = vpop.f32.mrf.mxu0 }
 0x3e6   :  { %v1316_v48 = vadd.f32 %v1315_v7, %v1196_v55 }
 0x3e7   :  { %v1317_v52 = vpop.f32.mrf.mxu0 }
 0x3e8   :  { %v1404_v14 = vadd.f32 %v1403_v19, %v1316_v48  ;;  %v1318_v9 = vadd.f32 %v1317_v52, %v1198_v29 }
 0x3ea   :  { %v1412_v51 = vadd.f32 %v5865_v28, %v1404_v14  ;;  %v1406_v39 = vadd.f32 %v1405_v47, %v1318_v9 }
 0x3ec   :  { %5933 = vtanh.f32 %v1412_v51  ;;  %v1423_v44 = vadd.f32 %v1421_v38, %v1406_v39  ;;  %v5868_v7 = vmul.f32 -1.442695, %v1412_v51 }
 0x3ee   :  { %5935 = vtanh.f32 %v1423_v44  ;;  %v5869_v55 = vmul.f32 -1.442695, %v1423_v44 }
 0x3ef   :  { %5937 = vpow2.f32 %v5868_v7 }
 0x3f0   :  { %5939 = vpow2.f32 %v5869_v55 }
 0x3f9   :  { %v5934_v20 = vpop.eup %5933 }
 0x3fa   :  { %1440 = vrot.lane.b32.xlu0 %v5934_v20, %s6046_s16 }
 0x3fb   :  { %v5936_v3 = vpop.eup %5935 }
 0x3fc   :  { %1451 = vrot.lane.b32.xlu1 %v5936_v3, %s6046_s16  ;;  %v5938_v63 = vpop.eup %5937 }
 0x3fd   :  { %v5940_v19 = vpop.eup %5939  ;;  %v1427_v29 = vadd.f32 1.0, %v5938_v63 }
 0x3fe   :  { %v1433_v56 = vadd.f32 1.0, %v5940_v19 }
 0x3ff   :  { %5941 = vrcp.f32 %v1427_v29 }
 0x400   :  { %5943 = vrcp.f32 %v1433_v56 }
 0x40c   :  { %v5942_v9 = vpop.eup %5941 }
 0x40d   :  { %v5944_v48 = vpop.eup %5943  ;;  %v1438_v14 = vmul.f32 %v5942_v9, %v6466_v60 }
 0x40e   :  { %v1449_v51 = vmul.f32 %v5944_v48, %v6469_v15 }
 0x46c   :  { %v1441_v28 = vpop.permute.xlu0 %1440 }
 0x46d   :  { %v1443_v59 = vmul.f32 %v5942_v9, %v1441_v28 }
 0x46e   :  { %v1452_v53 = vpop.permute.xlu1 %1451 }
 0x46f   :  { %1445 = vrot.lane.b32.xlu0 %v1443_v59, %s6046_s16  ;;  %v1454_v52 = vmul.f32 %v5944_v48, %v1452_v53 }
 0x471   :  { %1456 = vrot.lane.b32.xlu1 %v1454_v52, %s6046_s16  ;;  %v7565_v52 = vld [vmem:[#allocation10_spill] sm:$0xff] }
 0x4e1   :  { %v1446_v38 = vpop.permute.xlu0 %1445 }
 0x4e2   :  { %v6604_v47 = vadd.f32 %v1446_v38, %v1438_v14  ;;  %v7566_v14 = vld [vmem:[#allocation3_spill] sm:$0xff] }
 0x4e3   :  { %v1457_v39 = vpop.permute.xlu1 %1456  ;;  %v7567_v38 = vld [vmem:[#allocation11_spill] sm:$0xff] }
 0x4e4   :  { %5945 = vtanh.f32 %v6604_v47  ;;  %v6608_v44 = vadd.f32 %v1457_v39, %v1449_v51  ;;  %v7568_v51 = vld [vmem:[#allocation4_spill] sm:$0xff] }
 0x4e5   :  { %v7569_v39 = vld [vmem:[#allocation12_spill] sm:$0xff] }
 0x4e6   :  { %5947 = vtanh.f32 %v6608_v44 }
 0x4f1   :  { %v5946_v20 = vpop.eup %5945 }
 0x4f2   :  { %1462 = vrot.lane.b32.xlu0 %v5946_v20, %s6046_s16  ;;  %v7570_v20 = vld [vmem:[#allocation5_spill] sm:$0xff] }
 0x4f3   :  { %v5948_v3 = vpop.eup %5947 }
 0x4f4   :  { %1468 = vrot.lane.b32.xlu1 %v5948_v3, %s6046_s16  ;;  %v7571_v3 = vld [vmem:[#allocation15_spill] sm:$0xff] }
 0x564   :  { %v1463_v7 = vpop.permute.xlu0 %1462 }
 0x565   :  { %v1465_v60 = vmul.f32 %v5942_v9, %v1463_v7  ;;  %v7572_v7 = vld [vmem:[#allocation6_spill] sm:$0xff] }
 0x566   :  { %v1469_v55 = vpop.permute.xlu1 %1468 }
 0x567   :  { %1473 = vrot.lane.b32.xlu0 %v1465_v60, %s6047_s17  ;;  %v6614_v63 = vmul.f32 %v5944_v48, %v1469_v55  ;;  %v7573_v60 = vld [vmem:[#allocation18_spill] sm:$0xff]  ;;  %v7574_v55 = vld [vmem:[#allocation7_spill] sm:$0xff] }
 0x569   :  { %7564 = vst [vmem:[#allocation26_spill] sm:$0xff] %v6614_v63  ;;  %1484 = vrot.lane.b32.xlu1 %v6614_v63, %s6048_s18  ;;  %v7584_v63 = vld [vmem:[#allocation21_spill] sm:$0xff] }
 0x5d9   :  { %v1474_v15 = vpop.permute.xlu0 %1473 }
 0x5da   :  { %5870 = vst.msk [vmem:[%s7459_s2 + $0x2] sm:$0x3] %vm745_vm0, %v1474_v15 }
 0x5db   :  { %v1485_v19 = vpop.permute.xlu1 %1484 }
 0x5dc   :  { %v1487_v29 = vsel %vm756_vm1, %v1474_v15, %v1485_v19  ;;  %v7575_v15 = vld [vmem:[#allocation22_spill] sm:$0xff]  ;;  %v7576_v19 = vld [vmem:[#allocation8_spill] sm:$0xff] }
 0x5dd   :  { %v1489_v56 = vsel %vm27_vm2, %v1487_v29, 0  ;;  %v7577_v29 = vld [vmem:[#allocation9_spill] sm:$0xff] }
 0x5de   :  { %v6624_v9 = vand.u32 4294901760, %v1489_v56 }
 0x5e0   :  { %v1573_v28 = vsub.f32 %v1489_v56, %v6624_v9  ;;  %1729 = vmatmul.mubr.f32.vlgmr.msra.gmra.mxu1 %v6624_v9  ;;  %v7578_v56 = vld [vmem:[#allocation13_spill] sm:$0xff] }
 0x5e1   :  { %1859 = vmatpush1.msra.mxu1 %v6077_v5  ;;  %1920 = vmatprep.mubr.f32.mxu1 %v7532_v27 }
 0x5e2   :  { %v1574_v59 = vand.u32 4294901760, %v1573_v28  ;;  %1861 = vmatprep.subr.mxu1 %v6079_v6 }
 0x5e3   :  { %1863 = vmatpush1.msra.mxu1 %v6090_v10 }
 0x5e4   :  { %1865 = vmatprep.subr.mxu1 %v6092_v11  ;;  %v1575_v48 = vsub.f32 %v1573_v28, %v1574_v59 }
 0x5e5   :  { %1867 = vmatpush1.msra.mxu1 %v6094_v12 }
 0x5e6   :  { %1869 = vmatprep.subr.mxu1 %v6106_v16  ;;  %v1576_v53 = vand.u32 4294901760, %v1575_v48  ;;  %v7581_v48 = vld [vmem:[#allocation17_spill] sm:$0xff] }
 0x5e7   :  { %1871 = vmatpush1.msra.mxu1 %v6108_v17 }
 0x5e8   :  { %1873 = vmatprep.subr.mxu1 %v6110_v18  ;;  %1577 = vmatmul.mubr.f32.vlgmr.msra.gmra.mxu0 %v1576_v53  ;;  %v7582_v53 = vld [vmem:[#allocation19_spill] sm:$0xff] }
 0x5e9   :  { %1756 = vmatpush1.msra.mxu0 %v6128_v24  ;;  %1875 = vmatpush1.msra.mxu1 %v6125_v23 }
 0x5ea   :  { %1759 = vmatprep.subr.mxu0 %v6133_v26  ;;  %1877 = vmatprep.subr.mxu1 %v6130_v25 }
 0x5eb   :  { %1762 = vmatpush1.msra.mxu0 %v6153_v32  ;;  %1879 = vmatpush1.msra.mxu1 %v6150_v31 }
 0x5ec   :  { %1765 = vmatprep.subr.mxu0 %v6165_v36  ;;  %1881 = vmatprep.subr.mxu1 %v6155_v33 }
 0x5ed   :  { %1768 = vmatpush1.msra.mxu0 %v6181_v41  ;;  %1883 = vmatpush1.msra.mxu1 %v6167_v37 }
 0x5ee   :  { %1771 = vmatprep.subr.mxu0 %v6195_v46  ;;  %1885 = vmatprep.subr.mxu1 %v6184_v42 }
 0x5ef   :  { %1774 = vmatpush1.msra.mxu0 %v6225_v57  ;;  %1887 = vmatpush1.msra.mxu1 %v6206_v50 }
 0x5f0   :  { %1777 = vmatprep.subr.mxu0 %v6228_v58  ;;  %1924 = vmatmul.mubr.f32.vlgmr.msra.gmra.mxu1 %v1574_v59  ;;  %v7580_v59 = vld [vmem:[#allocation16_spill] sm:$0xff] }
 0x5f1   :  { %2067 = vmatprep.subr.mxu1 %v6075_v4  ;;  %1780 = vmatpush1.msra.mxu0 %v6237_v61 }
 0x5f2   :  { %2069 = vmatpush1.msra.mxu1 %v6077_v5  ;;  %1783 = vmatprep.subr.mxu0 %v6240_v62 }
 0x5f3   :  { %2071 = vmatprep.subr.mxu1 %v6079_v6  ;;  %1786 = vmatpush1.msra.mxu0 %v6253_v2 }
 0x5f4   :  { %2073 = vmatpush1.msra.mxu1 %v6090_v10  ;;  %1789 = vmatprep.subr.mxu0 %v6266_v13 }
 0x5f5   :  { %2075 = vmatprep.subr.mxu1 %v6092_v11  ;;  %1792 = vmatpush1.msra.mxu0 %v6278_v21 }
 0x5f6   :  { %2077 = vmatpush1.msra.mxu1 %v6094_v12  ;;  %1795 = vmatprep.subr.mxu0 %v6291_v43 }
 0x5f7   :  { %2079 = vmatprep.subr.mxu1 %v6106_v16  ;;  %1798 = vmatpush1.msra.mxu0 %v6322_v22 }
 0x5f8   :  { %1831 = vmatprep.mubr.f32.mxu0 %v7532_v27  ;;  %2081 = vmatpush1.msra.mxu1 %v6108_v17 }
 0x5f9   :  { %1834 = vmatmul.mubr.f32.vlgmr.msra.gmra.mxu0 %v1573_v28  ;;  %1949 = vmatprep.subr.mxu0 %v6148_v30  ;;  %v7579_v28 = vld [vmem:[#allocation14_spill] sm:$0xff] }
 0x5fa   :  { %2083 = vmatprep.subr.mxu1 %v6110_v18  ;;  %1953 = vmatpush1.msra.mxu0 %v6159_v34 }
 0x5fb   :  { %2085 = vmatpush1.msra.mxu1 %v6125_v23  ;;  %1957 = vmatprep.subr.mxu0 %v6162_v35 }
 0x5fc   :  { %2087 = vmatprep.subr.mxu1 %v6130_v25  ;;  %1961 = vmatpush1.msra.mxu0 %v6178_v40 }
 0x5fd   :  { %2089 = vmatpush1.msra.mxu1 %v6150_v31  ;;  %1965 = vmatprep.subr.mxu0 %v6192_v45 }
 0x5fe   :  { %2091 = vmatprep.subr.mxu1 %v6155_v33  ;;  %1969 = vmatpush1.msra.mxu0 %v6203_v49 }
 0x5ff   :  { %2093 = vmatpush1.msra.mxu1 %v6167_v37  ;;  %1973 = vmatprep.subr.mxu0 %v6216_v54 }
 0x600   :  { %2095 = vmatprep.subr.mxu1 %v6184_v42  ;;  %1977 = vmatpush1.msra.mxu0 %v6247_v0 }
 0x601   :  { %2097 = vmatpush1.msra.mxu1 %v6206_v50  ;;  %2130 = vmatprep.mubr.f32.mxu1 %v7532_v27 }
 0x602   :  { %1981 = vmatprep.subr.mxu0 %v6250_v1  ;;  %2132 = vmatmul.mubr.f32.vlgmr.msra.gmra.mxu1 %v6624_v9 }
 0x603   :  { %1985 = vmatpush1.msra.mxu0 %v6260_v8  ;;  %2042 = vmatprep.mubr.f32.mxu0 %v7532_v27 }
 0x604   :  { %1989 = vmatprep.subr.mxu0 %v7565_v52  ;;  %2334 = vmatprep.subr.mxu1 %v7566_v14  ;;  %v5872_v14 = vld [vmem:[%s7458_s0 + $0x8] sm:$0xf] }
 0x605   :  { %1993 = vmatpush1.msra.mxu0 %v7567_v38  ;;  %2340 = vmatpush1.msra.mxu1 %v7568_v51  ;;  %v5874_v51 = vld.sshfl [vmem:[%s7458_s0 + $0x14] sm:$0x33 pattern:$0x76325410] }
 0x606   :  { %1997 = vmatprep.subr.mxu0 %v7569_v39  ;;  %2346 = vmatprep.subr.mxu1 %v7570_v20 }
 0x607   :  { %2001 = vmatpush1.msra.mxu0 %v7571_v3  ;;  %2352 = vmatpush1.msra.mxu1 %v7572_v7 }
 0x608   :  { %2005 = vmatprep.subr.mxu0 %v7573_v60  ;;  %2358 = vmatprep.subr.mxu1 %v7574_v55 }
 0x609   :  { %2009 = vmatpush1.msra.mxu0 %v7575_v15  ;;  %2364 = vmatpush1.msra.mxu1 %v7576_v19 }
 0x60a   :  { %2044 = vmatmul.mubr.f32.vlgmr.msra.gmra.mxu0 %v6624_v9  ;;  %2370 = vmatprep.subr.mxu1 %v7577_v29  ;;  %v7583_v9 = vld [vmem:[#allocation20_spill] sm:$0xff] }
 0x60b   :  { %2376 = vmatpush1.msra.mxu1 %v7578_v56  ;;  %2238 = vmatprep.subr.mxu0 %v6075_v4 }
 0x60c   :  { %2382 = vmatprep.subr.mxu1 %v7579_v28  ;;  %2240 = vmatpush1.msra.mxu0 %v6077_v5  ;;  %v7585_v28 = vld [vmem:[#allocation23_spill] sm:$0xff] }
 0x60d   :  { %2388 = vmatpush1.msra.mxu1 %v7580_v59  ;;  %2242 = vmatprep.subr.mxu0 %v6079_v6  ;;  %v7586_v59 = vld [vmem:[#allocation24_spill] sm:$0xff] }
 0x60e   :  { %2394 = vmatprep.subr.mxu1 %v7581_v48  ;;  %2244 = vmatpush1.msra.mxu0 %v6090_v10 }
 0x60f   :  { %2400 = vmatpush1.msra.mxu1 %v7582_v53  ;;  %2246 = vmatprep.subr.mxu0 %v6092_v11 }
 0x610   :  { %2406 = vmatprep.subr.mxu1 %v7583_v9  ;;  %2248 = vmatpush1.msra.mxu0 %v6094_v12 }
 0x611   :  { %2412 = vmatpush1.msra.mxu1 %v7584_v63  ;;  %2250 = vmatprep.subr.mxu0 %v6106_v16 }
 0x612   :  { %2418 = vmatprep.subr.mxu1 %v7585_v28  ;;  %2252 = vmatpush1.msra.mxu0 %v6108_v17 }
 0x613   :  { %2424 = vmatpush1.msra.mxu1 %v7586_v59  ;;  %2254 = vmatprep.subr.mxu0 %v6110_v18  ;;  %v7587_v59 = vld [vmem:[#allocation2_spill] sm:$0xff] }
 0x614   :  { %2457 = vmatprep.mubr.f32.mxu1 %v7532_v27  ;;  %2587 = vmatprep.subr.mxu1 %v6075_v4 }
 0x615   :  { %2256 = vmatpush1.msra.mxu0 %v6125_v23  ;;  %2301 = vmatprep.mubr.f32.mxu0 %v7532_v27 }
 0x616   :  { %2258 = vmatprep.subr.mxu0 %v6130_v25 }
 0x617   :  { %2260 = vmatpush1.msra.mxu0 %v6150_v31 }
 0x618   :  { %2262 = vmatprep.subr.mxu0 %v6155_v33 }
 0x619   :  { %2264 = vmatpush1.msra.mxu0 %v6167_v37 }
 0x61a   :  { %2266 = vmatprep.subr.mxu0 %v6184_v42 }
 0x61b   :  { %2268 = vmatpush1.msra.mxu0 %v6206_v50 }
 0x61c   :  { %2483 = vmatprep.subr.mxu0 %v7587_v59 }
 0x6a0   :  { %v1730_v63 = vpop.f32.mrf.mxu1 }
 0x6a2   :  { %v1732_v48 = vpop.f32.mrf.mxu1 }
 0x6a8   :  { %v1578_v28 = vpop.f32.mrf.mxu0 }
 0x6a9   :  { %v1731_v56 = vadd.f32 %v1730_v63, %v1578_v28 }
 0x6aa   :  { %v1580_v9 = vpop.f32.mrf.mxu0 }
 0x6ab   :  { %v1733_v15 = vadd.f32 %v1732_v48, %v1580_v9  ;;  %v2151_v48 = vcombine.high %v5874_v51, %v5874_v51 }
 0x6b0   :  { %v1925_v29 = vpop.f32.mrf.mxu1 }
 0x6b2   :  { %v1927_v7 = vpop.f32.mrf.mxu1 }
 0x6b9   :  { %v1835_v53 = vpop.f32.mrf.mxu0 }
 0x6ba   :  { %v1836_v55 = vadd.f32 %v1835_v53, %v1731_v56 }
 0x6bb   :  { %v1837_v19 = vpop.f32.mrf.mxu0 }
 0x6bc   :  { %v1838_v60 = vadd.f32 %v1837_v19, %v1733_v15  ;;  %v1926_v3 = vadd.f32 %v1925_v29, %v1836_v55 }
 0x6be   :  { %v1928_v38 = vadd.f32 %v1927_v7, %v1838_v60 }
 0x6c2   :  { %v2133_v20 = vpop.f32.mrf.mxu1 }
 0x6c4   :  { %v2135_v56 = vpop.f32.mrf.mxu1 }
 0x6ca   :  { %v2045_v39 = vpop.f32.mrf.mxu0 }
 0x6cb   :  { %v2046_v59 = vadd.f32 %v2045_v39, %v1926_v3 }
 0x6cc   :  { %v2047_v63 = vpop.f32.mrf.mxu0 }
 0x6cd   :  { %v2134_v28 = vadd.f32 %v2133_v20, %v2046_v59  ;;  %v2048_v52 = vadd.f32 %v2047_v63, %v1928_v38 }
 0x6cf   :  { %v2142_v15 = vadd.f32 %v5872_v14, %v2134_v28  ;;  %v2136_v19 = vadd.f32 %v2135_v56, %v2048_v52 }
 0x6d1   :  { %5949 = vtanh.f32 %v2142_v15  ;;  %v2153_v55 = vadd.f32 %v2151_v48, %v2136_v19  ;;  %v5875_v39 = vmul.f32 -1.442695, %v2142_v15 }
 0x6d3   :  { %5951 = vtanh.f32 %v2153_v55  ;;  %v5876_v3 = vmul.f32 -1.442695, %v2153_v55 }
 0x6d4   :  { %5953 = vpow2.f32 %v5875_v39 }
 0x6d5   :  { %5955 = vpow2.f32 %v5876_v3 }
 0x6de   :  { %v5950_v29 = vpop.eup %5949 }
 0x6df   :  { %2170 = vrot.lane.b32.xlu0 %v5950_v29, %s6046_s16 }
 0x6e0   :  { %v5952_v53 = vpop.eup %5951 }
 0x6e1   :  { %2181 = vrot.lane.b32.xlu1 %v5952_v53, %s6046_s16  ;;  %v5954_v7 = vpop.eup %5953 }
 0x6e2   :  { %v5956_v20 = vpop.eup %5955  ;;  %v2157_v38 = vadd.f32 1.0, %v5954_v7 }
 0x6e3   :  { %v2163_v51 = vadd.f32 1.0, %v5956_v20 }
 0x6e4   :  { %5957 = vrcp.f32 %v2157_v38 }
 0x6e5   :  { %5959 = vrcp.f32 %v2163_v51 }
 0x6f1   :  { %v5958_v52 = vpop.eup %5957 }
 0x6f2   :  { %v5960_v59 = vpop.eup %5959  ;;  %v2168_v28 = vmul.f32 %v5958_v52, %v6604_v47 }
 0x6f3   :  { %v2179_v15 = vmul.f32 %v5960_v59, %v6608_v44 }
 0x751   :  { %v2171_v14 = vpop.permute.xlu0 %2170 }
 0x752   :  { %v2173_v60 = vmul.f32 %v5958_v52, %v2171_v14 }
 0x753   :  { %v2182_v9 = vpop.permute.xlu1 %2181 }
 0x754   :  { %2175 = vrot.lane.b32.xlu0 %v2173_v60, %s6046_s16  ;;  %v2184_v63 = vmul.f32 %v5960_v59, %v2182_v9 }
 0x756   :  { %2186 = vrot.lane.b32.xlu1 %v2184_v63, %s6046_s16  ;;  %v7589_v63 = vld [vmem:[#allocation10_spill] sm:$0xff] }
 0x7c6   :  { %v2176_v48 = vpop.permute.xlu0 %2175 }
 0x7c7   :  { %v6743_v56 = vadd.f32 %v2176_v48, %v2168_v28  ;;  %v7590_v28 = vld [vmem:[#allocation3_spill] sm:$0xff] }
 0x7c8   :  { %v2187_v19 = vpop.permute.xlu1 %2186  ;;  %v7591_v48 = vld [vmem:[#allocation11_spill] sm:$0xff] }
 0x7c9   :  { %5961 = vtanh.f32 %v6743_v56  ;;  %v6747_v55 = vadd.f32 %v2187_v19, %v2179_v15  ;;  %v7592_v15 = vld [vmem:[#allocation4_spill] sm:$0xff] }
 0x7ca   :  { %v7593_v19 = vld [vmem:[#allocation12_spill] sm:$0xff] }
 0x7cb   :  { %5963 = vtanh.f32 %v6747_v55 }
 0x7d6   :  { %v5962_v29 = vpop.eup %5961 }
 0x7d7   :  { %2192 = vrot.lane.b32.xlu0 %v5962_v29, %s6046_s16  ;;  %v7594_v29 = vld [vmem:[#allocation5_spill] sm:$0xff] }
 0x7d8   :  { %v5964_v53 = vpop.eup %5963 }
 0x7d9   :  { %2198 = vrot.lane.b32.xlu1 %v5964_v53, %s6046_s16  ;;  %v7595_v53 = vld [vmem:[#allocation15_spill] sm:$0xff] }
 0x849   :  { %v2193_v39 = vpop.permute.xlu0 %2192 }
 0x84a   :  { %v2195_v47 = vmul.f32 %v5958_v52, %v2193_v39  ;;  %v7596_v39 = vld [vmem:[#allocation6_spill] sm:$0xff] }
 0x84b   :  { %v2199_v3 = vpop.permute.xlu1 %2198 }
 0x84c   :  { %2203 = vrot.lane.b32.xlu0 %v2195_v47, %s6047_s17  ;;  %v6753_v7 = vmul.f32 %v5960_v59, %v2199_v3  ;;  %v7597_v47 = vld [vmem:[#allocation18_spill] sm:$0xff]  ;;  %v7598_v3 = vld [vmem:[#allocation7_spill] sm:$0xff] }
 0x84e   :  { %7588 = vst [vmem:[#allocation27_spill] sm:$0xff] %v6753_v7  ;;  %2214 = vrot.lane.b32.xlu1 %v6753_v7, %s6048_s18  ;;  %v7608_v7 = vld [vmem:[#allocation21_spill] sm:$0xff] }
 0x8be   :  { %v2204_v44 = vpop.permute.xlu0 %2203 }
 0x8bf   :  { %5877 = vst.msk [vmem:[%s7459_s2 + $0x4] sm:$0x3] %vm745_vm0, %v2204_v44 }
 0x8c0   :  { %v2215_v20 = vpop.permute.xlu1 %2214 }
 0x8c1   :  { %v2217_v38 = vsel %vm756_vm1, %v2204_v44, %v2215_v20  ;;  %v7599_v44 = vld [vmem:[#allocation22_spill] sm:$0xff]  ;;  %v7600_v20 = vld [vmem:[#allocation8_spill] sm:$0xff] }
 0x8c2   :  { %v2219_v51 = vsel %vm27_vm2, %v2217_v38, 0  ;;  %v7601_v38 = vld [vmem:[#allocation9_spill] sm:$0xff] }
 0x8c3   :  { %v6763_v52 = vand.u32 4294901760, %v2219_v51 }
 0x8c5   :  { %v2303_v14 = vsub.f32 %v2219_v51, %v6763_v52  ;;  %2459 = vmatmul.mubr.f32.vlgmr.msra.gmra.mxu1 %v6763_v52  ;;  %v7602_v51 = vld [vmem:[#allocation13_spill] sm:$0xff] }
 0x8c6   :  { %2589 = vmatpush1.msra.mxu1 %v6077_v5  ;;  %2650 = vmatprep.mubr.f32.mxu1 %v7532_v27 }
 0x8c7   :  { %v2304_v60 = vand.u32 4294901760, %v2303_v14  ;;  %2591 = vmatprep.subr.mxu1 %v6079_v6 }
 0x8c8   :  { %2593 = vmatpush1.msra.mxu1 %v6090_v10 }
 0x8c9   :  { %2595 = vmatprep.subr.mxu1 %v6092_v11  ;;  %v2305_v59 = vsub.f32 %v2303_v14, %v2304_v60 }
 0x8ca   :  { %2597 = vmatpush1.msra.mxu1 %v6094_v12 }
 0x8cb   :  { %2599 = vmatprep.subr.mxu1 %v6106_v16  ;;  %v2306_v9 = vand.u32 4294901760, %v2305_v59  ;;  %v7605_v59 = vld [vmem:[#allocation17_spill] sm:$0xff] }
 0x8cc   :  { %2601 = vmatpush1.msra.mxu1 %v6108_v17 }
 0x8cd   :  { %2603 = vmatprep.subr.mxu1 %v6110_v18  ;;  %2307 = vmatmul.mubr.f32.vlgmr.msra.gmra.mxu0 %v2306_v9  ;;  %v7606_v9 = vld [vmem:[#allocation19_spill] sm:$0xff] }
 0x8ce   :  { %2486 = vmatpush1.msra.mxu0 %v6128_v24  ;;  %2605 = vmatpush1.msra.mxu1 %v6125_v23 }
 0x8cf   :  { %2489 = vmatprep.subr.mxu0 %v6133_v26  ;;  %2607 = vmatprep.subr.mxu1 %v6130_v25 }
 0x8d0   :  { %2492 = vmatpush1.msra.mxu0 %v6153_v32  ;;  %2609 = vmatpush1.msra.mxu1 %v6150_v31 }
 0x8d1   :  { %2495 = vmatprep.subr.mxu0 %v6165_v36  ;;  %2611 = vmatprep.subr.mxu1 %v6155_v33 }
 0x8d2   :  { %2498 = vmatpush1.msra.mxu0 %v6181_v41  ;;  %2613 = vmatpush1.msra.mxu1 %v6167_v37 }
 0x8d3   :  { %2501 = vmatprep.subr.mxu0 %v6195_v46  ;;  %2615 = vmatprep.subr.mxu1 %v6184_v42 }
 0x8d4   :  { %2504 = vmatpush1.msra.mxu0 %v6225_v57  ;;  %2617 = vmatpush1.msra.mxu1 %v6206_v50 }
 0x8d5   :  { %2507 = vmatprep.subr.mxu0 %v6228_v58  ;;  %2654 = vmatmul.mubr.f32.vlgmr.msra.gmra.mxu1 %v2304_v60  ;;  %v7604_v60 = vld [vmem:[#allocation16_spill] sm:$0xff] }
 0x8d6   :  { %2797 = vmatprep.subr.mxu1 %v6075_v4  ;;  %2510 = vmatpush1.msra.mxu0 %v6237_v61 }
 0x8d7   :  { %2799 = vmatpush1.msra.mxu1 %v6077_v5  ;;  %2513 = vmatprep.subr.mxu0 %v6240_v62 }
 0x8d8   :  { %2801 = vmatprep.subr.mxu1 %v6079_v6  ;;  %2516 = vmatpush1.msra.mxu0 %v6253_v2 }
 0x8d9   :  { %2803 = vmatpush1.msra.mxu1 %v6090_v10  ;;  %2519 = vmatprep.subr.mxu0 %v6266_v13 }
 0x8da   :  { %2805 = vmatprep.subr.mxu1 %v6092_v11  ;;  %2522 = vmatpush1.msra.mxu0 %v6278_v21 }
 0x8db   :  { %2807 = vmatpush1.msra.mxu1 %v6094_v12  ;;  %2525 = vmatprep.subr.mxu0 %v6291_v43 }
 0x8dc   :  { %2809 = vmatprep.subr.mxu1 %v6106_v16  ;;  %2528 = vmatpush1.msra.mxu0 %v6322_v22 }
 0x8dd   :  { %2561 = vmatprep.mubr.f32.mxu0 %v7532_v27  ;;  %2811 = vmatpush1.msra.mxu1 %v6108_v17 }
 0x8de   :  { %2564 = vmatmul.mubr.f32.vlgmr.msra.gmra.mxu0 %v2303_v14  ;;  %2679 = vmatprep.subr.mxu0 %v6148_v30  ;;  %v7603_v14 = vld [vmem:[#allocation14_spill] sm:$0xff] }
 0x8df   :  { %2813 = vmatprep.subr.mxu1 %v6110_v18  ;;  %2683 = vmatpush1.msra.mxu0 %v6159_v34 }
 0x8e0   :  { %2815 = vmatpush1.msra.mxu1 %v6125_v23  ;;  %2687 = vmatprep.subr.mxu0 %v6162_v35 }
 0x8e1   :  { %2817 = vmatprep.subr.mxu1 %v6130_v25  ;;  %2691 = vmatpush1.msra.mxu0 %v6178_v40 }
 0x8e2   :  { %2819 = vmatpush1.msra.mxu1 %v6150_v31  ;;  %2695 = vmatprep.subr.mxu0 %v6192_v45 }
 0x8e3   :  { %2821 = vmatprep.subr.mxu1 %v6155_v33  ;;  %2699 = vmatpush1.msra.mxu0 %v6203_v49 }
 0x8e4   :  { %2823 = vmatpush1.msra.mxu1 %v6167_v37  ;;  %2703 = vmatprep.subr.mxu0 %v6216_v54 }
 0x8e5   :  { %2825 = vmatprep.subr.mxu1 %v6184_v42  ;;  %2707 = vmatpush1.msra.mxu0 %v6247_v0 }
 0x8e6   :  { %2827 = vmatpush1.msra.mxu1 %v6206_v50  ;;  %2860 = vmatprep.mubr.f32.mxu1 %v7532_v27 }
 0x8e7   :  { %2711 = vmatprep.subr.mxu0 %v6250_v1  ;;  %2862 = vmatmul.mubr.f32.vlgmr.msra.gmra.mxu1 %v6763_v52 }
 0x8e8   :  { %2715 = vmatpush1.msra.mxu0 %v6260_v8  ;;  %2772 = vmatprep.mubr.f32.mxu0 %v7532_v27 }
 0x8e9   :  { %2719 = vmatprep.subr.mxu0 %v7589_v63  ;;  %3064 = vmatprep.subr.mxu1 %v7590_v28  ;;  %v5879_v28 = vld [vmem:[%s7458_s0 + $0xc] sm:$0xf] }
 0x8ea   :  { %2723 = vmatpush1.msra.mxu0 %v7591_v48  ;;  %3070 = vmatpush1.msra.mxu1 %v7592_v15  ;;  %v5881_v15 = vld.sshfl [vmem:[%s7458_s0 + $0x10] sm:$0x33 pattern:$0x76325410] }
 0x8eb   :  { %2727 = vmatprep.subr.mxu0 %v7593_v19  ;;  %3076 = vmatprep.subr.mxu1 %v7594_v29 }
 0x8ec   :  { %2731 = vmatpush1.msra.mxu0 %v7595_v53  ;;  %3082 = vmatpush1.msra.mxu1 %v7596_v39 }
 0x8ed   :  { %2735 = vmatprep.subr.mxu0 %v7597_v47  ;;  %3088 = vmatprep.subr.mxu1 %v7598_v3 }
 0x8ee   :  { %2739 = vmatpush1.msra.mxu0 %v7599_v44  ;;  %3094 = vmatpush1.msra.mxu1 %v7600_v20 }
 0x8ef   :  { %2774 = vmatmul.mubr.f32.vlgmr.msra.gmra.mxu0 %v6763_v52  ;;  %3100 = vmatprep.subr.mxu1 %v7601_v38  ;;  %v7607_v52 = vld [vmem:[#allocation20_spill] sm:$0xff] }
 0x8f0   :  { %3106 = vmatpush1.msra.mxu1 %v7602_v51  ;;  %2968 = vmatprep.subr.mxu0 %v6075_v4 }
 0x8f1   :  { %3112 = vmatprep.subr.mxu1 %v7603_v14  ;;  %2970 = vmatpush1.msra.mxu0 %v6077_v5  ;;  %v7609_v14 = vld [vmem:[#allocation23_spill] sm:$0xff] }
 0x8f2   :  { %3118 = vmatpush1.msra.mxu1 %v7604_v60  ;;  %2972 = vmatprep.subr.mxu0 %v6079_v6  ;;  %v7610_v60 = vld [vmem:[#allocation24_spill] sm:$0xff] }
 0x8f3   :  { %3124 = vmatprep.subr.mxu1 %v7605_v59  ;;  %2974 = vmatpush1.msra.mxu0 %v6090_v10 }
 0x8f4   :  { %3130 = vmatpush1.msra.mxu1 %v7606_v9  ;;  %2976 = vmatprep.subr.mxu0 %v6092_v11 }
 0x8f5   :  { %3136 = vmatprep.subr.mxu1 %v7607_v52  ;;  %2978 = vmatpush1.msra.mxu0 %v6094_v12 }
 0x8f6   :  { %3142 = vmatpush1.msra.mxu1 %v7608_v7  ;;  %2980 = vmatprep.subr.mxu0 %v6106_v16 }
 0x8f7   :  { %3148 = vmatprep.subr.mxu1 %v7609_v14  ;;  %2982 = vmatpush1.msra.mxu0 %v6108_v17 }
 0x8f8   :  { %3154 = vmatpush1.msra.mxu1 %v7610_v60  ;;  %2984 = vmatprep.subr.mxu0 %v6110_v18  ;;  %v7611_v60 = vld [vmem:[#allocation2_spill] sm:$0xff] }
 0x8f9   :  { %3187 = vmatprep.mubr.f32.mxu1 %v7532_v27  ;;  %3317 = vmatprep.subr.mxu1 %v6075_v4 }
 0x8fa   :  { %2986 = vmatpush1.msra.mxu0 %v6125_v23  ;;  %3031 = vmatprep.mubr.f32.mxu0 %v7532_v27 }
 0x8fb   :  { %2988 = vmatprep.subr.mxu0 %v6130_v25 }
 0x8fc   :  { %2990 = vmatpush1.msra.mxu0 %v6150_v31 }
 0x8fd   :  { %2992 = vmatprep.subr.mxu0 %v6155_v33 }
 0x8fe   :  { %2994 = vmatpush1.msra.mxu0 %v6167_v37 }
 0x8ff   :  { %2996 = vmatprep.subr.mxu0 %v6184_v42 }
 0x900   :  { %2998 = vmatpush1.msra.mxu0 %v6206_v50 }
 0x901   :  { %3213 = vmatprep.subr.mxu0 %v7611_v60 }
 0x985   :  { %v2460_v7 = vpop.f32.mrf.mxu1 }
 0x987   :  { %v2462_v59 = vpop.f32.mrf.mxu1 }
 0x98d   :  { %v2308_v14 = vpop.f32.mrf.mxu0 }
 0x98e   :  { %v2461_v51 = vadd.f32 %v2460_v7, %v2308_v14 }
 0x98f   :  { %v2310_v52 = vpop.f32.mrf.mxu0 }
 0x990   :  { %v2463_v44 = vadd.f32 %v2462_v59, %v2310_v52  ;;  %v2881_v59 = vcombine.high %v5881_v15, %v5881_v15 }
 0x995   :  { %v2655_v38 = vpop.f32.mrf.mxu1 }
 0x997   :  { %v2657_v39 = vpop.f32.mrf.mxu1 }
 0x99e   :  { %v2565_v9 = vpop.f32.mrf.mxu0 }
 0x99f   :  { %v2566_v3 = vadd.f32 %v2565_v9, %v2461_v51 }
 0x9a0   :  { %v2567_v20 = vpop.f32.mrf.mxu0 }
 0x9a1   :  { %v2568_v47 = vadd.f32 %v2567_v20, %v2463_v44  ;;  %v2656_v53 = vadd.f32 %v2655_v38, %v2566_v3 }
 0x9a3   :  { %v2658_v48 = vadd.f32 %v2657_v39, %v2568_v47 }
 0x9a7   :  { %v2863_v29 = vpop.f32.mrf.mxu1 }
 0x9a9   :  { %v2865_v51 = vpop.f32.mrf.mxu1 }
 0x9af   :  { %v2775_v19 = vpop.f32.mrf.mxu0 }
 0x9b0   :  { %v2776_v60 = vadd.f32 %v2775_v19, %v2656_v53 }
 0x9b1   :  { %v2777_v7 = vpop.f32.mrf.mxu0 }
 0x9b2   :  { %v2864_v14 = vadd.f32 %v2863_v29, %v2776_v60  ;;  %v2778_v63 = vadd.f32 %v2777_v7, %v2658_v48 }
 0x9b4   :  { %v2872_v44 = vadd.f32 %v5879_v28, %v2864_v14  ;;  %v2866_v20 = vadd.f32 %v2865_v51, %v2778_v63 }
 0x9b6   :  { %5965 = vtanh.f32 %v2872_v44  ;;  %v2883_v3 = vadd.f32 %v2881_v59, %v2866_v20  ;;  %v5882_v19 = vmul.f32 -1.442695, %v2872_v44 }
 0x9b8   :  { %5967 = vtanh.f32 %v2883_v3  ;;  %v5883_v53 = vmul.f32 -1.442695, %v2883_v3 }
 0x9b9   :  { %5969 = vpow2.f32 %v5882_v19 }
 0x9ba   :  { %5971 = vpow2.f32 %v5883_v53 }
 0x9c3   :  { %v5966_v38 = vpop.eup %5965 }
 0x9c4   :  { %2900 = vrot.lane.b32.xlu0 %v5966_v38, %s6046_s16 }
 0x9c5   :  { %v5968_v9 = vpop.eup %5967 }
 0x9c6   :  { %2911 = vrot.lane.b32.xlu1 %v5968_v9, %s6046_s16  ;;  %v5970_v39 = vpop.eup %5969 }
 0x9c7   :  { %v5972_v29 = vpop.eup %5971  ;;  %v2887_v48 = vadd.f32 1.0, %v5970_v39 }
 0x9c8   :  { %v2893_v15 = vadd.f32 1.0, %v5972_v29 }
 0x9c9   :  { %5973 = vrcp.f32 %v2887_v48 }
 0x9ca   :  { %5975 = vrcp.f32 %v2893_v15 }
 0x9d6   :  { %v5974_v63 = vpop.eup %5973 }
 0x9d7   :  { %v5976_v60 = vpop.eup %5975  ;;  %v2898_v14 = vmul.f32 %v5974_v63, %v6743_v56 }
 0x9d8   :  { %v2909_v44 = vmul.f32 %v5976_v60, %v6747_v55 }
 0xa36   :  { %v2901_v28 = vpop.permute.xlu0 %2900 }
 0xa37   :  { %v2903_v47 = vmul.f32 %v5974_v63, %v2901_v28 }
 0xa38   :  { %v2912_v52 = vpop.permute.xlu1 %2911 }
 0xa39   :  { %2905 = vrot.lane.b32.xlu0 %v2903_v47, %s6046_s16  ;;  %v2914_v7 = vmul.f32 %v5976_v60, %v2912_v52 }
 0xa3b   :  { %2916 = vrot.lane.b32.xlu1 %v2914_v7, %s6046_s16  ;;  %v7613_v7 = vld [vmem:[#allocation10_spill] sm:$0xff] }
 0xaab   :  { %v2906_v59 = vpop.permute.xlu0 %2905 }
 0xaac   :  { %v6882_v51 = vadd.f32 %v2906_v59, %v2898_v14  ;;  %v7614_v14 = vld [vmem:[#allocation3_spill] sm:$0xff] }
 0xaad   :  { %v2917_v20 = vpop.permute.xlu1 %2916  ;;  %v7615_v59 = vld [vmem:[#allocation11_spill] sm:$0xff] }
 0xaae   :  { %5977 = vtanh.f32 %v6882_v51  ;;  %v6886_v3 = vadd.f32 %v2917_v20, %v2909_v44  ;;  %v7616_v44 = vld [vmem:[#allocation4_spill] sm:$0xff] }
 0xaaf   :  { %v7617_v20 = vld [vmem:[#allocation12_spill] sm:$0xff] }
 0xab0   :  { %5979 = vtanh.f32 %v6886_v3 }
 0xabb   :  { %v5978_v38 = vpop.eup %5977 }
 0xabc   :  { %2922 = vrot.lane.b32.xlu0 %v5978_v38, %s6046_s16  ;;  %v7618_v38 = vld [vmem:[#allocation5_spill] sm:$0xff] }
 0xabd   :  { %v5980_v9 = vpop.eup %5979 }
 0xabe   :  { %2928 = vrot.lane.b32.xlu1 %v5980_v9, %s6046_s16  ;;  %v7619_v9 = vld [vmem:[#allocation15_spill] sm:$0xff] }
 0xb2e   :  { %v2923_v19 = vpop.permute.xlu0 %2922 }
 0xb2f   :  { %v2925_v56 = vmul.f32 %v5974_v63, %v2923_v19  ;;  %v7620_v19 = vld [vmem:[#allocation6_spill] sm:$0xff] }
 0xb30   :  { %v2929_v53 = vpop.permute.xlu1 %2928 }
 0xb31   :  { %2933 = vrot.lane.b32.xlu0 %v2925_v56, %s6047_s17  ;;  %v6892_v39 = vmul.f32 %v5976_v60, %v2929_v53  ;;  %v7621_v56 = vld [vmem:[#allocation18_spill] sm:$0xff]  ;;  %v7622_v53 = vld [vmem:[#allocation7_spill] sm:$0xff] }
 0xb33   :  { %7612 = vst [vmem:[#allocation28_spill] sm:$0xff] %v6892_v39  ;;  %2944 = vrot.lane.b32.xlu1 %v6892_v39, %s6048_s18  ;;  %v7632_v39 = vld [vmem:[#allocation21_spill] sm:$0xff] }
 0xba3   :  { %v2934_v55 = vpop.permute.xlu0 %2933 }
 0xba4   :  { %5884 = vst.msk [vmem:[%s7459_s2 + $0x6] sm:$0x3] %vm745_vm0, %v2934_v55 }
 0xba5   :  { %v2945_v29 = vpop.permute.xlu1 %2944 }
 0xba6   :  { %v2947_v48 = vsel %vm756_vm1, %v2934_v55, %v2945_v29  ;;  %v7623_v55 = vld [vmem:[#allocation22_spill] sm:$0xff]  ;;  %v7624_v29 = vld [vmem:[#allocation8_spill] sm:$0xff] }
 0xba7   :  { %v2949_v15 = vsel %vm27_vm2, %v2947_v48, 0  ;;  %v7625_v48 = vld [vmem:[#allocation9_spill] sm:$0xff] }
 0xba8   :  { %v6902_v63 = vand.u32 4294901760, %v2949_v15 }
 0xbaa   :  { %v3033_v28 = vsub.f32 %v2949_v15, %v6902_v63  ;;  %3189 = vmatmul.mubr.f32.vlgmr.msra.gmra.mxu1 %v6902_v63  ;;  %v7626_v15 = vld [vmem:[#allocation13_spill] sm:$0xff] }
 0xbab   :  { %3319 = vmatpush1.msra.mxu1 %v6077_v5  ;;  %3380 = vmatprep.mubr.f32.mxu1 %v7532_v27 }
 0xbac   :  { %v3034_v47 = vand.u32 4294901760, %v3033_v28  ;;  %3321 = vmatprep.subr.mxu1 %v6079_v6 }
 0xbad   :  { %3323 = vmatpush1.msra.mxu1 %v6090_v10 }
 0xbae   :  { %3325 = vmatprep.subr.mxu1 %v6092_v11  ;;  %v3035_v60 = vsub.f32 %v3033_v28, %v3034_v47 }
 0xbaf   :  { %3327 = vmatpush1.msra.mxu1 %v6094_v12 }
 0xbb0   :  { %3329 = vmatprep.subr.mxu1 %v6106_v16  ;;  %v3036_v52 = vand.u32 4294901760, %v3035_v60  ;;  %v7629_v60 = vld [vmem:[#allocation17_spill] sm:$0xff] }
 0xbb1   :  { %3331 = vmatpush1.msra.mxu1 %v6108_v17 }
 0xbb2   :  { %3333 = vmatprep.subr.mxu1 %v6110_v18  ;;  %3037 = vmatmul.mubr.f32.vlgmr.msra.gmra.mxu0 %v3036_v52  ;;  %v7630_v52 = vld [vmem:[#allocation19_spill] sm:$0xff] }
 0xbb3   :  { %3216 = vmatpush1.msra.mxu0 %v6128_v24  ;;  %3335 = vmatpush1.msra.mxu1 %v6125_v23 }
 0xbb4   :  { %3219 = vmatprep.subr.mxu0 %v6133_v26  ;;  %3337 = vmatprep.subr.mxu1 %v6130_v25 }
 0xbb5   :  { %3222 = vmatpush1.msra.mxu0 %v6153_v32  ;;  %3339 = vmatpush1.msra.mxu1 %v6150_v31 }
 0xbb6   :  { %3225 = vmatprep.subr.mxu0 %v6165_v36  ;;  %3341 = vmatprep.subr.mxu1 %v6155_v33 }
 0xbb7   :  { %3228 = vmatpush1.msra.mxu0 %v6181_v41  ;;  %3343 = vmatpush1.msra.mxu1 %v6167_v37 }
 0xbb8   :  { %3231 = vmatprep.subr.mxu0 %v6195_v46  ;;  %3345 = vmatprep.subr.mxu1 %v6184_v42 }
 0xbb9   :  { %3234 = vmatpush1.msra.mxu0 %v6225_v57  ;;  %3347 = vmatpush1.msra.mxu1 %v6206_v50 }
 0xbba   :  { %3237 = vmatprep.subr.mxu0 %v6228_v58  ;;  %3384 = vmatmul.mubr.f32.vlgmr.msra.gmra.mxu1 %v3034_v47  ;;  %v7628_v47 = vld [vmem:[#allocation16_spill] sm:$0xff] }
 0xbbb   :  { %3527 = vmatprep.subr.mxu1 %v6075_v4  ;;  %3240 = vmatpush1.msra.mxu0 %v6237_v61 }
 0xbbc   :  { %3529 = vmatpush1.msra.mxu1 %v6077_v5  ;;  %3243 = vmatprep.subr.mxu0 %v6240_v62 }
 0xbbd   :  { %3531 = vmatprep.subr.mxu1 %v6079_v6  ;;  %3246 = vmatpush1.msra.mxu0 %v6253_v2 }
 0xbbe   :  { %3533 = vmatpush1.msra.mxu1 %v6090_v10  ;;  %3249 = vmatprep.subr.mxu0 %v6266_v13 }
 0xbbf   :  { %3535 = vmatprep.subr.mxu1 %v6092_v11  ;;  %3252 = vmatpush1.msra.mxu0 %v6278_v21 }
 0xbc0   :  { %3537 = vmatpush1.msra.mxu1 %v6094_v12  ;;  %3255 = vmatprep.subr.mxu0 %v6291_v43 }
 0xbc1   :  { %3539 = vmatprep.subr.mxu1 %v6106_v16  ;;  %3258 = vmatpush1.msra.mxu0 %v6322_v22 }
 0xbc2   :  { %3291 = vmatprep.mubr.f32.mxu0 %v7532_v27  ;;  %3541 = vmatpush1.msra.mxu1 %v6108_v17 }
 0xbc3   :  { %3294 = vmatmul.mubr.f32.vlgmr.msra.gmra.mxu0 %v3033_v28  ;;  %3409 = vmatprep.subr.mxu0 %v6148_v30  ;;  %v7627_v28 = vld [vmem:[#allocation14_spill] sm:$0xff] }
 0xbc4   :  { %3543 = vmatprep.subr.mxu1 %v6110_v18  ;;  %3413 = vmatpush1.msra.mxu0 %v6159_v34 }
 0xbc5   :  { %3545 = vmatpush1.msra.mxu1 %v6125_v23  ;;  %3417 = vmatprep.subr.mxu0 %v6162_v35 }
 0xbc6   :  { %3547 = vmatprep.subr.mxu1 %v6130_v25  ;;  %3421 = vmatpush1.msra.mxu0 %v6178_v40 }
 0xbc7   :  { %3549 = vmatpush1.msra.mxu1 %v6150_v31  ;;  %3425 = vmatprep.subr.mxu0 %v6192_v45 }
 0xbc8   :  { %3551 = vmatprep.subr.mxu1 %v6155_v33  ;;  %3429 = vmatpush1.msra.mxu0 %v6203_v49 }
 0xbc9   :  { %3553 = vmatpush1.msra.mxu1 %v6167_v37  ;;  %3433 = vmatprep.subr.mxu0 %v6216_v54 }
 0xbca   :  { %3555 = vmatprep.subr.mxu1 %v6184_v42  ;;  %3437 = vmatpush1.msra.mxu0 %v6247_v0 }
 0xbcb   :  { %3557 = vmatpush1.msra.mxu1 %v6206_v50  ;;  %3590 = vmatprep.mubr.f32.mxu1 %v7532_v27 }
 0xbcc   :  { %3441 = vmatprep.subr.mxu0 %v6250_v1  ;;  %3592 = vmatmul.mubr.f32.vlgmr.msra.gmra.mxu1 %v6902_v63 }
 0xbcd   :  { %3445 = vmatpush1.msra.mxu0 %v6260_v8  ;;  %3502 = vmatprep.mubr.f32.mxu0 %v7532_v27 }
 0xbce   :  { %3449 = vmatprep.subr.mxu0 %v7613_v7  ;;  %3792 = vmatprep.subr.mxu1 %v7614_v14  ;;  %v5886_v14 = vld [vmem:[%s7458_s0 + $0x10] sm:$0xf] }
 0xbcf   :  { %3453 = vmatpush1.msra.mxu0 %v7615_v59  ;;  %3798 = vmatpush1.msra.mxu1 %v7616_v44  ;;  %v5888_v44 = vld.sshfl [vmem:[%s7458_s0 + $0xc] sm:$0x33 pattern:$0x76325410] }
 0xbd0   :  { %3457 = vmatprep.subr.mxu0 %v7617_v20  ;;  %3804 = vmatprep.subr.mxu1 %v7618_v38 }
 0xbd1   :  { %3461 = vmatpush1.msra.mxu0 %v7619_v9  ;;  %3810 = vmatpush1.msra.mxu1 %v7620_v19 }
 0xbd2   :  { %3465 = vmatprep.subr.mxu0 %v7621_v56  ;;  %3816 = vmatprep.subr.mxu1 %v7622_v53 }
 0xbd3   :  { %3469 = vmatpush1.msra.mxu0 %v7623_v55  ;;  %3822 = vmatpush1.msra.mxu1 %v7624_v29 }
 0xbd4   :  { %3504 = vmatmul.mubr.f32.vlgmr.msra.gmra.mxu0 %v6902_v63  ;;  %3828 = vmatprep.subr.mxu1 %v7625_v48  ;;  %v7631_v63 = vld [vmem:[#allocation20_spill] sm:$0xff] }
 0xbd5   :  { %3834 = vmatpush1.msra.mxu1 %v7626_v15  ;;  %3696 = vmatprep.subr.mxu0 %v6075_v4 }
 0xbd6   :  { %3840 = vmatprep.subr.mxu1 %v7627_v28  ;;  %3698 = vmatpush1.msra.mxu0 %v6077_v5  ;;  %v7633_v28 = vld [vmem:[#allocation23_spill] sm:$0xff] }
 0xbd7   :  { %3846 = vmatpush1.msra.mxu1 %v7628_v47  ;;  %3700 = vmatprep.subr.mxu0 %v6079_v6  ;;  %v7634_v47 = vld [vmem:[#allocation24_spill] sm:$0xff] }
 0xbd8   :  { %3852 = vmatprep.subr.mxu1 %v7629_v60  ;;  %3702 = vmatpush1.msra.mxu0 %v6090_v10 }
 0xbd9   :  { %3858 = vmatpush1.msra.mxu1 %v7630_v52  ;;  %3704 = vmatprep.subr.mxu0 %v6092_v11 }
 0xbda   :  { %3864 = vmatprep.subr.mxu1 %v7631_v63  ;;  %3706 = vmatpush1.msra.mxu0 %v6094_v12 }
 0xbdb   :  { %3870 = vmatpush1.msra.mxu1 %v7632_v39  ;;  %3708 = vmatprep.subr.mxu0 %v6106_v16 }
 0xbdc   :  { %3876 = vmatprep.subr.mxu1 %v7633_v28  ;;  %3710 = vmatpush1.msra.mxu0 %v6108_v17 }
 0xbdd   :  { %3882 = vmatpush1.msra.mxu1 %v7634_v47  ;;  %3712 = vmatprep.subr.mxu0 %v6110_v18  ;;  %v7635_v47 = vld [vmem:[#allocation2_spill] sm:$0xff] }
 0xbde   :  { %3915 = vmatprep.mubr.f32.mxu1 %v7532_v27  ;;  %4045 = vmatprep.subr.mxu1 %v6075_v4 }
 0xbdf   :  { %3714 = vmatpush1.msra.mxu0 %v6125_v23  ;;  %3759 = vmatprep.mubr.f32.mxu0 %v7532_v27 }
 0xbe0   :  { %3716 = vmatprep.subr.mxu0 %v6130_v25 }
 0xbe1   :  { %3718 = vmatpush1.msra.mxu0 %v6150_v31 }
 0xbe2   :  { %3720 = vmatprep.subr.mxu0 %v6155_v33 }
 0xbe3   :  { %3722 = vmatpush1.msra.mxu0 %v6167_v37 }
 0xbe4   :  { %3724 = vmatprep.subr.mxu0 %v6184_v42 }
 0xbe5   :  { %3726 = vmatpush1.msra.mxu0 %v6206_v50 }
 0xbe6   :  { %3941 = vmatprep.subr.mxu0 %v7635_v47 }
 0xc6a   :  { %v3190_v39 = vpop.f32.mrf.mxu1 }
 0xc6c   :  { %v3192_v60 = vpop.f32.mrf.mxu1 }
 0xc72   :  { %v3038_v28 = vpop.f32.mrf.mxu0 }
 0xc73   :  { %v3191_v15 = vadd.f32 %v3190_v39, %v3038_v28 }
 0xc74   :  { %v3040_v63 = vpop.f32.mrf.mxu0 }
 0xc75   :  { %v3193_v55 = vadd.f32 %v3192_v60, %v3040_v63  ;;  %v3609_v60 = vcombine.high %v5888_v44, %v5888_v44 }
 0xc7a   :  { %v3385_v48 = vpop.f32.mrf.mxu1 }
 0xc7c   :  { %v3387_v19 = vpop.f32.mrf.mxu1 }
 0xc83   :  { %v3295_v52 = vpop.f32.mrf.mxu0 }
 0xc84   :  { %v3296_v53 = vadd.f32 %v3295_v52, %v3191_v15 }
 0xc85   :  { %v3297_v29 = vpop.f32.mrf.mxu0 }
 0xc86   :  { %v3298_v56 = vadd.f32 %v3297_v29, %v3193_v55  ;;  %v3386_v9 = vadd.f32 %v3385_v48, %v3296_v53 }
 0xc88   :  { %v3388_v59 = vadd.f32 %v3387_v19, %v3298_v56 }
 0xc8c   :  { %v3593_v38 = vpop.f32.mrf.mxu1 }
 0xc8e   :  { %v3595_v15 = vpop.f32.mrf.mxu1 }
 0xc94   :  { %v3505_v20 = vpop.f32.mrf.mxu0 }
 0xc95   :  { %v3506_v47 = vadd.f32 %v3505_v20, %v3386_v9 }
 0xc96   :  { %v3507_v39 = vpop.f32.mrf.mxu0 }
 0xc97   :  { %v3594_v28 = vadd.f32 %v3593_v38, %v3506_v47  ;;  %v3508_v7 = vadd.f32 %v3507_v39, %v3388_v59 }
 0xc99   :  { %v3600_v55 = vadd.f32 %v5886_v14, %v3594_v28  ;;  %v3596_v29 = vadd.f32 %v3595_v15, %v3508_v7 }
 0xc9b   :  { %5981 = vtanh.f32 %v3600_v55  ;;  %v3611_v53 = vadd.f32 %v3609_v60, %v3596_v29  ;;  %v5889_v20 = vmul.f32 -1.442695, %v3600_v55 }
 0xc9d   :  { %5983 = vtanh.f32 %v3611_v53  ;;  %v5890_v9 = vmul.f32 -1.442695, %v3611_v53 }
 0xc9e   :  { %5985 = vpow2.f32 %v5889_v20 }
 0xc9f   :  { %5987 = vpow2.f32 %v5890_v9 }
 0xca8   :  { %v5982_v48 = vpop.eup %5981 }
 0xca9   :  { %3628 = vrot.lane.b32.xlu0 %v5982_v48, %s6046_s16 }
 0xcaa   :  { %v5984_v52 = vpop.eup %5983 }
 0xcab   :  { %3639 = vrot.lane.b32.xlu1 %v5984_v52, %s6046_s16  ;;  %v5986_v19 = vpop.eup %5985 }
 0xcac   :  { %v5988_v38 = vpop.eup %5987  ;;  %v3615_v59 = vadd.f32 1.0, %v5986_v19 }
 0xcad   :  { %v3621_v44 = vadd.f32 1.0, %v5988_v38 }
 0xcae   :  { %5989 = vrcp.f32 %v3615_v59 }
 0xcaf   :  { %5991 = vrcp.f32 %v3621_v44 }
 0xcbb   :  { %v5990_v7 = vpop.eup %5989 }
 0xcbc   :  { %v5992_v47 = vpop.eup %5991  ;;  %v3626_v28 = vmul.f32 %v5990_v7, %v6882_v51 }
 0xcbd   :  { %v3637_v55 = vmul.f32 %v5992_v47, %v6886_v3 }
 0xd1b   :  { %v3629_v14 = vpop.permute.xlu0 %3628 }
 0xd1c   :  { %v3631_v56 = vmul.f32 %v5990_v7, %v3629_v14 }
 0xd1d   :  { %v3640_v63 = vpop.permute.xlu1 %3639 }
 0xd1e   :  { %3633 = vrot.lane.b32.xlu0 %v3631_v56, %s6046_s16  ;;  %v3642_v39 = vmul.f32 %v5992_v47, %v3640_v63 }
 0xd20   :  { %3644 = vrot.lane.b32.xlu1 %v3642_v39, %s6046_s16  ;;  %v7637_v39 = vld [vmem:[#allocation10_spill] sm:$0xff] }
 0xd90   :  { %v3634_v60 = vpop.permute.xlu0 %3633 }
 0xd91   :  { %v7021_v15 = vadd.f32 %v3634_v60, %v3626_v28  ;;  %v7638_v28 = vld [vmem:[#allocation3_spill] sm:$0xff] }
 0xd92   :  { %v3645_v29 = vpop.permute.xlu1 %3644  ;;  %v7639_v60 = vld [vmem:[#allocation11_spill] sm:$0xff] }
 0xd93   :  { %5993 = vtanh.f32 %v7021_v15  ;;  %v7025_v53 = vadd.f32 %v3645_v29, %v3637_v55  ;;  %v7640_v55 = vld [vmem:[#allocation4_spill] sm:$0xff] }
 0xd94   :  { %v7641_v29 = vld [vmem:[#allocation12_spill] sm:$0xff] }
 0xd95   :  { %5995 = vtanh.f32 %v7025_v53 }
 0xda0   :  { %v5994_v48 = vpop.eup %5993 }
 0xda1   :  { %3650 = vrot.lane.b32.xlu0 %v5994_v48, %s6046_s16  ;;  %v7642_v48 = vld [vmem:[#allocation5_spill] sm:$0xff] }
 0xda2   :  { %v5996_v52 = vpop.eup %5995 }
 0xda3   :  { %3656 = vrot.lane.b32.xlu1 %v5996_v52, %s6046_s16  ;;  %v7643_v52 = vld [vmem:[#allocation15_spill] sm:$0xff] }
 0xe13   :  { %v3651_v20 = vpop.permute.xlu0 %3650 }
 0xe14   :  { %v3653_v51 = vmul.f32 %v5990_v7, %v3651_v20  ;;  %v7644_v20 = vld [vmem:[#allocation6_spill] sm:$0xff] }
 0xe15   :  { %v3657_v9 = vpop.permute.xlu1 %3656 }
 0xe16   :  { %3661 = vrot.lane.b32.xlu0 %v3653_v51, %s6047_s17  ;;  %v7031_v19 = vmul.f32 %v5992_v47, %v3657_v9  ;;  %v7645_v51 = vld [vmem:[#allocation18_spill] sm:$0xff]  ;;  %v7646_v9 = vld [vmem:[#allocation7_spill] sm:$0xff] }
 0xe18   :  { %7636 = vst [vmem:[#allocation29_spill] sm:$0xff] %v7031_v19  ;;  %3672 = vrot.lane.b32.xlu1 %v7031_v19, %s6048_s18  ;;  %v7656_v19 = vld [vmem:[#allocation21_spill] sm:$0xff] }
 0xe88   :  { %v3662_v3 = vpop.permute.xlu0 %3661 }
 0xe89   :  { %5891 = vst.msk [vmem:[%s7459_s2 + $0x8] sm:$0x3] %vm745_vm0, %v3662_v3 }
 0xe8a   :  { %v3673_v38 = vpop.permute.xlu1 %3672 }
 0xe8b   :  { %v3675_v59 = vsel %vm756_vm1, %v3662_v3, %v3673_v38  ;;  %v7647_v3 = vld [vmem:[#allocation22_spill] sm:$0xff]  ;;  %v7648_v38 = vld [vmem:[#allocation8_spill] sm:$0xff] }
 0xe8c   :  { %v3677_v44 = vsel %vm27_vm2, %v3675_v59, 0  ;;  %v7649_v59 = vld [vmem:[#allocation9_spill] sm:$0xff] }
 0xe8d   :  { %v7041_v7 = vand.u32 4294901760, %v3677_v44 }
 0xe8f   :  { %v3761_v14 = vsub.f32 %v3677_v44, %v7041_v7  ;;  %3917 = vmatmul.mubr.f32.vlgmr.msra.gmra.mxu1 %v7041_v7  ;;  %v7650_v44 = vld [vmem:[#allocation13_spill] sm:$0xff] }
 0xe90   :  { %4047 = vmatpush1.msra.mxu1 %v6077_v5  ;;  %4108 = vmatprep.mubr.f32.mxu1 %v7532_v27 }
 0xe91   :  { %v3762_v56 = vand.u32 4294901760, %v3761_v14  ;;  %4049 = vmatprep.subr.mxu1 %v6079_v6 }
 0xe92   :  { %4051 = vmatpush1.msra.mxu1 %v6090_v10 }
 0xe93   :  { %4053 = vmatprep.subr.mxu1 %v6092_v11  ;;  %v3763_v47 = vsub.f32 %v3761_v14, %v3762_v56 }
 0xe94   :  { %4055 = vmatpush1.msra.mxu1 %v6094_v12 }
 0xe95   :  { %4057 = vmatprep.subr.mxu1 %v6106_v16  ;;  %v3764_v63 = vand.u32 4294901760, %v3763_v47  ;;  %v7653_v47 = vld [vmem:[#allocation17_spill] sm:$0xff] }
 0xe96   :  { %4059 = vmatpush1.msra.mxu1 %v6108_v17 }
 0xe97   :  { %4061 = vmatprep.subr.mxu1 %v6110_v18  ;;  %3765 = vmatmul.mubr.f32.vlgmr.msra.gmra.mxu0 %v3764_v63  ;;  %v7654_v63 = vld [vmem:[#allocation19_spill] sm:$0xff] }
 0xe98   :  { %3944 = vmatpush1.msra.mxu0 %v6128_v24  ;;  %4063 = vmatpush1.msra.mxu1 %v6125_v23 }
 0xe99   :  { %3947 = vmatprep.subr.mxu0 %v6133_v26  ;;  %4065 = vmatprep.subr.mxu1 %v6130_v25 }
 0xe9a   :  { %3950 = vmatpush1.msra.mxu0 %v6153_v32  ;;  %4067 = vmatpush1.msra.mxu1 %v6150_v31 }
 0xe9b   :  { %3953 = vmatprep.subr.mxu0 %v6165_v36  ;;  %4069 = vmatprep.subr.mxu1 %v6155_v33 }
 0xe9c   :  { %3956 = vmatpush1.msra.mxu0 %v6181_v41  ;;  %4071 = vmatpush1.msra.mxu1 %v6167_v37 }
 0xe9d   :  { %3959 = vmatprep.subr.mxu0 %v6195_v46  ;;  %4073 = vmatprep.subr.mxu1 %v6184_v42 }
 0xe9e   :  { %3962 = vmatpush1.msra.mxu0 %v6225_v57  ;;  %4075 = vmatpush1.msra.mxu1 %v6206_v50 }
 0xe9f   :  { %3965 = vmatprep.subr.mxu0 %v6228_v58  ;;  %4112 = vmatmul.mubr.f32.vlgmr.msra.gmra.mxu1 %v3762_v56  ;;  %v7652_v56 = vld [vmem:[#allocation16_spill] sm:$0xff] }
 0xea0   :  { %4255 = vmatprep.subr.mxu1 %v6075_v4  ;;  %3968 = vmatpush1.msra.mxu0 %v6237_v61 }
 0xea1   :  { %4257 = vmatpush1.msra.mxu1 %v6077_v5  ;;  %3971 = vmatprep.subr.mxu0 %v6240_v62 }
 0xea2   :  { %4259 = vmatprep.subr.mxu1 %v6079_v6  ;;  %3974 = vmatpush1.msra.mxu0 %v6253_v2 }
 0xea3   :  { %4261 = vmatpush1.msra.mxu1 %v6090_v10  ;;  %3977 = vmatprep.subr.mxu0 %v6266_v13 }
 0xea4   :  { %4263 = vmatprep.subr.mxu1 %v6092_v11  ;;  %3980 = vmatpush1.msra.mxu0 %v6278_v21 }
 0xea5   :  { %4265 = vmatpush1.msra.mxu1 %v6094_v12  ;;  %3983 = vmatprep.subr.mxu0 %v6291_v43 }
 0xea6   :  { %4267 = vmatprep.subr.mxu1 %v6106_v16  ;;  %3986 = vmatpush1.msra.mxu0 %v6322_v22 }
 0xea7   :  { %4019 = vmatprep.mubr.f32.mxu0 %v7532_v27  ;;  %4269 = vmatpush1.msra.mxu1 %v6108_v17 }
 0xea8   :  { %4022 = vmatmul.mubr.f32.vlgmr.msra.gmra.mxu0 %v3761_v14  ;;  %4137 = vmatprep.subr.mxu0 %v6148_v30  ;;  %v7651_v14 = vld [vmem:[#allocation14_spill] sm:$0xff] }
 0xea9   :  { %4271 = vmatprep.subr.mxu1 %v6110_v18  ;;  %4141 = vmatpush1.msra.mxu0 %v6159_v34 }
 0xeaa   :  { %4273 = vmatpush1.msra.mxu1 %v6125_v23  ;;  %4145 = vmatprep.subr.mxu0 %v6162_v35 }
 0xeab   :  { %4275 = vmatprep.subr.mxu1 %v6130_v25  ;;  %4149 = vmatpush1.msra.mxu0 %v6178_v40 }
 0xeac   :  { %4277 = vmatpush1.msra.mxu1 %v6150_v31  ;;  %4153 = vmatprep.subr.mxu0 %v6192_v45 }
 0xead   :  { %4279 = vmatprep.subr.mxu1 %v6155_v33  ;;  %4157 = vmatpush1.msra.mxu0 %v6203_v49 }
 0xeae   :  { %4281 = vmatpush1.msra.mxu1 %v6167_v37  ;;  %4161 = vmatprep.subr.mxu0 %v6216_v54 }
 0xeaf   :  { %4283 = vmatprep.subr.mxu1 %v6184_v42  ;;  %4165 = vmatpush1.msra.mxu0 %v6247_v0 }
 0xeb0   :  { %4285 = vmatpush1.msra.mxu1 %v6206_v50  ;;  %4318 = vmatprep.mubr.f32.mxu1 %v7532_v27 }
 0xeb1   :  { %4169 = vmatprep.subr.mxu0 %v6250_v1  ;;  %4320 = vmatmul.mubr.f32.vlgmr.msra.gmra.mxu1 %v7041_v7 }
 0xeb2   :  { %4173 = vmatpush1.msra.mxu0 %v6260_v8  ;;  %4230 = vmatprep.mubr.f32.mxu0 %v7532_v27 }
 0xeb3   :  { %4177 = vmatprep.subr.mxu0 %v7637_v39  ;;  %4520 = vmatprep.subr.mxu1 %v7638_v28  ;;  %v5893_v28 = vld [vmem:[%s7458_s0 + $0x14] sm:$0xf] }
 0xeb4   :  { %4181 = vmatpush1.msra.mxu0 %v7639_v60  ;;  %4526 = vmatpush1.msra.mxu1 %v7640_v55  ;;  %v5895_v55 = vld.sshfl [vmem:[%s7458_s0 + $0x8] sm:$0x33 pattern:$0x76325410] }
 0xeb5   :  { %4185 = vmatprep.subr.mxu0 %v7641_v29  ;;  %4532 = vmatprep.subr.mxu1 %v7642_v48 }
 0xeb6   :  { %4189 = vmatpush1.msra.mxu0 %v7643_v52  ;;  %4538 = vmatpush1.msra.mxu1 %v7644_v20 }
 0xeb7   :  { %4193 = vmatprep.subr.mxu0 %v7645_v51  ;;  %4544 = vmatprep.subr.mxu1 %v7646_v9 }
 0xeb8   :  { %4197 = vmatpush1.msra.mxu0 %v7647_v3  ;;  %4550 = vmatpush1.msra.mxu1 %v7648_v38 }
 0xeb9   :  { %4232 = vmatmul.mubr.f32.vlgmr.msra.gmra.mxu0 %v7041_v7  ;;  %4556 = vmatprep.subr.mxu1 %v7649_v59  ;;  %v7655_v7 = vld [vmem:[#allocation20_spill] sm:$0xff] }
 0xeba   :  { %4562 = vmatpush1.msra.mxu1 %v7650_v44  ;;  %4424 = vmatprep.subr.mxu0 %v6075_v4 }
 0xebb   :  { %4568 = vmatprep.subr.mxu1 %v7651_v14  ;;  %4426 = vmatpush1.msra.mxu0 %v6077_v5  ;;  %v7657_v14 = vld [vmem:[#allocation23_spill] sm:$0xff] }
 0xebc   :  { %4574 = vmatpush1.msra.mxu1 %v7652_v56  ;;  %4428 = vmatprep.subr.mxu0 %v6079_v6  ;;  %v7658_v56 = vld [vmem:[#allocation24_spill] sm:$0xff] }
 0xebd   :  { %4580 = vmatprep.subr.mxu1 %v7653_v47  ;;  %4430 = vmatpush1.msra.mxu0 %v6090_v10 }
 0xebe   :  { %4586 = vmatpush1.msra.mxu1 %v7654_v63  ;;  %4432 = vmatprep.subr.mxu0 %v6092_v11 }
 0xebf   :  { %4592 = vmatprep.subr.mxu1 %v7655_v7  ;;  %4434 = vmatpush1.msra.mxu0 %v6094_v12 }
 0xec0   :  { %4598 = vmatpush1.msra.mxu1 %v7656_v19  ;;  %4436 = vmatprep.subr.mxu0 %v6106_v16 }
 0xec1   :  { %4604 = vmatprep.subr.mxu1 %v7657_v14  ;;  %4438 = vmatpush1.msra.mxu0 %v6108_v17 }
 0xec2   :  { %4610 = vmatpush1.msra.mxu1 %v7658_v56  ;;  %4440 = vmatprep.subr.mxu0 %v6110_v18  ;;  %v7659_v56 = vld [vmem:[#allocation2_spill] sm:$0xff] }
 0xec3   :  { %4643 = vmatprep.mubr.f32.mxu1 %v7532_v27  ;;  %4773 = vmatprep.subr.mxu1 %v6075_v4 }
 0xec4   :  { %4442 = vmatpush1.msra.mxu0 %v6125_v23  ;;  %4487 = vmatprep.mubr.f32.mxu0 %v7532_v27 }
 0xec5   :  { %4444 = vmatprep.subr.mxu0 %v6130_v25 }
 0xec6   :  { %4446 = vmatpush1.msra.mxu0 %v6150_v31 }
 0xec7   :  { %4448 = vmatprep.subr.mxu0 %v6155_v33 }
 0xec8   :  { %4450 = vmatpush1.msra.mxu0 %v6167_v37 }
 0xec9   :  { %4452 = vmatprep.subr.mxu0 %v6184_v42 }
 0xeca   :  { %4454 = vmatpush1.msra.mxu0 %v6206_v50 }
 0xecb   :  { %4669 = vmatprep.subr.mxu0 %v7659_v56 }
 0xf4f   :  { %v3918_v19 = vpop.f32.mrf.mxu1 }
 0xf51   :  { %v3920_v47 = vpop.f32.mrf.mxu1 }
 0xf57   :  { %v3766_v14 = vpop.f32.mrf.mxu0 }
 0xf58   :  { %v3919_v44 = vadd.f32 %v3918_v19, %v3766_v14 }
 0xf59   :  { %v3768_v7 = vpop.f32.mrf.mxu0 }
 0xf5a   :  { %v3921_v3 = vadd.f32 %v3920_v47, %v3768_v7  ;;  %v4337_v47 = vcombine.high %v5895_v55, %v5895_v55 }
 0xf5f   :  { %v4113_v59 = vpop.f32.mrf.mxu1 }
 0xf61   :  { %v4115_v20 = vpop.f32.mrf.mxu1 }
 0xf68   :  { %v4023_v63 = vpop.f32.mrf.mxu0 }
 0xf69   :  { %v4024_v9 = vadd.f32 %v4023_v63, %v3919_v44 }
 0xf6a   :  { %v4025_v38 = vpop.f32.mrf.mxu0 }
 0xf6b   :  { %v4026_v51 = vadd.f32 %v4025_v38, %v3921_v3  ;;  %v4114_v52 = vadd.f32 %v4113_v59, %v4024_v9 }
 0xf6d   :  { %v4116_v60 = vadd.f32 %v4115_v20, %v4026_v51 }
 0xf71   :  { %v4321_v48 = vpop.f32.mrf.mxu1 }
 0xf73   :  { %v4323_v44 = vpop.f32.mrf.mxu1 }
 0xf79   :  { %v4233_v29 = vpop.f32.mrf.mxu0 }
 0xf7a   :  { %v4234_v56 = vadd.f32 %v4233_v29, %v4114_v52 }
 0xf7b   :  { %v4235_v19 = vpop.f32.mrf.mxu0 }
 0xf7c   :  { %v4322_v14 = vadd.f32 %v4321_v48, %v4234_v56  ;;  %v4236_v39 = vadd.f32 %v4235_v19, %v4116_v60 }
 0xf7e   :  { %v4328_v3 = vadd.f32 %v5893_v28, %v4322_v14  ;;  %v4324_v38 = vadd.f32 %v4323_v44, %v4236_v39 }
 0xf80   :  { %5997 = vtanh.f32 %v4328_v3  ;;  %v4339_v9 = vadd.f32 %v4337_v47, %v4324_v38  ;;  %v5896_v29 = vmul.f32 -1.442695, %v4328_v3 }
 0xf82   :  { %5999 = vtanh.f32 %v4339_v9  ;;  %v5897_v52 = vmul.f32 -1.442695, %v4339_v9 }
 0xf83   :  { %6001 = vpow2.f32 %v5896_v29 }
 0xf84   :  { %6003 = vpow2.f32 %v5897_v52 }
 0xf8d   :  { %v5998_v59 = vpop.eup %5997 }
 0xf8e   :  { %4356 = vrot.lane.b32.xlu0 %v5998_v59, %s6046_s16 }
 0xf8f   :  { %v6000_v63 = vpop.eup %5999 }
 0xf90   :  { %4367 = vrot.lane.b32.xlu1 %v6000_v63, %s6046_s16  ;;  %v6002_v20 = vpop.eup %6001 }
 0xf91   :  { %v6004_v48 = vpop.eup %6003  ;;  %v4343_v60 = vadd.f32 1.0, %v6002_v20 }
 0xf92   :  { %v4349_v55 = vadd.f32 1.0, %v6004_v48 }
 0xf93   :  { %6005 = vrcp.f32 %v4343_v60 }
 0xf94   :  { %6007 = vrcp.f32 %v4349_v55 }
 0xfa0   :  { %v6006_v39 = vpop.eup %6005 }
 0xfa1   :  { %v6008_v56 = vpop.eup %6007  ;;  %v4354_v14 = vmul.f32 %v6006_v39, %v7021_v15 }
 0xfa2   :  { %v4365_v3 = vmul.f32 %v6008_v56, %v7025_v53 }
0x1000   :  { %v4357_v28 = vpop.permute.xlu0 %4356 }
0x1001   :  { %v4359_v51 = vmul.f32 %v6006_v39, %v4357_v28 }
0x1002   :  { %v4368_v7 = vpop.permute.xlu1 %4367 }
0x1003   :  { %4361 = vrot.lane.b32.xlu0 %v4359_v51, %s6046_s16  ;;  %v4370_v19 = vmul.f32 %v6008_v56, %v4368_v7 }
0x1005   :  { %4372 = vrot.lane.b32.xlu1 %v4370_v19, %s6046_s16  ;;  %v7661_v19 = vld [vmem:[#allocation10_spill] sm:$0xff] }
0x1075   :  { %v4362_v47 = vpop.permute.xlu0 %4361 }
0x1076   :  { %v7160_v44 = vadd.f32 %v4362_v47, %v4354_v14  ;;  %v7662_v14 = vld [vmem:[#allocation3_spill] sm:$0xff] }
0x1077   :  { %v4373_v38 = vpop.permute.xlu1 %4372  ;;  %v7663_v47 = vld [vmem:[#allocation11_spill] sm:$0xff] }
0x1078   :  { %6009 = vtanh.f32 %v7160_v44  ;;  %v7164_v9 = vadd.f32 %v4373_v38, %v4365_v3  ;;  %v7664_v3 = vld [vmem:[#allocation4_spill] sm:$0xff] }
0x1079   :  { %v7665_v38 = vld [vmem:[#allocation12_spill] sm:$0xff] }
0x107a   :  { %6011 = vtanh.f32 %v7164_v9 }
0x1085   :  { %v6010_v59 = vpop.eup %6009 }
0x1086   :  { %4378 = vrot.lane.b32.xlu0 %v6010_v59, %s6046_s16  ;;  %v7666_v59 = vld [vmem:[#allocation5_spill] sm:$0xff] }
0x1087   :  { %v6012_v63 = vpop.eup %6011 }
0x1088   :  { %4384 = vrot.lane.b32.xlu1 %v6012_v63, %s6046_s16  ;;  %v7667_v63 = vld [vmem:[#allocation15_spill] sm:$0xff] }
0x10f8   :  { %v4379_v29 = vpop.permute.xlu0 %4378 }
0x10f9   :  { %v4381_v15 = vmul.f32 %v6006_v39, %v4379_v29  ;;  %v7668_v29 = vld [vmem:[#allocation6_spill] sm:$0xff] }
0x10fa   :  { %v4385_v52 = vpop.permute.xlu1 %4384 }
0x10fb   :  { %4389 = vrot.lane.b32.xlu0 %v4381_v15, %s6047_s17  ;;  %v7170_v20 = vmul.f32 %v6008_v56, %v4385_v52  ;;  %v7669_v15 = vld [vmem:[#allocation18_spill] sm:$0xff]  ;;  %v7670_v52 = vld [vmem:[#allocation7_spill] sm:$0xff] }
0x10fd   :  { %7660 = vst [vmem:[#allocation30_spill] sm:$0xff] %v7170_v20  ;;  %4400 = vrot.lane.b32.xlu1 %v7170_v20, %s6048_s18 }
0x116d   :  { %v4390_v53 = vpop.permute.xlu0 %4389 }
0x116e   :  { %5898 = vst.msk [vmem:[%s7459_s2 + $0xa] sm:$0x3] %vm745_vm0, %v4390_v53 }
0x116f   :  { %v4401_v48 = vpop.permute.xlu1 %4400 }
0x1170   :  { %v4403_v60 = vsel %vm756_vm1, %v4390_v53, %v4401_v48  ;;  %v7671_v53 = vld [vmem:[#allocation22_spill] sm:$0xff]  ;;  %v7672_v48 = vld [vmem:[#allocation8_spill] sm:$0xff] }
0x1171   :  { %v4405_v55 = vsel %vm27_vm2, %v4403_v60, 0  ;;  %v7673_v60 = vld [vmem:[#allocation9_spill] sm:$0xff] }
0x1172   :  { %v7180_v39 = vand.u32 4294901760, %v4405_v55 }
0x1174   :  { %v4489_v28 = vsub.f32 %v4405_v55, %v7180_v39  ;;  %4645 = vmatmul.mubr.f32.vlgmr.msra.gmra.mxu1 %v7180_v39  ;;  %v7674_v55 = vld [vmem:[#allocation13_spill] sm:$0xff] }
0x1175   :  { %4775 = vmatpush1.msra.mxu1 %v6077_v5  ;;  %4836 = vmatprep.mubr.f32.mxu1 %v7532_v27 }
0x1176   :  { %v4490_v51 = vand.u32 4294901760, %v4489_v28  ;;  %4777 = vmatprep.subr.mxu1 %v6079_v6 }
0x1177   :  { %4779 = vmatpush1.msra.mxu1 %v6090_v10 }
0x1178   :  { %4781 = vmatprep.subr.mxu1 %v6092_v11  ;;  %v4491_v56 = vsub.f32 %v4489_v28, %v4490_v51 }
0x1179   :  { %4783 = vmatpush1.msra.mxu1 %v6094_v12 }
0x117a   :  { %4785 = vmatprep.subr.mxu1 %v6106_v16  ;;  %v4492_v7 = vand.u32 4294901760, %v4491_v56  ;;  %v7677_v56 = vld [vmem:[#allocation17_spill] sm:$0xff] }
0x117b   :  { %4787 = vmatpush1.msra.mxu1 %v6108_v17 }
0x117c   :  { %4789 = vmatprep.subr.mxu1 %v6110_v18  ;;  %4493 = vmatmul.mubr.f32.vlgmr.msra.gmra.mxu0 %v4492_v7  ;;  %v7678_v7 = vld [vmem:[#allocation19_spill] sm:$0xff] }
0x117d   :  { %4672 = vmatpush1.msra.mxu0 %v6128_v24  ;;  %4791 = vmatpush1.msra.mxu1 %v6125_v23 }
0x117e   :  { %4675 = vmatprep.subr.mxu0 %v6133_v26  ;;  %4793 = vmatprep.subr.mxu1 %v6130_v25 }
0x117f   :  { %4678 = vmatpush1.msra.mxu0 %v6153_v32  ;;  %4795 = vmatpush1.msra.mxu1 %v6150_v31 }
0x1180   :  { %4681 = vmatprep.subr.mxu0 %v6165_v36  ;;  %4797 = vmatprep.subr.mxu1 %v6155_v33 }
0x1181   :  { %4684 = vmatpush1.msra.mxu0 %v6181_v41  ;;  %4799 = vmatpush1.msra.mxu1 %v6167_v37 }
0x1182   :  { %4687 = vmatprep.subr.mxu0 %v6195_v46  ;;  %4801 = vmatprep.subr.mxu1 %v6184_v42 }
0x1183   :  { %4690 = vmatpush1.msra.mxu0 %v6225_v57  ;;  %4803 = vmatpush1.msra.mxu1 %v6206_v50 }
0x1184   :  { %4693 = vmatprep.subr.mxu0 %v6228_v58  ;;  %4840 = vmatmul.mubr.f32.vlgmr.msra.gmra.mxu1 %v4490_v51  ;;  %v7676_v51 = vld [vmem:[#allocation16_spill] sm:$0xff] }
0x1185   :  { %4983 = vmatprep.subr.mxu1 %v6075_v4  ;;  %4696 = vmatpush1.msra.mxu0 %v6237_v61 }
0x1186   :  { %4985 = vmatpush1.msra.mxu1 %v6077_v5  ;;  %4699 = vmatprep.subr.mxu0 %v6240_v62 }
0x1187   :  { %4987 = vmatprep.subr.mxu1 %v6079_v6  ;;  %4702 = vmatpush1.msra.mxu0 %v6253_v2 }
0x1188   :  { %4989 = vmatpush1.msra.mxu1 %v6090_v10  ;;  %4705 = vmatprep.subr.mxu0 %v6266_v13 }
0x1189   :  { %4991 = vmatprep.subr.mxu1 %v6092_v11  ;;  %4708 = vmatpush1.msra.mxu0 %v6278_v21 }
0x118a   :  { %4993 = vmatpush1.msra.mxu1 %v6094_v12  ;;  %4711 = vmatprep.subr.mxu0 %v6291_v43 }
0x118b   :  { %4995 = vmatprep.subr.mxu1 %v6106_v16  ;;  %4714 = vmatpush1.msra.mxu0 %v6322_v22 }
0x118c   :  { %4747 = vmatprep.mubr.f32.mxu0 %v7532_v27  ;;  %4997 = vmatpush1.msra.mxu1 %v6108_v17 }
0x118d   :  { %4750 = vmatmul.mubr.f32.vlgmr.msra.gmra.mxu0 %v4489_v28  ;;  %4865 = vmatprep.subr.mxu0 %v6148_v30  ;;  %v7675_v28 = vld [vmem:[#allocation14_spill] sm:$0xff] }
0x118e   :  { %4999 = vmatprep.subr.mxu1 %v6110_v18  ;;  %4869 = vmatpush1.msra.mxu0 %v6159_v34 }
0x118f   :  { %5001 = vmatpush1.msra.mxu1 %v6125_v23  ;;  %4873 = vmatprep.subr.mxu0 %v6162_v35 }
0x1190   :  { %5003 = vmatprep.subr.mxu1 %v6130_v25  ;;  %4877 = vmatpush1.msra.mxu0 %v6178_v40 }
0x1191   :  { %5005 = vmatpush1.msra.mxu1 %v6150_v31  ;;  %4881 = vmatprep.subr.mxu0 %v6192_v45 }
0x1192   :  { %5007 = vmatprep.subr.mxu1 %v6155_v33  ;;  %4885 = vmatpush1.msra.mxu0 %v6203_v49 }
0x1193   :  { %5009 = vmatpush1.msra.mxu1 %v6167_v37  ;;  %4889 = vmatprep.subr.mxu0 %v6216_v54 }
0x1194   :  { %5011 = vmatprep.subr.mxu1 %v6184_v42  ;;  %4893 = vmatpush1.msra.mxu0 %v6247_v0 }
0x1195   :  { %5013 = vmatpush1.msra.mxu1 %v6206_v50  ;;  %5046 = vmatprep.mubr.f32.mxu1 %v7532_v27 }
0x1196   :  { %4897 = vmatprep.subr.mxu0 %v6250_v1  ;;  %5048 = vmatmul.mubr.f32.vlgmr.msra.gmra.mxu1 %v7180_v39 }
0x1197   :  { %4901 = vmatpush1.msra.mxu0 %v6260_v8  ;;  %4958 = vmatprep.mubr.f32.mxu0 %v7532_v27 }
0x1198   :  { %4905 = vmatprep.subr.mxu0 %v7661_v19  ;;  %5248 = vmatprep.subr.mxu1 %v7662_v14  ;;  %v7680_v14 = vld [vmem:[#allocation21_spill] sm:$0xff] }
0x1199   :  { %4909 = vmatpush1.msra.mxu0 %v7663_v47  ;;  %5254 = vmatpush1.msra.mxu1 %v7664_v3  ;;  %v7681_v3 = vld [vmem:[#allocation23_spill] sm:$0xff]  ;;  %v5900_v47 = vld [vmem:[%s7458_s0 + $0x18] sm:$0xf] }
0x119a   :  { %4913 = vmatprep.subr.mxu0 %v7665_v38  ;;  %5260 = vmatprep.subr.mxu1 %v7666_v59  ;;  %v7682_v59 = vld [vmem:[#allocation24_spill] sm:$0xff] }
0x119b   :  { %4917 = vmatpush1.msra.mxu0 %v7667_v63  ;;  %5266 = vmatpush1.msra.mxu1 %v7668_v29  ;;  %v7683_v29 = vld [vmem:[#allocation2_spill] sm:$0xff] }
0x119c   :  { %4921 = vmatprep.subr.mxu0 %v7669_v15  ;;  %5272 = vmatprep.subr.mxu1 %v7670_v52  ;;  %v5902_v63 = vld.sshfl [vmem:[%s7458_s0 + $0x4] sm:$0x33 pattern:$0x76325410] }
0x119d   :  { %4925 = vmatpush1.msra.mxu0 %v7671_v53  ;;  %5278 = vmatpush1.msra.mxu1 %v7672_v48 }
0x119e   :  { %4960 = vmatmul.mubr.f32.vlgmr.msra.gmra.mxu0 %v7180_v39  ;;  %5284 = vmatprep.subr.mxu1 %v7673_v60  ;;  %v7679_v39 = vld [vmem:[#allocation20_spill] sm:$0xff] }
0x119f   :  { %5290 = vmatpush1.msra.mxu1 %v7674_v55  ;;  %5152 = vmatprep.subr.mxu0 %v6075_v4 }
0x11a0   :  { %5296 = vmatprep.subr.mxu1 %v7675_v28  ;;  %5154 = vmatpush1.msra.mxu0 %v6077_v5 }
0x11a1   :  { %5302 = vmatpush1.msra.mxu1 %v7676_v51  ;;  %5156 = vmatprep.subr.mxu0 %v6079_v6 }
0x11a2   :  { %5308 = vmatprep.subr.mxu1 %v7677_v56  ;;  %5158 = vmatpush1.msra.mxu0 %v6090_v10 }
0x11a3   :  { %5314 = vmatpush1.msra.mxu1 %v7678_v7  ;;  %5160 = vmatprep.subr.mxu0 %v6092_v11 }
0x11a4   :  { %5320 = vmatprep.subr.mxu1 %v7679_v39  ;;  %5162 = vmatpush1.msra.mxu0 %v6094_v12 }
0x11a5   :  { %5326 = vmatpush1.msra.mxu1 %v7680_v14  ;;  %5164 = vmatprep.subr.mxu0 %v6106_v16 }
0x11a6   :  { %5332 = vmatprep.subr.mxu1 %v7681_v3  ;;  %5166 = vmatpush1.msra.mxu0 %v6108_v17 }
0x11a7   :  { %5338 = vmatpush1.msra.mxu1 %v7682_v59  ;;  %5168 = vmatprep.subr.mxu0 %v6110_v18 }
0x11a8   :  { %5371 = vmatprep.mubr.f32.mxu1 %v7532_v27  ;;  %5501 = vmatprep.subr.mxu1 %v6075_v4 }
0x11a9   :  { %5170 = vmatpush1.msra.mxu0 %v6125_v23  ;;  %5215 = vmatprep.mubr.f32.mxu0 %v7532_v27 }
0x11aa   :  { %5172 = vmatprep.subr.mxu0 %v6130_v25 }
0x11ab   :  { %5174 = vmatpush1.msra.mxu0 %v6150_v31 }
0x11ac   :  { %5176 = vmatprep.subr.mxu0 %v6155_v33 }
0x11ad   :  { %5178 = vmatpush1.msra.mxu0 %v6167_v37 }
0x11ae   :  { %5180 = vmatprep.subr.mxu0 %v6184_v42 }
0x11af   :  { %5182 = vmatpush1.msra.mxu0 %v6206_v50 }
0x11b0   :  { %5397 = vmatprep.subr.mxu0 %v7683_v29 }
0x1234   :  { %v4646_v48 = vpop.f32.mrf.mxu1 }
0x1236   :  { %v4648_v28 = vpop.f32.mrf.mxu1 }
0x123c   :  { %v4494_v52 = vpop.f32.mrf.mxu0 }
0x123d   :  { %v4647_v51 = vadd.f32 %v4646_v48, %v4494_v52 }
0x123e   :  { %v4496_v60 = vpop.f32.mrf.mxu0 }
0x123f   :  { %v4649_v39 = vadd.f32 %v4648_v28, %v4496_v60  ;;  %v5065_v60 = vcombine.high %v5902_v63, %v5902_v63 }
0x1244   :  { %v4841_v56 = vpop.f32.mrf.mxu1 }
0x1246   :  { %v4843_v59 = vpop.f32.mrf.mxu1 }
0x124d   :  { %v4751_v55 = vpop.f32.mrf.mxu0 }
0x124e   :  { %v4752_v14 = vadd.f32 %v4751_v55, %v4647_v51 }
0x124f   :  { %v4753_v7 = vpop.f32.mrf.mxu0 }
0x1250   :  { %v4754_v3 = vadd.f32 %v4753_v7, %v4649_v39  ;;  %v4842_v20 = vadd.f32 %v4841_v56, %v4752_v14 }
0x1252   :  { %v4844_v38 = vadd.f32 %v4843_v59, %v4754_v3 }
0x1256   :  { %v5049_v53 = vpop.f32.mrf.mxu1 }
0x1258   :  { %v5051_v55 = vpop.f32.mrf.mxu1 }
0x125e   :  { %v4961_v15 = vpop.f32.mrf.mxu0 }
0x125f   :  { %v4962_v29 = vadd.f32 %v4961_v15, %v4842_v20 }
0x1260   :  { %v4963_v52 = vpop.f32.mrf.mxu0 }
0x1261   :  { %v5050_v48 = vadd.f32 %v5049_v53, %v4962_v29  ;;  %v4964_v19 = vadd.f32 %v4963_v52, %v4844_v38 }
0x1263   :  { %v5056_v28 = vadd.f32 %v5900_v47, %v5050_v48  ;;  %v5052_v51 = vadd.f32 %v5051_v55, %v4964_v19 }
0x1265   :  { %6013 = vtanh.f32 %v5056_v28  ;;  %v5067_v56 = vadd.f32 %v5065_v60, %v5052_v51  ;;  %v5903_v20 = vmul.f32 -1.442695, %v5056_v28 }
0x1267   :  { %6015 = vtanh.f32 %v5067_v56  ;;  %v5904_v15 = vmul.f32 -1.442695, %v5067_v56 }
0x1268   :  { %6017 = vpow2.f32 %v5903_v20 }
0x1269   :  { %6019 = vpow2.f32 %v5904_v15 }
0x1272   :  { %v6014_v7 = vpop.eup %6013 }
0x1273   :  { %5084 = vrot.lane.b32.xlu0 %v6014_v7, %s6046_s16 }
0x1274   :  { %v6016_v39 = vpop.eup %6015 }
0x1275   :  { %5095 = vrot.lane.b32.xlu1 %v6016_v39, %s6046_s16  ;;  %v6018_v14 = vpop.eup %6017 }
0x1276   :  { %v6020_v53 = vpop.eup %6019  ;;  %v5071_v38 = vadd.f32 1.0, %v6018_v14 }
0x1277   :  { %v5077_v63 = vadd.f32 1.0, %v6020_v53 }
0x1278   :  { %6021 = vrcp.f32 %v5071_v38 }
0x1279   :  { %6023 = vrcp.f32 %v5077_v63 }
0x1285   :  { %v6022_v19 = vpop.eup %6021 }
0x1286   :  { %v6024_v59 = vpop.eup %6023  ;;  %v5082_v48 = vmul.f32 %v6022_v19, %v7160_v44 }
0x1287   :  { %v5093_v28 = vmul.f32 %v6024_v59, %v7164_v9 }
0x12e5   :  { %v5085_v47 = vpop.permute.xlu0 %5084 }
0x12e6   :  { %v5087_v3 = vmul.f32 %v6022_v19, %v5085_v47 }
0x12e7   :  { %v5096_v29 = vpop.permute.xlu1 %5095 }
0x12e8   :  { %5089 = vrot.lane.b32.xlu0 %v5087_v3, %s6046_s16  ;;  %v5098_v52 = vmul.f32 %v6024_v59, %v5096_v29 }
0x12ea   :  { %5100 = vrot.lane.b32.xlu1 %v5098_v52, %s6046_s16 }
0x135a   :  { %v5090_v60 = vpop.permute.xlu0 %5089 }
0x135b   :  { %v7299_v55 = vadd.f32 %v5090_v60, %v5082_v48 }
0x135c   :  { %v5101_v51 = vpop.permute.xlu1 %5100 }
0x135d   :  { %6025 = vtanh.f32 %v7299_v55  ;;  %v7303_v56 = vadd.f32 %v5101_v51, %v5093_v28 }
0x135f   :  { %6027 = vtanh.f32 %v7303_v56 }
0x136a   :  { %v6026_v7 = vpop.eup %6025 }
0x136b   :  { %5106 = vrot.lane.b32.xlu0 %v6026_v7, %s6046_s16 }
0x136c   :  { %v6028_v39 = vpop.eup %6027 }
0x136d   :  { %5112 = vrot.lane.b32.xlu1 %v6028_v39, %s6046_s16 }
0x13dd   :  { %v5107_v20 = vpop.permute.xlu0 %5106 }
0x13de   :  { %v5109_v44 = vmul.f32 %v6022_v19, %v5107_v20 }
0x13df   :  { %v5113_v15 = vpop.permute.xlu1 %5112 }
0x13e0   :  { %5117 = vrot.lane.b32.xlu0 %v5109_v44, %s6047_s17  ;;  %v7309_v14 = vmul.f32 %v6024_v59, %v5113_v15 }
0x13e2   :  { %5128 = vrot.lane.b32.xlu1 %v7309_v14, %s6048_s18 }
0x1452   :  { %v5118_v9 = vpop.permute.xlu0 %5117 }
0x1453   :  { %5905 = vst.msk [vmem:[%s7459_s2 + $0xc] sm:$0x3] %vm745_vm0, %v5118_v9 }
0x1454   :  { %v5129_v53 = vpop.permute.xlu1 %5128 }
0x1455   :  { %v5131_v38 = vsel %vm756_vm1, %v5118_v9, %v5129_v53 }
0x1456   :  { %v5133_v63 = vsel %vm27_vm2, %v5131_v38, 0 }
0x1457   :  { %v7319_v19 = vand.u32 4294901760, %v5133_v63 }
0x1459   :  { %v5217_v47 = vsub.f32 %v5133_v63, %v7319_v19  ;;  %5373 = vmatmul.mubr.f32.vlgmr.msra.gmra.mxu1 %v7319_v19  ;;  %v7690_v63 = vld [vmem:[#allocation25_spill] sm:$0xff] }
0x145a   :  { %5503 = vmatpush1.msra.mxu1 %v6077_v5  ;;  %5564 = vmatprep.mubr.f32.mxu1 %v7532_v27 }
0x145b   :  { %v5218_v3 = vand.u32 4294901760, %v5217_v47  ;;  %5505 = vmatprep.subr.mxu1 %v6079_v6 }
0x145c   :  { %5507 = vmatpush1.msra.mxu1 %v6090_v10 }
0x145d   :  { %5509 = vmatprep.subr.mxu1 %v6092_v11  ;;  %v5219_v59 = vsub.f32 %v5217_v47, %v5218_v3 }
0x145e   :  { %5511 = vmatpush1.msra.mxu1 %v6094_v12 }
0x145f   :  { %5513 = vmatprep.subr.mxu1 %v6106_v16  ;;  %v5220_v29 = vand.u32 4294901760, %v5219_v59 }
0x1460   :  { %5515 = vmatpush1.msra.mxu1 %v6108_v17 }
0x1461   :  { %5517 = vmatprep.subr.mxu1 %v6110_v18  ;;  %5221 = vmatmul.mubr.f32.vlgmr.msra.gmra.mxu0 %v5220_v29 }
0x1462   :  { %5400 = vmatpush1.msra.mxu0 %v6128_v24  ;;  %5519 = vmatpush1.msra.mxu1 %v6125_v23 }
0x1463   :  { %5403 = vmatprep.subr.mxu0 %v6133_v26  ;;  %5521 = vmatprep.subr.mxu1 %v6130_v25 }
0x1464   :  { %5406 = vmatpush1.msra.mxu0 %v6153_v32  ;;  %5523 = vmatpush1.msra.mxu1 %v6150_v31 }
0x1465   :  { %5409 = vmatprep.subr.mxu0 %v6165_v36  ;;  %5525 = vmatprep.subr.mxu1 %v6155_v33 }
0x1466   :  { %5412 = vmatpush1.msra.mxu0 %v6181_v41  ;;  %5527 = vmatpush1.msra.mxu1 %v6167_v37 }
0x1467   :  { %5415 = vmatprep.subr.mxu0 %v6195_v46  ;;  %5529 = vmatprep.subr.mxu1 %v6184_v42 }
0x1468   :  { %5418 = vmatpush1.msra.mxu0 %v6225_v57  ;;  %5531 = vmatpush1.msra.mxu1 %v6206_v50 }
0x1469   :  { %5421 = vmatprep.subr.mxu0 %v6228_v58  ;;  %5568 = vmatmul.mubr.f32.vlgmr.msra.gmra.mxu1 %v5218_v3  ;;  %v7695_v3 = vld [vmem:[#allocation30_spill] sm:$0xff] }
0x146a   :  { %5711 = vmatprep.subr.mxu1 %v6075_v4  ;;  %5424 = vmatpush1.msra.mxu0 %v6237_v61  ;;  %v7684_v4 = vld [vmem:[#allocation10_spill] sm:$0xff] }
0x146b   :  { %5713 = vmatpush1.msra.mxu1 %v6077_v5  ;;  %5427 = vmatprep.subr.mxu0 %v6240_v62  ;;  %v7685_v5 = vld [vmem:[#allocation11_spill] sm:$0xff] }
0x146c   :  { %5715 = vmatprep.subr.mxu1 %v6079_v6  ;;  %5430 = vmatpush1.msra.mxu0 %v6253_v2  ;;  %v7686_v6 = vld [vmem:[#allocation12_spill] sm:$0xff] }
0x146d   :  { %5717 = vmatpush1.msra.mxu1 %v6090_v10  ;;  %5433 = vmatprep.subr.mxu0 %v6266_v13  ;;  %v7687_v10 = vld [vmem:[#allocation15_spill] sm:$0xff] }
0x146e   :  { %5719 = vmatprep.subr.mxu1 %v6092_v11  ;;  %5436 = vmatpush1.msra.mxu0 %v6278_v21  ;;  %v7688_v11 = vld [vmem:[#allocation18_spill] sm:$0xff] }
0x146f   :  { %5721 = vmatpush1.msra.mxu1 %v6094_v12  ;;  %5439 = vmatprep.subr.mxu0 %v6291_v43  ;;  %v7689_v12 = vld [vmem:[#allocation22_spill] sm:$0xff] }
0x1470   :  { %5723 = vmatprep.subr.mxu1 %v6106_v16  ;;  %5442 = vmatpush1.msra.mxu0 %v6322_v22 }
0x1471   :  { %5475 = vmatprep.mubr.f32.mxu0 %v7532_v27  ;;  %5725 = vmatpush1.msra.mxu1 %v6108_v17 }
0x1472   :  { %5478 = vmatmul.mubr.f32.vlgmr.msra.gmra.mxu0 %v5217_v47  ;;  %5593 = vmatprep.subr.mxu0 %v6148_v30  ;;  %v7694_v47 = vld [vmem:[#allocation29_spill] sm:$0xff] }
0x1473   :  { %5727 = vmatprep.subr.mxu1 %v6110_v18  ;;  %5597 = vmatpush1.msra.mxu0 %v6159_v34 }
0x1474   :  { %5729 = vmatpush1.msra.mxu1 %v6125_v23  ;;  %5601 = vmatprep.subr.mxu0 %v6162_v35 }
0x1475   :  { %5731 = vmatprep.subr.mxu1 %v6130_v25  ;;  %5605 = vmatpush1.msra.mxu0 %v6178_v40  ;;  %v5908_v40 = vld.sshfl [vmem:[%s7458_s0] sm:$0x33 pattern:$0x76325410] }
0x1476   :  { %5733 = vmatpush1.msra.mxu1 %v6150_v31  ;;  %5609 = vmatprep.subr.mxu0 %v6192_v45  ;;  %v5907_v45 = vld [vmem:[%s7458_s0 + $0x1c] sm:$0xf] }
0x1477   :  { %5735 = vmatprep.subr.mxu1 %v6155_v33  ;;  %5613 = vmatpush1.msra.mxu0 %v6203_v49 }
0x1478   :  { %5737 = vmatpush1.msra.mxu1 %v6167_v37  ;;  %5617 = vmatprep.subr.mxu0 %v6216_v54  ;;  %v5793_v54 = vcombine.high %v5908_v40, %v5908_v40 }
0x1479   :  { %5739 = vmatprep.subr.mxu1 %v6184_v42  ;;  %5621 = vmatpush1.msra.mxu0 %v6247_v0 }
0x147a   :  { %5741 = vmatpush1.msra.mxu1 %v6206_v50  ;;  %5774 = vmatprep.mubr.f32.mxu1 %v7532_v27 }
0x147b   :  { %5625 = vmatprep.subr.mxu0 %v6250_v1  ;;  %5776 = vmatmul.mubr.f32.vlgmr.msra.gmra.mxu1 %v7319_v19 }
0x147c   :  { %5629 = vmatpush1.msra.mxu0 %v6260_v8  ;;  %5686 = vmatprep.mubr.f32.mxu0 %v7532_v27 }
0x147d   :  { %5633 = vmatprep.subr.mxu0 %v7684_v4 }
0x147e   :  { %5637 = vmatpush1.msra.mxu0 %v7685_v5 }
0x147f   :  { %5641 = vmatprep.subr.mxu0 %v7686_v6 }
0x1480   :  { %5645 = vmatpush1.msra.mxu0 %v7687_v10 }
0x1481   :  { %5649 = vmatprep.subr.mxu0 %v7688_v11 }
0x1482   :  { %5653 = vmatpush1.msra.mxu0 %v7689_v12 }
0x1483   :  { %5688 = vmatmul.mubr.f32.vlgmr.msra.gmra.mxu0 %v7319_v19  ;;  %v7691_v19 = vld [vmem:[#allocation26_spill] sm:$0xff] }
0x1519   :  { %v5374_v17 = vpop.f32.mrf.mxu1 }
0x151b   :  { %v5376_v24 = vpop.f32.mrf.mxu1 }
0x1521   :  { %v5222_v16 = vpop.f32.mrf.mxu0 }
0x1522   :  { %v5375_v25 = vadd.f32 %v5374_v17, %v5222_v16 }
0x1523   :  { %v5224_v18 = vpop.f32.mrf.mxu0 }
0x1524   :  { %v5377_v31 = vadd.f32 %v5376_v24, %v5224_v18 }
0x1529   :  { %v5569_v26 = vpop.f32.mrf.mxu1 }
0x152b   :  { %v5571_v34 = vpop.f32.mrf.mxu1 }
0x1532   :  { %v5479_v23 = vpop.f32.mrf.mxu0 }
0x1533   :  { %v5480_v32 = vadd.f32 %v5479_v23, %v5375_v25 }
0x1534   :  { %v5481_v30 = vpop.f32.mrf.mxu0 }
0x1535   :  { %v5482_v33 = vadd.f32 %v5481_v30, %v5377_v31  ;;  %v5570_v35 = vadd.f32 %v5569_v26, %v5480_v32 }
0x1537   :  { %v5572_v42 = vadd.f32 %v5571_v34, %v5482_v33 }
0x153b   :  { %v5777_v36 = vpop.f32.mrf.mxu1 }
0x153d   :  { %v5779_v57 = vpop.f32.mrf.mxu1 }
0x1543   :  { %v5689_v37 = vpop.f32.mrf.mxu0 }
0x1544   :  { %v5690_v41 = vadd.f32 %v5689_v37, %v5570_v35 }
0x1545   :  { %v5691_v46 = vpop.f32.mrf.mxu0 }
0x1546   :  { %v5778_v49 = vadd.f32 %v5777_v36, %v5690_v41  ;;  %v5692_v50 = vadd.f32 %v5691_v46, %v5572_v42 }
0x1548   :  { %v5784_v58 = vadd.f32 %v5907_v45, %v5778_v49  ;;  %v5780_v61 = vadd.f32 %v5779_v57, %v5692_v50 }
0x154a   :  { %6029 = vtanh.f32 %v5784_v58  ;;  %v5795_v62 = vadd.f32 %v5793_v54, %v5780_v61  ;;  %v5909_v2 = vmul.f32 -1.442695, %v5784_v58 }
0x154c   :  { %6031 = vtanh.f32 %v5795_v62  ;;  %v5910_v8 = vmul.f32 -1.442695, %v5795_v62 }
0x154d   :  { %6033 = vpow2.f32 %v5909_v2 }
0x154e   :  { %6035 = vpow2.f32 %v5910_v8 }
0x1557   :  { %v6030_v0 = vpop.eup %6029 }
0x1558   :  { %5812 = vrot.lane.b32.xlu0 %v6030_v0, %s6046_s16 }
0x1559   :  { %v6032_v1 = vpop.eup %6031 }
0x155a   :  { %5823 = vrot.lane.b32.xlu1 %v6032_v1, %s6046_s16  ;;  %v6034_v13 = vpop.eup %6033 }
0x155b   :  { %v6036_v21 = vpop.eup %6035  ;;  %v5799_v43 = vadd.f32 1.0, %v6034_v13 }
0x155c   :  { %v5805_v22 = vadd.f32 1.0, %v6036_v21 }
0x155d   :  { %6037 = vrcp.f32 %v5799_v43 }
0x155e   :  { %6039 = vrcp.f32 %v5805_v22 }
0x156a   :  { %v6038_v27 = vpop.eup %6037 }
0x156b   :  { %v6040_v60 = vpop.eup %6039  ;;  %v5810_v7 = vmul.f32 %v6038_v27, %v7299_v55  ;;  %v7692_v55 = vld [vmem:[#allocation27_spill] sm:$0xff] }
0x156c   :  { %v5821_v44 = vmul.f32 %v6040_v60, %v7303_v56  ;;  %v7693_v56 = vld [vmem:[#allocation28_spill] sm:$0xff] }
0x15ca   :  { %v5813_v52 = vpop.permute.xlu0 %5812 }
0x15cb   :  { %v5815_v48 = vmul.f32 %v6038_v27, %v5813_v52 }
0x15cc   :  { %v5824_v28 = vpop.permute.xlu1 %5823 }
0x15cd   :  { %5817 = vrot.lane.b32.xlu0 %v5815_v48, %s6046_s16  ;;  %v5826_v51 = vmul.f32 %v6040_v60, %v5824_v28 }
0x15cf   :  { %5828 = vrot.lane.b32.xlu1 %v5826_v51, %s6046_s16 }
0x163f   :  { %v5818_v39 = vpop.permute.xlu0 %5817 }
0x1640   :  { %v5820_v20 = vadd.f32 %v5818_v39, %v5810_v7 }
0x1641   :  { %v5829_v15 = vpop.permute.xlu1 %5828 }
0x1642   :  { %6041 = vtanh.f32 %v5820_v20  ;;  %v5831_v9 = vadd.f32 %v5829_v15, %v5821_v44 }
0x1644   :  { %6043 = vtanh.f32 %v5831_v9 }
0x164f   :  { %v6042_v53 = vpop.eup %6041 }
0x1650   :  { %5834 = vrot.lane.b32.xlu0 %v6042_v53, %s6046_s16 }
0x1651   :  { %v6044_v38 = vpop.eup %6043 }
0x1652   :  { %5840 = vrot.lane.b32.xlu1 %v6044_v38, %s6046_s16 }
0x1654   :  { %748 = vrot.lane.b32.xlu0 %v7690_v63, %s6047_s17 }
0x1656   :  { %1479 = vrot.lane.b32.xlu1 %v7691_v19, %s6047_s17 }
0x1658   :  { %2209 = vrot.lane.b32.xlu0 %v7692_v55, %s6047_s17 }
0x165a   :  { %2939 = vrot.lane.b32.xlu1 %v7693_v56, %s6047_s17 }
0x165c   :  { %3667 = vrot.lane.b32.xlu0 %v7694_v47, %s6047_s17 }
0x165e   :  { %4395 = vrot.lane.b32.xlu1 %v7695_v3, %s6047_s17 }
0x1660   :  { %5123 = vrot.lane.b32.xlu0 %v7309_v14, %s6047_s17 }
0x16c2   :  { %v5835_v59 = vpop.permute.xlu0 %5834 }
0x16c3   :  { %v5837_v29 = vmul.f32 %v6038_v27, %v5835_v59 }
0x16c4   :  { %v5841_v4 = vpop.permute.xlu1 %5840 }
0x16c5   :  { %5845 = vrot.lane.b32.xlu1 %v5837_v29, %s6047_s17  ;;  %v5843_v5 = vmul.f32 %v6040_v60, %v5841_v4 }
0x16c6   :  { %v749_v6 = vpop.permute.xlu0 %748 }
0x16c7   :  { %5864 = vst.msk [vmem:[%s7459_s2 + $0x1e] sm:$0x3] %vm745_vm0, %v749_v6  ;;  %5851 = vrot.lane.b32.xlu0 %v5843_v5, %s6047_s17 }
0x16c8   :  { %v1480_v10 = vpop.permute.xlu1 %1479 }
0x16c9   :  { %5871 = vst.msk [vmem:[%s7459_s2 + $0x1c] sm:$0x3] %vm745_vm0, %v1480_v10 }
0x16ca   :  { %v2210_v14 = vpop.permute.xlu0 %2209 }
0x16cb   :  { %5878 = vst.msk [vmem:[%s7459_s2 + $0x1a] sm:$0x3] %vm745_vm0, %v2210_v14 }
0x16cc   :  { %v2940_v11 = vpop.permute.xlu1 %2939 }
0x16cd   :  { %5885 = vst.msk [vmem:[%s7459_s2 + $0x18] sm:$0x3] %vm745_vm0, %v2940_v11 }
0x16ce   :  { %v3668_v12 = vpop.permute.xlu0 %3667 }
0x16cf   :  { %5892 = vst.msk [vmem:[%s7459_s2 + $0x16] sm:$0x3] %vm745_vm0, %v3668_v12 }
0x16d0   :  { %v4396_v16 = vpop.permute.xlu1 %4395 }
0x16d1   :  { %5899 = vst.msk [vmem:[%s7459_s2 + $0x14] sm:$0x3] %vm745_vm0, %v4396_v16 }
0x16d2   :  { %v5124_v17 = vpop.permute.xlu0 %5123 }
0x16d3   :  { %5906 = vst.msk [vmem:[%s7459_s2 + $0x12] sm:$0x3] %vm745_vm0, %v5124_v17 }
0x1737   :  { %v5846_v18 = vpop.permute.xlu1 %5845 }
0x1738   :  { %5911 = vst.msk [vmem:[%s7459_s2 + $0xe] sm:$0x3] %vm745_vm0, %v5846_v18 }
0x1739   :  { %v5852_v23 = vpop.permute.xlu0 %5851 }
0x173a   :  { %5912 = vst.msk [vmem:[%s7459_s2 + $0x10] sm:$0x3] %vm745_vm0, %v5852_v23 }

</bundles_post_ra>
